<compile_context>
chip_gen: v5e
topology: v5e:2x2
jax: 0.10.0
libtpu: 0.0.40
codegen_flags: <defaults>
</compile_context>

<pallas_src>
import math

import jax
import jax.numpy as jnp
from jax.experimental import pallas as pl
from jax.experimental.pallas import tpu as pltpu


def abmil_kernel(x_ref,
                 w1_ref, b1_ref, w2_ref, b2_ref, w3_ref, b3_ref,
                 wa_ref, ba_ref, wvt_ref, bv_ref,
                 wd_ref, bd_ref, wf_ref, bf_ref,
                 out_ref):
    """One grid step = TB bags.  x_ref: (TB, N, dim_in) bfloat16."""
    f32 = jnp.float32
    bf16 = jnp.bfloat16

    TB, N, dim_in = x_ref.shape
    L = w1_ref.shape[1]
    K = wvt_ref.shape[0]
    dim_out = wf_ref.shape[1]

    # --- encoder: 3x (Linear + ReLU) over all TB*N instances (MXU bf16 in / f32 acc) ---
    x2 = x_ref[...].reshape(TB * N, dim_in)
    h = jnp.maximum(
        jnp.dot(x2, w1_ref[...], preferred_element_type=f32) + b1_ref[...], 0.0)
    h = jnp.maximum(
        jnp.dot(h.astype(bf16), w2_ref[...], preferred_element_type=f32) + b2_ref[...], 0.0)
    h = jnp.maximum(
        jnp.dot(h.astype(bf16), w3_ref[...], preferred_element_type=f32) + b3_ref[...], 0.0)   # (TB*N, L) f32

    # --- attention: Linear -> Tanh (MXU + EUP), then the K-wide projection on the VPU ---
    a = jnp.tanh(
        jnp.dot(h.astype(bf16), wa_ref[...], preferred_element_type=f32) + ba_ref[...])        # (TB*N, D) f32

    wvt = wvt_ref[...]                                               # (K, D) f32
    cols = [jnp.sum(a * wvt[k:k + 1, :], axis=-1, keepdims=True) for k in range(K)]
    scores = (cols[0] if K == 1 else jnp.concatenate(cols, axis=-1)) + bv_ref[...]             # (TB*N, K)

    # --- per-bag softmax over instances (torch: A.T, softmax(dim=1), then / sqrt(N)) ---
    s3 = scores.reshape(TB, N, K)
    s_max = jnp.max(s3, axis=1, keepdims=True)
    e = jnp.exp(s3 - s_max)
    denom = jnp.sum(e, axis=1, keepdims=True)
    inv = pl.reciprocal(denom, approx=True) * (1.0 / math.sqrt(float(N)))
    attn = e * inv                                                   # (TB, N, K)

    # --- softmax-weighted pooling: M[b,k,:] = sum_n attn[b,n,k] * H[b,n,:]  (VPU + XLU reduce) ---
    h3 = h.reshape(TB, N, L)
    pooled = [jnp.sum(attn[:, :, k:k + 1] * h3, axis=1) for k in range(K)]   # K x (TB, L)
    m2 = pooled[0] if K == 1 else jnp.stack(pooled, axis=1).reshape(TB * K, L)               # (TB*K, L)

    # --- decoder (Linear + ReLU) and final fc ---
    dec = jnp.maximum(
        jnp.dot(m2.astype(bf16), wd_ref[...], preferred_element_type=f32) + bd_ref[...], 0.0)
    out = jnp.dot(dec.astype(bf16), wf_ref[...], preferred_element_type=f32) + bf_ref[...]   # (TB*K, dim_out)

    out_ref[...] = out.reshape(TB, K, dim_out)


def _pick_block_bags(B, N, max_rows=1024):
    """Largest divisor TB of B with TB*N <= max_rows, keeping >= 2 grid steps
    when possible so megacore / 2-TensorCore parts get work on every chip."""
    divisors = [d for d in range(1, B + 1) if B % d == 0]
    fits = [d for d in divisors if d * N <= max_rows] or [1]
    multi = [d for d in fits if B // d >= 2]
    return max(multi) if multi else max(fits)


def abmil_forward(x, params, block_bags=None):
    """x: (B, N, dim_in) float32 batch of bags.  Returns (B*K, dim_out) float32."""
    B, N, dim_in = x.shape
    L = params["w1"].shape[1]
    D = params["wa"].shape[1]
    K = params["wv"].shape[1]
    dim_out = params["wf"].shape[1]

    TB = _pick_block_bags(B, N) if block_bags is None else block_bags
    assert B % TB == 0, (B, TB)

    bf16 = jnp.bfloat16
    # bf16 for everything that feeds the MXU (also halves HBM->VMEM traffic);
    # biases and the VPU-side attention vector stay float32.
    inputs = (
        x.astype(bf16),
        params["w1"].astype(bf16), params["b1"],
        params["w2"].astype(bf16), params["b2"],
        params["w3"].astype(bf16), params["b3"],
        params["wa"].astype(bf16), params["ba"],
        jnp.transpose(params["wv"]), params["bv"],   # (K, D), used on the VPU score path
        params["wd"].astype(bf16), params["bd"],
        params["wf"].astype(bf16), params["bf"],
    )

    x_spec = pl.BlockSpec((TB, N, dim_in), lambda b: (b, 0, 0))
    out_spec = pl.BlockSpec((TB, K, dim_out), lambda b: (b, 0, 0))

    def param_specs(single_buffer):
        if single_buffer:
            # Grid-invariant operands: one VMEM buffer each instead of two.
            return [pl.BlockSpec(p.shape, lambda b: (0, 0),
                                 pipeline_mode=pl.Buffered(1)) for p in inputs[1:]]
        return [pl.BlockSpec(p.shape, lambda b: (0, 0)) for p in inputs[1:]]

    flops = int(2 * B * N * (dim_in * L + 2 * L * L + L * D + D * K)
                + 2 * B * K * (N * L + L * L + L * dim_out))
    transcendentals = int(B * N * (D + K))
    bytes_accessed = int(sum(a.size * a.dtype.itemsize for a in inputs)
                         + B * K * dim_out * 4)
    cost = pl.CostEstimate(flops=flops, transcendentals=transcendentals,
                           bytes_accessed=bytes_accessed)

    def build(single_buffer):
        return pl.pallas_call(
            abmil_kernel,
            out_shape=jax.ShapeDtypeStruct((B, K, dim_out), jnp.float32),
            grid=(B // TB,),
            in_specs=[x_spec] + param_specs(single_buffer),
            out_specs=out_spec,
            compiler_params=pltpu.CompilerParams(
                dimension_semantics=("parallel",)),
            cost_estimate=cost,
        )

    try:
        out = build(True)(*inputs)
    except Exception:
        # Fallback only for jax versions without BlockSpec pipeline_mode /
        # Buffered(1) support: identical math, default double-buffered weights.
        out = build(False)(*inputs)

    return out.reshape(B * K, dim_out)


def init_params(key, dim_in, L, D, K, dim_out):
    """Deterministic synthetic parameters (Linear weights stored (in, out))."""
    ks = jax.random.split(key, 8)

    def lin(k, fan_in, fan_out):
        kw, kb = jax.random.split(k)
        bound = 1.0 / math.sqrt(fan_in)
        w = jax.random.uniform(kw, (fan_in, fan_out), jnp.float32, -bound, bound)
        b = jax.random.uniform(kb, (1, fan_out), jnp.float32, -bound, bound)
        return w, b

    w1, b1 = lin(ks[0], dim_in, L)
    w2, b2 = lin(ks[1], L, L)
    w3, b3 = lin(ks[2], L, L)
    wa, ba = lin(ks[3], L, D)
    wv, bv = lin(ks[4], D, K)
    wd, bd = lin(ks[5], L, L)
    wf, bf = lin(ks[6], L, dim_out)
    return dict(w1=w1, b1=b1, w2=w2, b2=b2, w3=w3, b3=b3,
                wa=wa, ba=ba, wv=wv, bv=bv, wd=wd, bd=bd, wf=wf, bf=bf)


def abmil_reference(x, params):
    """Pure-JAX float32 reference mirroring the PyTorch bag_forward/batch_forward."""
    outs = []
    for b in range(x.shape[0]):
        bag = x[b]
        h = jnp.maximum(bag @ params["w1"] + params["b1"], 0.0)
        h = jnp.maximum(h @ params["w2"] + params["b2"], 0.0)
        h = jnp.maximum(h @ params["w3"] + params["b3"], 0.0)
        a = jnp.tanh(h @ params["wa"] + params["ba"]) @ params["wv"] + params["bv"]  # (N,K)
        a = a.T                                                                      # (K,N)
        a = jax.nn.softmax(a, axis=1) / math.sqrt(a.shape[-1])
        m = a @ h
        dec = jnp.maximum(m @ params["wd"] + params["bd"], 0.0)
        outs.append(dec @ params["wf"] + params["bf"])
    return jnp.concatenate(outs, axis=0)


def _run_case(seed, B, N, dim_in, L, D, K, dim_out):
    key = jax.random.PRNGKey(seed)
    kx, kp = jax.random.split(key)
    x = jax.random.normal(kx, (B, N, dim_in), dtype=jnp.float32)
    params = init_params(kp, dim_in, L, D, K, dim_out)

    out = jax.block_until_ready(abmil_forward(x, params))
    ref = abmil_reference(x, params)

    assert out.shape == (B * K, dim_out), out.shape
    # bf16 MXU operands (f32 accumulation) + approx softmax reciprocal -> loosened tolerance.
    assert jnp.allclose(out, ref, atol=5e-2, rtol=5e-2), (out, ref)


if __name__ == "__main__":
    # K = 1 (the typical ABMIL config): 16 bags x 16 instances -> TB=8, grid=(2,)
    _run_case(seed=0, B=16, N=16, dim_in=64, L=128, D=64, K=1, dim_out=2)
    # K > 1 exercises the multi-branch attention / pooling paths.
    _run_case(seed=0, B=4, N=8, dim_in=32, L=64, D=32, K=2, dim_out=3)

    print("KERNEL_OK")
</pallas_src>

<mosaic_0001>
module attributes {stable_mosaic.version = 11 : i64} {
  func.func @abmil_kernel(%arg0: i32, %arg1: memref<8x16x64xbf16, #tpu.memory_space<vmem>>, %arg2: memref<64x128xbf16, #tpu.memory_space<vmem>>, %arg3: memref<1x128xf32, #tpu.memory_space<vmem>>, %arg4: memref<128x128xbf16, #tpu.memory_space<vmem>>, %arg5: memref<1x128xf32, #tpu.memory_space<vmem>>, %arg6: memref<128x128xbf16, #tpu.memory_space<vmem>>, %arg7: memref<1x128xf32, #tpu.memory_space<vmem>>, %arg8: memref<128x64xbf16, #tpu.memory_space<vmem>>, %arg9: memref<1x64xf32, #tpu.memory_space<vmem>>, %arg10: memref<1x64xf32, #tpu.memory_space<vmem>>, %arg11: memref<1x1xf32, #tpu.memory_space<vmem>>, %arg12: memref<128x128xbf16, #tpu.memory_space<vmem>>, %arg13: memref<1x128xf32, #tpu.memory_space<vmem>>, %arg14: memref<128x2xbf16, #tpu.memory_space<vmem>>, %arg15: memref<1x2xf32, #tpu.memory_space<vmem>>, %arg16: memref<8x1x2xf32, #tpu.memory_space<vmem>>) attributes {dimension_semantics = [#tpu.dimension_semantics<parallel>], iteration_bounds = array<i64: 2>, scalar_prefetch = 0 : i64, scratch_operands = 0 : i64, tpu.core_type = #tpu.core_type<tc>, window_params = [{transform_indices = @transform_0, window_bounds = array<i64: 8, 16, 64>}, {pipeline_mode = #tpu.pipeline_mode<synchronous>, transform_indices = @transform_1, window_bounds = array<i64: 64, 128>}, {pipeline_mode = #tpu.pipeline_mode<synchronous>, transform_indices = @transform_2, window_bounds = array<i64: 1, 128>}, {pipeline_mode = #tpu.pipeline_mode<synchronous>, transform_indices = @transform_3, window_bounds = array<i64: 128, 128>}, {pipeline_mode = #tpu.pipeline_mode<synchronous>, transform_indices = @transform_4, window_bounds = array<i64: 1, 128>}, {pipeline_mode = #tpu.pipeline_mode<synchronous>, transform_indices = @transform_5, window_bounds = array<i64: 128, 128>}, {pipeline_mode = #tpu.pipeline_mode<synchronous>, transform_indices = @transform_6, window_bounds = array<i64: 1, 128>}, {pipeline_mode = #tpu.pipeline_mode<synchronous>, transform_indices = @transform_7, window_bounds = array<i64: 128, 64>}, {pipeline_mode = #tpu.pipeline_mode<synchronous>, transform_indices = @transform_8, window_bounds = array<i64: 1, 64>}, {pipeline_mode = #tpu.pipeline_mode<synchronous>, transform_indices = @transform_9, window_bounds = array<i64: 1, 64>}, {pipeline_mode = #tpu.pipeline_mode<synchronous>, transform_indices = @transform_10, window_bounds = array<i64: 1, 1>}, {pipeline_mode = #tpu.pipeline_mode<synchronous>, transform_indices = @transform_11, window_bounds = array<i64: 128, 128>}, {pipeline_mode = #tpu.pipeline_mode<synchronous>, transform_indices = @transform_12, window_bounds = array<i64: 1, 128>}, {pipeline_mode = #tpu.pipeline_mode<synchronous>, transform_indices = @transform_13, window_bounds = array<i64: 128, 2>}, {pipeline_mode = #tpu.pipeline_mode<synchronous>, transform_indices = @transform_14, window_bounds = array<i64: 1, 2>}, {transform_indices = @transform_15, window_bounds = array<i64: 8, 1, 2>}]} {
    %c0 = arith.constant 0 : index
    %c0_0 = arith.constant 0 : index
    %c0_1 = arith.constant 0 : index
    %0 = vector.load %arg1[%c0, %c0_0, %c0_1] : memref<8x16x64xbf16, #tpu.memory_space<vmem>>, vector<8x16x64xbf16>
    %1 = vector.shape_cast %0 : vector<8x16x64xbf16> to vector<128x64xbf16>
    %c0_2 = arith.constant 0 : index
    %c0_3 = arith.constant 0 : index
    %2 = vector.load %arg2[%c0_2, %c0_3] : memref<64x128xbf16, #tpu.memory_space<vmem>>, vector<64x128xbf16>
    %cst = arith.constant dense<0.000000e+00> : vector<128x128xf32>
    %3 = tpu.matmul %1, %2, %cst {dimension_numbers = #tpu.dot_dimension_numbers<[1], [0], [0], [1], [0, 0, 1, 1], [], []>} : vector<128x64xbf16>, vector<64x128xbf16>, vector<128x128xf32> -> vector<128x128xf32>
    %c0_4 = arith.constant 0 : index
    %c0_5 = arith.constant 0 : index
    %4 = vector.load %arg3[%c0_4, %c0_5] : memref<1x128xf32, #tpu.memory_space<vmem>>, vector<1x128xf32>
    %5 = vector.broadcast %4 : vector<1x128xf32> to vector<128x128xf32>
    %6 = arith.addf %3, %5 : vector<128x128xf32>
    %cst_6 = arith.constant 0.000000e+00 : f32
    %7 = vector.broadcast %cst_6 : f32 to vector<128x128xf32>
    %8 = arith.maximumf %6, %7 : vector<128x128xf32>
    %9 = arith.truncf %8 : vector<128x128xf32> to vector<128x128xbf16>
    %c0_7 = arith.constant 0 : index
    %c0_8 = arith.constant 0 : index
    %10 = vector.load %arg4[%c0_7, %c0_8] : memref<128x128xbf16, #tpu.memory_space<vmem>>, vector<128x128xbf16>
    %cst_9 = arith.constant dense<0.000000e+00> : vector<128x128xf32>
    %11 = tpu.matmul %9, %10, %cst_9 {dimension_numbers = #tpu.dot_dimension_numbers<[1], [0], [0], [1], [0, 0, 1, 1], [], []>} : vector<128x128xbf16>, vector<128x128xbf16>, vector<128x128xf32> -> vector<128x128xf32>
    %c0_10 = arith.constant 0 : index
    %c0_11 = arith.constant 0 : index
    %12 = vector.load %arg5[%c0_10, %c0_11] : memref<1x128xf32, #tpu.memory_space<vmem>>, vector<1x128xf32>
    %13 = vector.broadcast %12 : vector<1x128xf32> to vector<128x128xf32>
    %14 = arith.addf %11, %13 : vector<128x128xf32>
    %cst_12 = arith.constant 0.000000e+00 : f32
    %15 = vector.broadcast %cst_12 : f32 to vector<128x128xf32>
    %16 = arith.maximumf %14, %15 : vector<128x128xf32>
    %17 = arith.truncf %16 : vector<128x128xf32> to vector<128x128xbf16>
    %c0_13 = arith.constant 0 : index
    %c0_14 = arith.constant 0 : index
    %18 = vector.load %arg6[%c0_13, %c0_14] : memref<128x128xbf16, #tpu.memory_space<vmem>>, vector<128x128xbf16>
    %cst_15 = arith.constant dense<0.000000e+00> : vector<128x128xf32>
    %19 = tpu.matmul %17, %18, %cst_15 {dimension_numbers = #tpu.dot_dimension_numbers<[1], [0], [0], [1], [0, 0, 1, 1], [], []>} : vector<128x128xbf16>, vector<128x128xbf16>, vector<128x128xf32> -> vector<128x128xf32>
    %c0_16 = arith.constant 0 : index
    %c0_17 = arith.constant 0 : index
    %20 = vector.load %arg7[%c0_16, %c0_17] : memref<1x128xf32, #tpu.memory_space<vmem>>, vector<1x128xf32>
    %21 = vector.broadcast %20 : vector<1x128xf32> to vector<128x128xf32>
    %22 = arith.addf %19, %21 : vector<128x128xf32>
    %cst_18 = arith.constant 0.000000e+00 : f32
    %23 = vector.broadcast %cst_18 : f32 to vector<128x128xf32>
    %24 = arith.maximumf %22, %23 : vector<128x128xf32>
    %25 = arith.truncf %24 : vector<128x128xf32> to vector<128x128xbf16>
    %c0_19 = arith.constant 0 : index
    %c0_20 = arith.constant 0 : index
    %26 = vector.load %arg8[%c0_19, %c0_20] : memref<128x64xbf16, #tpu.memory_space<vmem>>, vector<128x64xbf16>
    %cst_21 = arith.constant dense<0.000000e+00> : vector<128x64xf32>
    %27 = tpu.matmul %25, %26, %cst_21 {dimension_numbers = #tpu.dot_dimension_numbers<[1], [0], [0], [1], [0, 0, 1, 1], [], []>} : vector<128x128xbf16>, vector<128x64xbf16>, vector<128x64xf32> -> vector<128x64xf32>
    %c0_22 = arith.constant 0 : index
    %c0_23 = arith.constant 0 : index
    %28 = vector.load %arg9[%c0_22, %c0_23] : memref<1x64xf32, #tpu.memory_space<vmem>>, vector<1x64xf32>
    %29 = vector.broadcast %28 : vector<1x64xf32> to vector<128x64xf32>
    %30 = arith.addf %27, %29 : vector<128x64xf32>
    %31 = math.tanh %30 : vector<128x64xf32>
    %c0_24 = arith.constant 0 : index
    %c0_25 = arith.constant 0 : index
    %32 = vector.load %arg10[%c0_24, %c0_25] : memref<1x64xf32, #tpu.memory_space<vmem>>, vector<1x64xf32>
    %33 = vector.broadcast %32 : vector<1x64xf32> to vector<128x64xf32>
    %34 = arith.mulf %31, %33 : vector<128x64xf32>
    %cst_26 = arith.constant dense<0.000000e+00> : vector<128xf32>
    %35 = vector.multi_reduction <add>, %34, %cst_26 [1] : vector<128x64xf32> to vector<128xf32>
    %36 = vector.shape_cast %35 : vector<128xf32> to vector<128x1xf32>
    %c0_27 = arith.constant 0 : index
    %c0_28 = arith.constant 0 : index
    %37 = vector.load %arg11[%c0_27, %c0_28] : memref<1x1xf32, #tpu.memory_space<vmem>>, vector<1x1xf32>
    %38 = vector.broadcast %37 : vector<1x1xf32> to vector<128x1xf32>
    %39 = arith.addf %36, %38 : vector<128x1xf32>
    %40 = vector.shape_cast %39 : vector<128x1xf32> to vector<8x16x1xf32>
    %cst_29 = arith.constant dense<0xFF800000> : vector<8x1xf32>
    %41 = vector.multi_reduction <maximumf>, %40, %cst_29 [1] : vector<8x16x1xf32> to vector<8x1xf32>
    %42 = vector.shape_cast %41 : vector<8x1xf32> to vector<8x1x1xf32>
    %43 = vector.broadcast %42 : vector<8x1x1xf32> to vector<8x16x1xf32>
    %44 = arith.subf %40, %43 : vector<8x16x1xf32>
    %45 = math.exp %44 : vector<8x16x1xf32>
    %cst_30 = arith.constant dense<0.000000e+00> : vector<8x1xf32>
    %46 = vector.multi_reduction <add>, %45, %cst_30 [1] : vector<8x16x1xf32> to vector<8x1xf32>
    %47 = vector.shape_cast %46 : vector<8x1xf32> to vector<8x1x1xf32>
    %48 = tpu.reciprocal %47 {approx = true} : vector<8x1x1xf32> -> vector<8x1x1xf32>
    %cst_31 = arith.constant 2.500000e-01 : f32
    %49 = vector.broadcast %cst_31 : f32 to vector<8x1x1xf32>
    %50 = arith.mulf %48, %49 : vector<8x1x1xf32>
    %51 = vector.broadcast %50 : vector<8x1x1xf32> to vector<8x16x1xf32>
    %52 = arith.mulf %45, %51 : vector<8x16x1xf32>
    %53 = vector.shape_cast %24 : vector<128x128xf32> to vector<8x16x128xf32>
    %54 = vector.broadcast %52 : vector<8x16x1xf32> to vector<8x16x128xf32>
    %55 = arith.mulf %54, %53 : vector<8x16x128xf32>
    %cst_32 = arith.constant dense<0.000000e+00> : vector<8x128xf32>
    %56 = vector.multi_reduction <add>, %55, %cst_32 [1] : vector<8x16x128xf32> to vector<8x128xf32>
    %57 = arith.truncf %56 : vector<8x128xf32> to vector<8x128xbf16>
    %c0_33 = arith.constant 0 : index
    %c0_34 = arith.constant 0 : index
    %58 = vector.load %arg12[%c0_33, %c0_34] : memref<128x128xbf16, #tpu.memory_space<vmem>>, vector<128x128xbf16>
    %cst_35 = arith.constant dense<0.000000e+00> : vector<8x128xf32>
    %59 = tpu.matmul %57, %58, %cst_35 {dimension_numbers = #tpu.dot_dimension_numbers<[1], [0], [0], [1], [0, 0, 1, 1], [], []>} : vector<8x128xbf16>, vector<128x128xbf16>, vector<8x128xf32> -> vector<8x128xf32>
    %c0_36 = arith.constant 0 : index
    %c0_37 = arith.constant 0 : index
    %60 = vector.load %arg13[%c0_36, %c0_37] : memref<1x128xf32, #tpu.memory_space<vmem>>, vector<1x128xf32>
    %61 = vector.broadcast %60 : vector<1x128xf32> to vector<8x128xf32>
    %62 = arith.addf %59, %61 : vector<8x128xf32>
    %cst_38 = arith.constant 0.000000e+00 : f32
    %63 = vector.broadcast %cst_38 : f32 to vector<8x128xf32>
    %64 = arith.maximumf %62, %63 : vector<8x128xf32>
    %65 = arith.truncf %64 : vector<8x128xf32> to vector<8x128xbf16>
    %c0_39 = arith.constant 0 : index
    %c0_40 = arith.constant 0 : index
    %66 = vector.load %arg14[%c0_39, %c0_40] : memref<128x2xbf16, #tpu.memory_space<vmem>>, vector<128x2xbf16>
    %cst_41 = arith.constant dense<0.000000e+00> : vector<8x2xf32>
    %67 = tpu.matmul %65, %66, %cst_41 {dimension_numbers = #tpu.dot_dimension_numbers<[1], [0], [0], [1], [0, 0, 1, 1], [], []>} : vector<8x128xbf16>, vector<128x2xbf16>, vector<8x2xf32> -> vector<8x2xf32>
    %c0_42 = arith.constant 0 : index
    %c0_43 = arith.constant 0 : index
    %68 = vector.load %arg15[%c0_42, %c0_43] : memref<1x2xf32, #tpu.memory_space<vmem>>, vector<1x2xf32>
    %69 = vector.broadcast %68 : vector<1x2xf32> to vector<8x2xf32>
    %70 = arith.addf %67, %69 : vector<8x2xf32>
    %71 = vector.shape_cast %70 : vector<8x2xf32> to vector<8x1x2xf32>
    %c0_44 = arith.constant 0 : index
    %c0_45 = arith.constant 0 : index
    %c0_46 = arith.constant 0 : index
    %72 = vector.load %arg16[%c0_44, %c0_45, %c0_46] : memref<8x1x2xf32, #tpu.memory_space<vmem>>, vector<8x1x2xf32>
    tpu.vector_store %arg16[%c0_44, %c0_45, %c0_46], %71 {strides = array<i32>} : memref<8x1x2xf32, #tpu.memory_space<vmem>>, vector<8x1x2xf32>,
    return
  }
  func.func @transform_0(%arg0: i32) -> (i32, i32, i32) {
    %c0_i32 = arith.constant 0 : i32
    %c0_i32_0 = arith.constant 0 : i32
    %c0_i32_1 = arith.constant 0 : i32
    return %arg0, %c0_i32, %c0_i32_0 : i32, i32, i32
  }
  func.func @transform_1(%arg0: i32) -> (i32, i32) {
    %c0_i32 = arith.constant 0 : i32
    %c0_i32_0 = arith.constant 0 : i32
    %c0_i32_1 = arith.constant 0 : i32
    return %c0_i32, %c0_i32_0 : i32, i32
  }
  func.func @transform_2(%arg0: i32) -> (i32, i32) {
    %c0_i32 = arith.constant 0 : i32
    %c0_i32_0 = arith.constant 0 : i32
    %c0_i32_1 = arith.constant 0 : i32
    return %c0_i32, %c0_i32_0 : i32, i32
  }
  func.func @transform_3(%arg0: i32) -> (i32, i32) {
    %c0_i32 = arith.constant 0 : i32
    %c0_i32_0 = arith.constant 0 : i32
    %c0_i32_1 = arith.constant 0 : i32
    return %c0_i32, %c0_i32_0 : i32, i32
  }
  func.func @transform_4(%arg0: i32) -> (i32, i32) {
    %c0_i32 = arith.constant 0 : i32
    %c0_i32_0 = arith.constant 0 : i32
    %c0_i32_1 = arith.constant 0 : i32
    return %c0_i32, %c0_i32_0 : i32, i32
  }
  func.func @transform_5(%arg0: i32) -> (i32, i32) {
    %c0_i32 = arith.constant 0 : i32
    %c0_i32_0 = arith.constant 0 : i32
    %c0_i32_1 = arith.constant 0 : i32
    return %c0_i32, %c0_i32_0 : i32, i32
  }
  func.func @transform_6(%arg0: i32) -> (i32, i32) {
    %c0_i32 = arith.constant 0 : i32
    %c0_i32_0 = arith.constant 0 : i32
    %c0_i32_1 = arith.constant 0 : i32
    return %c0_i32, %c0_i32_0 : i32, i32
  }
  func.func @transform_7(%arg0: i32) -> (i32, i32) {
    %c0_i32 = arith.constant 0 : i32
    %c0_i32_0 = arith.constant 0 : i32
    %c0_i32_1 = arith.constant 0 : i32
    return %c0_i32, %c0_i32_0 : i32, i32
  }
  func.func @transform_8(%arg0: i32) -> (i32, i32) {
    %c0_i32 = arith.constant 0 : i32
    %c0_i32_0 = arith.constant 0 : i32
    %c0_i32_1 = arith.constant 0 : i32
    return %c0_i32, %c0_i32_0 : i32, i32
  }
  func.func @transform_9(%arg0: i32) -> (i32, i32) {
    %c0_i32 = arith.constant 0 : i32
    %c0_i32_0 = arith.constant 0 : i32
    %c0_i32_1 = arith.constant 0 : i32
    return %c0_i32, %c0_i32_0 : i32, i32
  }
  func.func @transform_10(%arg0: i32) -> (i32, i32) {
    %c0_i32 = arith.constant 0 : i32
    %c0_i32_0 = arith.constant 0 : i32
    %c0_i32_1 = arith.constant 0 : i32
    return %c0_i32, %c0_i32_0 : i32, i32
  }
  func.func @transform_11(%arg0: i32) -> (i32, i32) {
    %c0_i32 = arith.constant 0 : i32
    %c0_i32_0 = arith.constant 0 : i32
    %c0_i32_1 = arith.constant 0 : i32
    return %c0_i32, %c0_i32_0 : i32, i32
  }
  func.func @transform_12(%arg0: i32) -> (i32, i32) {
    %c0_i32 = arith.constant 0 : i32
    %c0_i32_0 = arith.constant 0 : i32
    %c0_i32_1 = arith.constant 0 : i32
    return %c0_i32, %c0_i32_0 : i32, i32
  }
  func.func @transform_13(%arg0: i32) -> (i32, i32) {
    %c0_i32 = arith.constant 0 : i32
    %c0_i32_0 = arith.constant 0 : i32
    %c0_i32_1 = arith.constant 0 : i32
    return %c0_i32, %c0_i32_0 : i32, i32
  }
  func.func @transform_14(%arg0: i32) -> (i32, i32) {
    %c0_i32 = arith.constant 0 : i32
    %c0_i32_0 = arith.constant 0 : i32
    %c0_i32_1 = arith.constant 0 : i32
    return %c0_i32, %c0_i32_0 : i32, i32
  }
  func.func @transform_15(%arg0: i32) -> (i32, i32, i32) {
    %c0_i32 = arith.constant 0 : i32
    %c0_i32_0 = arith.constant 0 : i32
    %c0_i32_1 = arith.constant 0 : i32
    return %arg0, %c0_i32, %c0_i32_0 : i32, i32, i32
  }
}

module attributes {stable_mosaic.version = 11 : i64} {
  func.func @abmil_kernel(%arg0: i32, %arg1: memref<8x16x64xbf16, #tpu.memory_space<vmem>>, %arg2: memref<64x128xbf16, #tpu.memory_space<vmem>>, %arg3: memref<1x128xf32, #tpu.memory_space<vmem>>, %arg4: memref<128x128xbf16, #tpu.memory_space<vmem>>, %arg5: memref<1x128xf32, #tpu.memory_space<vmem>>, %arg6: memref<128x128xbf16, #tpu.memory_space<vmem>>, %arg7: memref<1x128xf32, #tpu.memory_space<vmem>>, %arg8: memref<128x64xbf16, #tpu.memory_space<vmem>>, %arg9: memref<1x64xf32, #tpu.memory_space<vmem>>, %arg10: memref<1x64xf32, #tpu.memory_space<vmem>>, %arg11: memref<1x1xf32, #tpu.memory_space<vmem>>, %arg12: memref<128x128xbf16, #tpu.memory_space<vmem>>, %arg13: memref<1x128xf32, #tpu.memory_space<vmem>>, %arg14: memref<128x2xbf16, #tpu.memory_space<vmem>>, %arg15: memref<1x2xf32, #tpu.memory_space<vmem>>, %arg16: memref<8x1x2xf32, #tpu.memory_space<vmem>>) attributes {dimension_semantics = [#tpu.dimension_semantics<parallel>], iteration_bounds = array<i64: 2>, scalar_prefetch = 0 : i64, scratch_operands = 0 : i64, tpu.core_type = #tpu.core_type<tc>, window_params = [{transform_indices = @transform_0, window_bounds = array<i64: 8, 16, 64>}, {pipeline_mode = #tpu.pipeline_mode<synchronous>, transform_indices = @transform_1, window_bounds = array<i64: 64, 128>}, {pipeline_mode = #tpu.pipeline_mode<synchronous>, transform_indices = @transform_2, window_bounds = array<i64: 1, 128>}, {pipeline_mode = #tpu.pipeline_mode<synchronous>, transform_indices = @transform_3, window_bounds = array<i64: 128, 128>}, {pipeline_mode = #tpu.pipeline_mode<synchronous>, transform_indices = @transform_4, window_bounds = array<i64: 1, 128>}, {pipeline_mode = #tpu.pipeline_mode<synchronous>, transform_indices = @transform_5, window_bounds = array<i64: 128, 128>}, {pipeline_mode = #tpu.pipeline_mode<synchronous>, transform_indices = @transform_6, window_bounds = array<i64: 1, 128>}, {pipeline_mode = #tpu.pipeline_mode<synchronous>, transform_indices = @transform_7, window_bounds = array<i64: 128, 64>}, {pipeline_mode = #tpu.pipeline_mode<synchronous>, transform_indices = @transform_8, window_bounds = array<i64: 1, 64>}, {pipeline_mode = #tpu.pipeline_mode<synchronous>, transform_indices = @transform_9, window_bounds = array<i64: 1, 64>}, {pipeline_mode = #tpu.pipeline_mode<synchronous>, transform_indices = @transform_10, window_bounds = array<i64: 1, 1>}, {pipeline_mode = #tpu.pipeline_mode<synchronous>, transform_indices = @transform_11, window_bounds = array<i64: 128, 128>}, {pipeline_mode = #tpu.pipeline_mode<synchronous>, transform_indices = @transform_12, window_bounds = array<i64: 1, 128>}, {pipeline_mode = #tpu.pipeline_mode<synchronous>, transform_indices = @transform_13, window_bounds = array<i64: 128, 2>}, {pipeline_mode = #tpu.pipeline_mode<synchronous>, transform_indices = @transform_14, window_bounds = array<i64: 1, 2>}, {transform_indices = @transform_15, window_bounds = array<i64: 8, 1, 2>}]} {
    %c0 = arith.constant 0 : index
    %c0_0 = arith.constant 0 : index
    %c0_1 = arith.constant 0 : index
    %0 = vector.load %arg1[%c0, %c0_0, %c0_1] : memref<8x16x64xbf16, #tpu.memory_space<vmem>>, vector<8x16x64xbf16>
    %1 = vector.shape_cast %0 : vector<8x16x64xbf16> to vector<128x64xbf16>
    %c0_2 = arith.constant 0 : index
    %c0_3 = arith.constant 0 : index
    %2 = vector.load %arg2[%c0_2, %c0_3] : memref<64x128xbf16, #tpu.memory_space<vmem>>, vector<64x128xbf16>
    %cst = arith.constant dense<0.000000e+00> : vector<128x128xf32>
    %3 = tpu.matmul %1, %2, %cst {dimension_numbers = #tpu.dot_dimension_numbers<[1], [0], [0], [1], [0, 0, 1, 1], [], []>} : vector<128x64xbf16>, vector<64x128xbf16>, vector<128x128xf32> -> vector<128x128xf32>
    %c0_4 = arith.constant 0 : index
    %c0_5 = arith.constant 0 : index
    %4 = vector.load %arg3[%c0_4, %c0_5] : memref<1x128xf32, #tpu.memory_space<vmem>>, vector<1x128xf32>
    %5 = vector.broadcast %4 : vector<1x128xf32> to vector<128x128xf32>
    %6 = arith.addf %3, %5 : vector<128x128xf32>
    %cst_6 = arith.constant 0.000000e+00 : f32
    %7 = vector.broadcast %cst_6 : f32 to vector<128x128xf32>
    %8 = arith.maximumf %6, %7 : vector<128x128xf32>
    %9 = arith.truncf %8 : vector<128x128xf32> to vector<128x128xbf16>
    %c0_7 = arith.constant 0 : index
    %c0_8 = arith.constant 0 : index
    %10 = vector.load %arg4[%c0_7, %c0_8] : memref<128x128xbf16, #tpu.memory_space<vmem>>, vector<128x128xbf16>
    %cst_9 = arith.constant dense<0.000000e+00> : vector<128x128xf32>
    %11 = tpu.matmul %9, %10, %cst_9 {dimension_numbers = #tpu.dot_dimension_numbers<[1], [0], [0], [1], [0, 0, 1, 1], [], []>} : vector<128x128xbf16>, vector<128x128xbf16>, vector<128x128xf32> -> vector<128x128xf32>
    %c0_10 = arith.constant 0 : index
    %c0_11 = arith.constant 0 : index
    %12 = vector.load %arg5[%c0_10, %c0_11] : memref<1x128xf32, #tpu.memory_space<vmem>>, vector<1x128xf32>
    %13 = vector.broadcast %12 : vector<1x128xf32> to vector<128x128xf32>
    %14 = arith.addf %11, %13 : vector<128x128xf32>
    %cst_12 = arith.constant 0.000000e+00 : f32
    %15 = vector.broadcast %cst_12 : f32 to vector<128x128xf32>
    %16 = arith.maximumf %14, %15 : vector<128x128xf32>
    %17 = arith.truncf %16 : vector<128x128xf32> to vector<128x128xbf16>
    %c0_13 = arith.constant 0 : index
    %c0_14 = arith.constant 0 : index
    %18 = vector.load %arg6[%c0_13, %c0_14] : memref<128x128xbf16, #tpu.memory_space<vmem>>, vector<128x128xbf16>
    %cst_15 = arith.constant dense<0.000000e+00> : vector<128x128xf32>
    %19 = tpu.matmul %17, %18, %cst_15 {dimension_numbers = #tpu.dot_dimension_numbers<[1], [0], [0], [1], [0, 0, 1, 1], [], []>} : vector<128x128xbf16>, vector<128x128xbf16>, vector<128x128xf32> -> vector<128x128xf32>
    %c0_16 = arith.constant 0 : index
    %c0_17 = arith.constant 0 : index
    %20 = vector.load %arg7[%c0_16, %c0_17] : memref<1x128xf32, #tpu.memory_space<vmem>>, vector<1x128xf32>
    %21 = vector.broadcast %20 : vector<1x128xf32> to vector<128x128xf32>
    %22 = arith.addf %19, %21 : vector<128x128xf32>
    %cst_18 = arith.constant 0.000000e+00 : f32
    %23 = vector.broadcast %cst_18 : f32 to vector<128x128xf32>
    %24 = arith.maximumf %22, %23 : vector<128x128xf32>
    %25 = arith.truncf %24 : vector<128x128xf32> to vector<128x128xbf16>
    %c0_19 = arith.constant 0 : index
    %c0_20 = arith.constant 0 : index
    %26 = vector.load %arg8[%c0_19, %c0_20] : memref<128x64xbf16, #tpu.memory_space<vmem>>, vector<128x64xbf16>
    %cst_21 = arith.constant dense<0.000000e+00> : vector<128x64xf32>
    %27 = tpu.matmul %25, %26, %cst_21 {dimension_numbers = #tpu.dot_dimension_numbers<[1], [0], [0], [1], [0, 0, 1, 1], [], []>} : vector<128x128xbf16>, vector<128x64xbf16>, vector<128x64xf32> -> vector<128x64xf32>
    %c0_22 = arith.constant 0 : index
    %c0_23 = arith.constant 0 : index
    %28 = vector.load %arg9[%c0_22, %c0_23] : memref<1x64xf32, #tpu.memory_space<vmem>>, vector<1x64xf32>
    %29 = vector.broadcast %28 : vector<1x64xf32> to vector<128x64xf32>
    %30 = arith.addf %27, %29 : vector<128x64xf32>
    %31 = math.tanh %30 : vector<128x64xf32>
    %c0_24 = arith.constant 0 : index
    %c0_25 = arith.constant 0 : index
    %32 = vector.load %arg10[%c0_24, %c0_25] : memref<1x64xf32, #tpu.memory_space<vmem>>, vector<1x64xf32>
    %33 = vector.broadcast %32 : vector<1x64xf32> to vector<128x64xf32>
    %34 = arith.mulf %31, %33 : vector<128x64xf32>
    %cst_26 = arith.constant dense<0.000000e+00> : vector<128xf32>
    %35 = vector.multi_reduction <add>, %34, %cst_26 [1] : vector<128x64xf32> to vector<128xf32>
    %36 = vector.shape_cast %35 : vector<128xf32> to vector<128x1xf32>
    %c0_27 = arith.constant 0 : index
    %c0_28 = arith.constant 0 : index
    %37 = vector.load %arg11[%c0_27, %c0_28] : memref<1x1xf32, #tpu.memory_space<vmem>>, vector<1x1xf32>
    %38 = vector.broadcast %37 : vector<1x1xf32> to vector<128x1xf32>
    %39 = arith.addf %36, %38 : vector<128x1xf32>
    %40 = vector.shape_cast %39 : vector<128x1xf32> to vector<8x16x1xf32>
    %cst_29 = arith.constant dense<0xFF800000> : vector<8x1xf32>
    %41 = vector.multi_reduction <maximumf>, %40, %cst_29 [1] : vector<8x16x1xf32> to vector<8x1xf32>
    %42 = vector.shape_cast %41 : vector<8x1xf32> to vector<8x1x1xf32>
    %43 = vector.broadcast %42 : vector<8x1x1xf32> to vector<8x16x1xf32>
    %44 = arith.subf %40, %43 : vector<8x16x1xf32>
    %45 = math.exp %44 : vector<8x16x1xf32>
    %cst_30 = arith.constant dense<0.000000e+00> : vector<8x1xf32>
    %46 = vector.multi_reduction <add>, %45, %cst_30 [1] : vector<8x16x1xf32> to vector<8x1xf32>
    %47 = vector.shape_cast %46 : vector<8x1xf32> to vector<8x1x1xf32>
    %48 = tpu.reciprocal %47 {approx = true} : vector<8x1x1xf32> -> vector<8x1x1xf32>
    %cst_31 = arith.constant 2.500000e-01 : f32
    %49 = vector.broadcast %cst_31 : f32 to vector<8x1x1xf32>
    %50 = arith.mulf %48, %49 : vector<8x1x1xf32>
    %51 = vector.broadcast %50 : vector<8x1x1xf32> to vector<8x16x1xf32>
    %52 = arith.mulf %45, %51 : vector<8x16x1xf32>
    %53 = vector.shape_cast %24 : vector<128x128xf32> to vector<8x16x128xf32>
    %54 = vector.broadcast %52 : vector<8x16x1xf32> to vector<8x16x128xf32>
    %55 = arith.mulf %54, %53 : vector<8x16x128xf32>
    %cst_32 = arith.constant dense<0.000000e+00> : vector<8x128xf32>
    %56 = vector.multi_reduction <add>, %55, %cst_32 [1] : vector<8x16x128xf32> to vector<8x128xf32>
    %57 = arith.truncf %56 : vector<8x128xf32> to vector<8x128xbf16>
    %c0_33 = arith.constant 0 : index
    %c0_34 = arith.constant 0 : index
    %58 = vector.load %arg12[%c0_33, %c0_34] : memref<128x128xbf16, #tpu.memory_space<vmem>>, vector<128x128xbf16>
    %cst_35 = arith.constant dense<0.000000e+00> : vector<8x128xf32>
    %59 = tpu.matmul %57, %58, %cst_35 {dimension_numbers = #tpu.dot_dimension_numbers<[1], [0], [0], [1], [0, 0, 1, 1], [], []>} : vector<8x128xbf16>, vector<128x128xbf16>, vector<8x128xf32> -> vector<8x128xf32>
    %c0_36 = arith.constant 0 : index
    %c0_37 = arith.constant 0 : index
    %60 = vector.load %arg13[%c0_36, %c0_37] : memref<1x128xf32, #tpu.memory_space<vmem>>, vector<1x128xf32>
    %61 = vector.broadcast %60 : vector<1x128xf32> to vector<8x128xf32>
    %62 = arith.addf %59, %61 : vector<8x128xf32>
    %cst_38 = arith.constant 0.000000e+00 : f32
    %63 = vector.broadcast %cst_38 : f32 to vector<8x128xf32>
    %64 = arith.maximumf %62, %63 : vector<8x128xf32>
    %65 = arith.truncf %64 : vector<8x128xf32> to vector<8x128xbf16>
    %c0_39 = arith.constant 0 : index
    %c0_40 = arith.constant 0 : index
    %66 = vector.load %arg14[%c0_39, %c0_40] : memref<128x2xbf16, #tpu.memory_space<vmem>>, vector<128x2xbf16>
    %cst_41 = arith.constant dense<0.000000e+00> : vector<8x2xf32>
    %67 = tpu.matmul %65, %66, %cst_41 {dimension_numbers = #tpu.dot_dimension_numbers<[1], [0], [0], [1], [0, 0, 1, 1], [], []>} : vector<8x128xbf16>, vector<128x2xbf16>, vector<8x2xf32> -> vector<8x2xf32>
    %c0_42 = arith.constant 0 : index
    %c0_43 = arith.constant 0 : index
    %68 = vector.load %arg15[%c0_42, %c0_43] : memref<1x2xf32, #tpu.memory_space<vmem>>, vector<1x2xf32>
    %69 = vector.broadcast %68 : vector<1x2xf32> to vector<8x2xf32>
    %70 = arith.addf %67, %69 : vector<8x2xf32>
    %71 = vector.shape_cast %70 : vector<8x2xf32> to vector<8x1x2xf32>
    %c0_44 = arith.constant 0 : index
    %c0_45 = arith.constant 0 : index
    %c0_46 = arith.constant 0 : index
    %72 = vector.load %arg16[%c0_44, %c0_45, %c0_46] : memref<8x1x2xf32, #tpu.memory_space<vmem>>, vector<8x1x2xf32>
    tpu.vector_store %arg16[%c0_44, %c0_45, %c0_46], %71 {strides = array<i32>} : memref<8x1x2xf32, #tpu.memory_space<vmem>>, vector<8x1x2xf32>,
    return
  }
  func.func @transform_0(%arg0: i32) -> (i32, i32, i32) {
    %c0_i32 = arith.constant 0 : i32
    %c0_i32_0 = arith.constant 0 : i32
    %c0_i32_1 = arith.constant 0 : i32
    return %arg0, %c0_i32, %c0_i32_0 : i32, i32, i32
  }
  func.func @transform_1(%arg0: i32) -> (i32, i32) {
    %c0_i32 = arith.constant 0 : i32
    %c0_i32_0 = arith.constant 0 : i32
    %c0_i32_1 = arith.constant 0 : i32
    return %c0_i32, %c0_i32_0 : i32, i32
  }
  func.func @transform_2(%arg0: i32) -> (i32, i32) {
    %c0_i32 = arith.constant 0 : i32
    %c0_i32_0 = arith.constant 0 : i32
    %c0_i32_1 = arith.constant 0 : i32
    return %c0_i32, %c0_i32_0 : i32, i32
  }
  func.func @transform_3(%arg0: i32) -> (i32, i32) {
    %c0_i32 = arith.constant 0 : i32
    %c0_i32_0 = arith.constant 0 : i32
    %c0_i32_1 = arith.constant 0 : i32
    return %c0_i32, %c0_i32_0 : i32, i32
  }
  func.func @transform_4(%arg0: i32) -> (i32, i32) {
    %c0_i32 = arith.constant 0 : i32
    %c0_i32_0 = arith.constant 0 : i32
    %c0_i32_1 = arith.constant 0 : i32
    return %c0_i32, %c0_i32_0 : i32, i32
  }
  func.func @transform_5(%arg0: i32) -> (i32, i32) {
    %c0_i32 = arith.constant 0 : i32
    %c0_i32_0 = arith.constant 0 : i32
    %c0_i32_1 = arith.constant 0 : i32
    return %c0_i32, %c0_i32_0 : i32, i32
  }
  func.func @transform_6(%arg0: i32) -> (i32, i32) {
    %c0_i32 = arith.constant 0 : i32
    %c0_i32_0 = arith.constant 0 : i32
    %c0_i32_1 = arith.constant 0 : i32
    return %c0_i32, %c0_i32_0 : i32, i32
  }
  func.func @transform_7(%arg0: i32) -> (i32, i32) {
    %c0_i32 = arith.constant 0 : i32
    %c0_i32_0 = arith.constant 0 : i32
    %c0_i32_1 = arith.constant 0 : i32
    return %c0_i32, %c0_i32_0 : i32, i32
  }
  func.func @transform_8(%arg0: i32) -> (i32, i32) {
    %c0_i32 = arith.constant 0 : i32
    %c0_i32_0 = arith.constant 0 : i32
    %c0_i32_1 = arith.constant 0 : i32
    return %c0_i32, %c0_i32_0 : i32, i32
  }
  func.func @transform_9(%arg0: i32) -> (i32, i32) {
    %c0_i32 = arith.constant 0 : i32
    %c0_i32_0 = arith.constant 0 : i32
    %c0_i32_1 = arith.constant 0 : i32
    return %c0_i32, %c0_i32_0 : i32, i32
  }
  func.func @transform_10(%arg0: i32) -> (i32, i32) {
    %c0_i32 = arith.constant 0 : i32
    %c0_i32_0 = arith.constant 0 : i32
    %c0_i32_1 = arith.constant 0 : i32
    return %c0_i32, %c0_i32_0 : i32, i32
  }
  func.func @transform_11(%arg0: i32) -> (i32, i32) {
    %c0_i32 = arith.constant 0 : i32
    %c0_i32_0 = arith.constant 0 : i32
    %c0_i32_1 = arith.constant 0 : i32
    return %c0_i32, %c0_i32_0 : i32, i32
  }
  func.func @transform_12(%arg0: i32) -> (i32, i32) {
    %c0_i32 = arith.constant 0 : i32
    %c0_i32_0 = arith.constant 0 : i32
    %c0_i32_1 = arith.constant 0 : i32
    return %c0_i32, %c0_i32_0 : i32, i32
  }
  func.func @transform_13(%arg0: i32) -> (i32, i32) {
    %c0_i32 = arith.constant 0 : i32
    %c0_i32_0 = arith.constant 0 : i32
    %c0_i32_1 = arith.constant 0 : i32
    return %c0_i32, %c0_i32_0 : i32, i32
  }
  func.func @transform_14(%arg0: i32) -> (i32, i32) {
    %c0_i32 = arith.constant 0 : i32
    %c0_i32_0 = arith.constant 0 : i32
    %c0_i32_1 = arith.constant 0 : i32
    return %c0_i32, %c0_i32_0 : i32, i32
  }
  func.func @transform_15(%arg0: i32) -> (i32, i32, i32) {
    %c0_i32 = arith.constant 0 : i32
    %c0_i32_0 = arith.constant 0 : i32
    %c0_i32_1 = arith.constant 0 : i32
    return %arg0, %c0_i32, %c0_i32_0 : i32, i32, i32
  }
}

</mosaic_0001>

<bundles_post_ra>
// kernel: tpu_custom_call.1
= control target key start
LH: loop header
LB: loop body
LE: loop exit
PB: predicated region body
PF: predicated region fallthrough
CT: control target
= control target key end

     0   :  { %s2974_s0 = inlined_call_operand.vmem [shape: bf16[16,16,64], index: 0, kind: input, shape index: {}]   ;;  %s2975_s1 = inlined_call_operand.vmem [shape: bf16[64,128], index: 1, kind: input, shape index: {}]   ;;  %s2976_s2 = inlined_call_operand.vmem [shape: f32[1,128], index: 2, kind: input, shape index: {}]   ;;  %s2977_s3 = inlined_call_operand.hbm [shape: bf16[128,128], index: 3, kind: input, shape index: {}]   ;;  %s2978_s4 = inlined_call_operand.vmem [shape: f32[1,128], index: 4, kind: input, shape index: {}]   ;;  %s2979_s5 = inlined_call_operand.hbm [shape: bf16[128,128], index: 5, kind: input, shape index: {}]   ;;  %s2980_s6 = inlined_call_operand.vmem [shape: f32[1,128], index: 6, kind: input, shape index: {}]   ;;  %s2981_s7 = inlined_call_operand.vmem [shape: bf16[128,64], index: 7, kind: input, shape index: {}]   ;;  %s2982_s8 = inlined_call_operand.vmem [shape: f32[1,64], index: 8, kind: input, shape index: {}]   ;;  %s2983_s9 = inlined_call_operand.vmem [shape: f32[1,64], index: 9, kind: input, shape index: {}]   ;;  %s2984_s10 = inlined_call_operand.<no memory space> [shape: f32[1,1], index: 10, kind: input, shape index: {}]   ;;  %s2985_s11 = inlined_call_operand.hbm [shape: bf16[128,128], index: 11, kind: input, shape index: {}]   ;;  %s2986_s12 = inlined_call_operand.vmem [shape: f32[1,128], index: 12, kind: input, shape index: {}]   ;;  %s2987_s13 = inlined_call_operand.vmem [shape: bf16[128,2], index: 13, kind: input, shape index: {}]   ;;  %s2988_s14 = inlined_call_operand.vmem [shape: f32[1,2], index: 14, kind: input, shape index: {}]   ;;  %s2989_s15 = inlined_call_operand.vmem [shape: f32[16,1,2], index: 15, kind: output, shape index: {}]  }
   0x1   :  { %v20_v0 = vstv %s2984_s10 }
   0x2   :  { %21 = vst [vmem:[#allocation2] sm:$0x1] %v20_v0 }
   0x3   :  { %22 = vsyncpa [#allocation4], 0 }
   0x4   :  { %23 = vsyncpa [#allocation6], 0  ;;  %s2545_s20 = smov 0  }
   0x5 LB: > { %s2990_s21 = sadd.s32 4294967295, %s2454_s20   ;;  %p1933_p0 = scmp.ge.s32.totalorder %s2454_s20, 1  ;;  %s2454_s20 = sphi %s2545_s20, %s29_s20  }
   0x6   : > { %p380_p1 = scmp.lt.s32.totalorder %s2454_s20, 3  ;;  %p2555_p2 = scmp.eq.s32.totalorder %s2990_s21, 0 }
   0x7   : > { %s414_s24 = sshll.u32 %s2979_s5, 4  ;;  %s397_s28 = sshll.u32 %s2977_s3, 4  ;;  %s415_s24 = int_to_ptr.hbm [resolvable:$true] %s414_s24  ;;  %s398_s28 = int_to_ptr.hbm [resolvable:$true] %s397_s28 }
   0x8   : > { %p2562_p3 = pnand %p1933_p0, %p380_p1  ;;  %s2456_s29 = smov [#allocation5]  }
   0x9   : > { %s416_s30 = sshll.u32 %s2456_s29, 4  ;;  %s2457_s16 = smov [#allocation3]   ;;  %s417_s30 = int_to_ptr.vmem [resolvable:$true] %s416_s30 }
   0xa   : > { %p2229_p4 = pneg %p2562_p3  ;;  %s399_s17 = sshll.u32 %s2457_s16, 4  ;;  %s400_s17 = int_to_ptr.vmem [resolvable:$true] %s399_s17 }
   0xb   : > { %s443_s22 = sshll.u32 %s2985_s11, 4  ;;  %s2458_s23 = smov 64   ;;  %s444_s22 = int_to_ptr.hbm [resolvable:$true] %s443_s22 }
   0xc   : > { %p2230_p5 = pnand %p2555_p2, %p2229_p4  ;;  %s2459_s21 = smov 4  }
   0xd   : > { %s2460_s26 = smov [#allocation7]   ;;  %480 = sbr.rel (%p2562_p3) target bundleno = 1305 (0x519), region = 80 }
   0xe   : > { %2235 = dma.hbm_to_vmem [thread:$0]  (!%p2230_p5), %s415_s24, 1024, %s417_s30, [#allocation6], %s2458_s23, %s2458_s23, %s2459_s21  }
   0xf   : > { %2232 = dma.hbm_to_vmem [thread:$0]  (!%p2230_p5), %s398_s28, 1024, %s400_s17, [#allocation4], %s2458_s23, %s2458_s23, %s2459_s21  }
  0x10   : > { %s445_s27 = sshll.u32 %s2460_s26, 4  ;;  %s446_s27 = int_to_ptr.vmem [resolvable:$true] %s445_s27 }
  0x11   : > { %2238 = dma.hbm_to_vmem [thread:$0]  (!%p2230_p5), %s444_s22, 1024, %s446_s27, [#allocation6], %s2458_s23, %s2458_s23, %s2459_s21  }
  0x12   : > { %2445 = dma.done.wait (%p2555_p2), [#allocation4], 1024  }
  0x13   : > { %2447 = vsyncadd (%p2555_p2), [#allocation4], 4294966272 }
  0x14   : > { %2449 = dma.done.wait (%p2555_p2), [#allocation6], 2048  }
  0x15   : > { %2451 = vsyncadd (%p2555_p2), [#allocation6], 4294965248  ;;  %s2993_s24 = sadd.s32 4294967295, %s2454_s20   ;;  %v2176_v1 = vld [vmem:[%s2975_s1 + $0x18] sm:$0xff]  ;;  %v2175_v2 = vld [vmem:[%s2975_s1 + $0x10] sm:$0xff]  ;;  %vm644_vm0 = vcmask 523264  }
  0x16   : > { %s1942_s28 = sshll.u32 %s2993_s24, 3  ;;  %673 = vmatpush.bf16.msra.mxu0 %v2176_v1  ;;  %v2174_v3 = vld [vmem:[%s2975_s1 + $0x8] sm:$0xff]  ;;  %v2173_v4 = vld [vmem:[%s2975_s1] sm:$0xff]  ;;  %v2183_v12 = vld [vmem:[#allocation3 + $0x30] sm:$0xff]  ;;  %vm1245_vm1 = vcmask 7168   ;;  %vm1666_vm2 = vcmask 1041409  }
  0x17   : > { %p540_p6 = scmp.lt.s32.totalorder %s1942_s28, 15  ;;  %v2184_v10 = vld [vmem:[#allocation3 + $0x38] sm:$0xff]  ;;  %v2182_v13 = vld [vmem:[#allocation3 + $0x28] sm:$0xff]  ;;  %v2181_v14 = vld [vmem:[#allocation3 + $0x20] sm:$0xff]  ;;  %vm1668_vm3 = vcmask 1042434   ;;  %vm1670_vm4 = vcmask 1043459  }
  0x18   : > { %810 = vmatpush.bf16.msra.mxu1 %v2184_v10  ;;  %v2180_v15 = vld [vmem:[#allocation3 + $0x18] sm:$0xff]  ;;  %v2179_v17 = vld [vmem:[#allocation3 + $0x10] sm:$0xff]  ;;  %v2178_v18 = vld [vmem:[#allocation3 + $0x8] sm:$0xff]  ;;  %vm1672_vm5 = vcmask 1044484   ;;  %vm1674_vm6 = vcmask 1045509   ;;  %vm1676_vm7 = vcmask 1046534  }
  0x19   : > { %s2995_s28 = smov (!%p540_p6, %s1942_s28), 15  ;;  %v2177_v19 = vld [vmem:[#allocation3] sm:$0xff]  ;;  %v2627_v22 = vld [vmem:[%s2976_s2] ss:$0 sm:$0xff]  ;;  %v2191_v1 = vld [vmem:[#allocation5 + $0x30] sm:$0xff]  ;;  %vm1678_vm8 = vcmask 1047559  }
  0x1a   : > { %674 = vmatpush.bf16.msra.mxu0 %v2175_v2  ;;  %s2164_s17 = sshll.u32 %s2995_s28, 3  ;;  %v2192_v61 = vld [vmem:[#allocation5 + $0x38] sm:$0xff]  ;;  %s549_s16 = scalar_lea.vmem %s2989_s15, %s2995_s28  ;;  %vm1841_vm9 = vcmask 8192  }
  0x1b   : > { %s2606_s26 = scalar_lea.vmem %s2974_s0, %s2164_s17  ;;  %951 = vmatpush.bf16.msra.mxu2 %v2192_v61 }
  0x1c   : > { %v2165_v5 = vld [vmem:[%s2606_s26] sm:$0xff]  ;;  %v2166_v6 = vld [vmem:[%s2606_s26 + $0x8] sm:$0xff]  ;;  %v2167_v7 = vld [vmem:[%s2606_s26 + $0x10] sm:$0xff]  ;;  %811 = vmatpush.bf16.msra.mxu1 %v2183_v12 }
  0x1d   : > { %v2168_v8 = vld [vmem:[%s2606_s26 + $0x18] sm:$0xff]  ;;  %v2169_v9 = vld [vmem:[%s2606_s26 + $0x20] sm:$0xff]  ;;  %v2170_v11 = vld [vmem:[%s2606_s26 + $0x28] sm:$0xff] }
  0x1e   : > { %675 = vmatpush.bf16.msra.mxu0 %v2174_v3  ;;  %v2171_v16 = vld [vmem:[%s2606_s26 + $0x30] sm:$0xff]  ;;  %v2172_v20 = vld [vmem:[%s2606_s26 + $0x38] sm:$0xff] }
  0x1f   : > { %952 = vmatpush.bf16.msra.mxu2 %v2191_v1  ;;  %v2190_v3 = vld [vmem:[#allocation5 + $0x28] sm:$0xff]  ;;  %v2187_v12 = vld [vmem:[#allocation5 + $0x10] sm:$0xff] }
  0x20   : > { %812 = vmatpush.bf16.msra.mxu1 %v2182_v13  ;;  %v2200_v1 = vld [vmem:[%s2981_s7 + $0x38] sm:$0xff] }
  0x21   : > { %1092 = vmatpush.bf16.msra.mxu3 %v2200_v1 }
  0x22   : > { %676 = vmatpush.bf16.msra.mxu0 %v2173_v4  ;;  %v2189_v4 = vld [vmem:[#allocation5 + $0x20] sm:$0xff] }
  0x23   : > { %953 = vmatpush.bf16.msra.mxu2 %v2190_v3  ;;  %v2199_v3 = vld [vmem:[%s2981_s7 + $0x30] sm:$0xff] }
  0x24   : > { %813 = vmatpush.bf16.msra.mxu1 %v2181_v14  ;;  %v2186_v14 = vld [vmem:[#allocation5 + $0x8] sm:$0xff] }
  0x25   : > { %1994 = vmatmul.msk.bf16.vlgmr.msra.gmra.mxu0 %vm644_vm0, %v2165_v5  ;;  %1093 = vmatpush.bf16.msra.mxu3 %v2199_v3 }
  0x27   : > { %954 = vmatpush.bf16.msra.mxu2 %v2189_v4  ;;  %v2198_v4 = vld [vmem:[%s2981_s7 + $0x28] sm:$0xff] }
  0x28   : > { %814 = vmatpush.bf16.msra.mxu1 %v2180_v15  ;;  %v2185_v15 = vld [vmem:[#allocation5] sm:$0xff] }
  0x29   : > { %1094 = vmatpush.bf16.msra.mxu3 %v2198_v4 }
  0x2c   : > { %815 = vmatpush.bf16.msra.mxu1 %v2179_v17 }
  0x30   : > { %816 = vmatpush.bf16.msra.mxu1 %v2178_v18 }
  0x34   : > { %817 = vmatpush.bf16.msra.mxu1 %v2177_v19 }
  0x35   : > { %1995 = vmatmul.msk.bf16.gmra.mxu0 %vm644_vm0, %v2166_v6 }
  0x45   : > { %1996 = vmatmul.msk.bf16.gmra.mxu0 %vm644_vm0, %v2167_v7 }
  0x55   : > { %1997 = vmatmul.msk.bf16.gmra.mxu0 %vm644_vm0, %v2168_v8  ;;  %v2188_v8 = vld [vmem:[#allocation5 + $0x18] sm:$0xff] }
  0x56   : > { %955 = vmatpush.bf16.msra.mxu2 %v2188_v8  ;;  %v2197_v8 = vld [vmem:[%s2981_s7 + $0x20] sm:$0xff] }
  0x57   : > { %1095 = vmatpush.bf16.msra.mxu3 %v2197_v8 }
  0x5a   : > { %956 = vmatpush.bf16.msra.mxu2 %v2187_v12 }
  0x5e   : > { %957 = vmatpush.bf16.msra.mxu2 %v2186_v14  ;;  %v2195_v14 = vld [vmem:[%s2981_s7 + $0x10] sm:$0xff] }
  0x62   : > { %958 = vmatpush.bf16.msra.mxu2 %v2185_v15 }
  0x65   : > { %1998 = vmatmul.msk.bf16.gmra.mxu0 %vm644_vm0, %v2169_v9 }
  0x75   : > { %1999 = vmatmul.msk.bf16.gmra.mxu0 %vm644_vm0, %v2170_v11 }
  0x85   : > { %2000 = vmatmul.msk.bf16.gmra.mxu0 %vm644_vm0, %v2171_v16 }
  0x95   : > { %2001 = vmatmul.msk.bf16.gmra.mxu0 %vm644_vm0, %v2172_v20 }
  0xa2   : > { %v678_v21 = vpop.f32.mrf.mxu0 }
  0xa3   : > { %v679_v23 = vadd.f32 %v2627_v22, %v678_v21 }
  0xa5   : > { %v718_v26 = vmax.f32 %v679_v23, 0.0 }
  0xaa   : > { %v680_v24 = vpop.f32.mrf.mxu0 }
  0xab   : > { %v681_v25 = vadd.f32 %v2627_v22, %v680_v24  ;;  %v2648_v24 = vld [vmem:[%s2978_s4] ss:$0 sm:$0xff] }
  0xad   : > { %v719_v27 = vmax.f32 %v681_v25, 0.0 }
  0xaf   : > { %v734_v28 = vpack.c.bf16 %v719_v27, %v718_v26 }
  0xb1   : > { %818 = vmatmul.bf16.vlgmr.msra.gmra.mxu1 %v734_v28 }
  0xb2   : > { %v683_v29 = vpop.f32.mrf.mxu0 }
  0xb3   : > { %v684_v30 = vadd.f32 %v2627_v22, %v683_v29 }
  0xb5   : > { %v720_v33 = vmax.f32 %v684_v30, 0.0 }
  0xba   : > { %v685_v31 = vpop.f32.mrf.mxu0 }
  0xbb   : > { %v686_v32 = vadd.f32 %v2627_v22, %v685_v31 }
  0xbd   : > { %v721_v34 = vmax.f32 %v686_v32, 0.0 }
  0xbf   : > { %v735_v35 = vpack.c.bf16 %v721_v34, %v720_v33 }
  0xc1   : > { %823 = vmatmul.bf16.gmra.mxu1 %v735_v35 }
  0xc2   : > { %v688_v36 = vpop.f32.mrf.mxu0 }
  0xc3   : > { %v689_v37 = vadd.f32 %v2627_v22, %v688_v36 }
  0xc5   : > { %v722_v40 = vmax.f32 %v689_v37, 0.0 }
  0xca   : > { %v690_v38 = vpop.f32.mrf.mxu0 }
  0xcb   : > { %v691_v39 = vadd.f32 %v2627_v22, %v690_v38 }
  0xcd   : > { %v723_v41 = vmax.f32 %v691_v39, 0.0 }
  0xcf   : > { %v736_v42 = vpack.c.bf16 %v723_v41, %v722_v40 }
  0xd1   : > { %828 = vmatmul.bf16.gmra.mxu1 %v736_v42 }
  0xd2   : > { %v693_v43 = vpop.f32.mrf.mxu0 }
  0xd3   : > { %v694_v44 = vadd.f32 %v2627_v22, %v693_v43 }
  0xd5   : > { %v724_v47 = vmax.f32 %v694_v44, 0.0 }
  0xda   : > { %v695_v45 = vpop.f32.mrf.mxu0 }
  0xdb   : > { %v696_v46 = vadd.f32 %v2627_v22, %v695_v45 }
  0xdd   : > { %v725_v48 = vmax.f32 %v696_v46, 0.0 }
  0xdf   : > { %v737_v49 = vpack.c.bf16 %v725_v48, %v724_v47 }
  0xe1   : > { %833 = vmatmul.bf16.gmra.mxu1 %v737_v49 }
  0xe2   : > { %v698_v50 = vpop.f32.mrf.mxu0 }
  0xe3   : > { %v699_v51 = vadd.f32 %v2627_v22, %v698_v50 }
  0xe5   : > { %v726_v54 = vmax.f32 %v699_v51, 0.0 }
  0xea   : > { %v700_v52 = vpop.f32.mrf.mxu0 }
  0xeb   : > { %v701_v53 = vadd.f32 %v2627_v22, %v700_v52 }
  0xed   : > { %v727_v55 = vmax.f32 %v701_v53, 0.0 }
  0xef   : > { %v738_v56 = vpack.c.bf16 %v727_v55, %v726_v54 }
  0xf1   : > { %838 = vmatmul.bf16.gmra.mxu1 %v738_v56 }
  0xf2   : > { %v703_v57 = vpop.f32.mrf.mxu0 }
  0xf3   : > { %v704_v58 = vadd.f32 %v2627_v22, %v703_v57 }
  0xf5   : > { %v728_v62 = vmax.f32 %v704_v58, 0.0 }
  0xfa   : > { %v705_v59 = vpop.f32.mrf.mxu0 }
  0xfb   : > { %v706_v60 = vadd.f32 %v2627_v22, %v705_v59 }
  0xfd   : > { %v729_v63 = vmax.f32 %v706_v60, 0.0 }
  0xff   : > { %v739_v0 = vpack.c.bf16 %v729_v63, %v728_v62 }
 0x101   : > { %843 = vmatmul.bf16.gmra.mxu1 %v739_v0 }
 0x102   : > { %v708_v2 = vpop.f32.mrf.mxu0 }
 0x103   : > { %v709_v5 = vadd.f32 %v2627_v22, %v708_v2 }
 0x105   : > { %v730_v9 = vmax.f32 %v709_v5, 0.0 }
 0x10a   : > { %v710_v6 = vpop.f32.mrf.mxu0 }
 0x10b   : > { %v711_v7 = vadd.f32 %v2627_v22, %v710_v6 }
 0x10d   : > { %v731_v10 = vmax.f32 %v711_v7, 0.0 }
 0x10f   : > { %v740_v11 = vpack.c.bf16 %v731_v10, %v730_v9 }
 0x111   : > { %848 = vmatmul.bf16.gmra.mxu1 %v740_v11 }
 0x112   : > { %v713_v13 = vpop.f32.mrf.mxu0 }
 0x113   : > { %v714_v16 = vadd.f32 %v2627_v22, %v713_v13  ;;  %v2196_v13 = vld [vmem:[%s2981_s7 + $0x18] sm:$0xff] }
 0x114   : > { %1096 = vmatpush.bf16.msra.mxu3 %v2196_v13 }
 0x115   : > { %v732_v19 = vmax.f32 %v714_v16, 0.0 }
 0x118   : > { %1097 = vmatpush.bf16.msra.mxu3 %v2195_v14 }
 0x11a   : > { %v715_v17 = vpop.f32.mrf.mxu0 }
 0x11b   : > { %v716_v18 = vadd.f32 %v2627_v22, %v715_v17  ;;  %v2194_v17 = vld [vmem:[%s2981_s7 + $0x8] sm:$0xff] }
 0x11c   : > { %1098 = vmatpush.bf16.msra.mxu3 %v2194_v17 }
 0x11d   : > { %v733_v20 = vmax.f32 %v716_v18, 0.0 }
 0x11f   : > { %v741_v21 = vpack.c.bf16 %v733_v20, %v732_v19 }
 0x121   : > { %853 = vmatmul.bf16.gmra.mxu1 %v741_v21  ;;  %v2193_v21 = vld [vmem:[%s2981_s7] sm:$0xff] }
 0x122   : > { %1099 = vmatpush.bf16.msra.mxu3 %v2193_v21 }
 0x12e   : > { %v819_v23 = vpop.f32.mrf.mxu1 }
 0x12f   : > { %v820_v25 = vadd.f32 %v2648_v24, %v819_v23 }
 0x131   : > { %v859_v28 = vmax.f32 %v820_v25, 0.0 }
 0x136   : > { %v821_v26 = vpop.f32.mrf.mxu1 }
 0x137   : > { %v822_v27 = vadd.f32 %v2648_v24, %v821_v26  ;;  %v2264_v26 = vld [vmem:[%s2980_s6] ss:$0 sm:$0xff] }
 0x139   : > { %v860_v29 = vmax.f32 %v822_v27, 0.0 }
 0x13b   : > { %v875_v30 = vpack.c.bf16 %v860_v29, %v859_v28 }
 0x13d   : > { %959 = vmatmul.bf16.vlgmr.msra.gmra.mxu2 %v875_v30 }
 0x13e   : > { %v824_v22 = vpop.f32.mrf.mxu1 }
 0x13f   : > { %v825_v31 = vadd.f32 %v2648_v24, %v824_v22 }
 0x141   : > { %v861_v34 = vmax.f32 %v825_v31, 0.0 }
 0x146   : > { %v826_v32 = vpop.f32.mrf.mxu1 }
 0x147   : > { %v827_v33 = vadd.f32 %v2648_v24, %v826_v32 }
 0x149   : > { %v862_v35 = vmax.f32 %v827_v33, 0.0 }
 0x14b   : > { %v876_v36 = vpack.c.bf16 %v862_v35, %v861_v34 }
 0x14d   : > { %964 = vmatmul.bf16.gmra.mxu2 %v876_v36 }
 0x14e   : > { %v829_v37 = vpop.f32.mrf.mxu1 }
 0x14f   : > { %v830_v38 = vadd.f32 %v2648_v24, %v829_v37 }
 0x151   : > { %v863_v41 = vmax.f32 %v830_v38, 0.0 }
 0x156   : > { %v831_v39 = vpop.f32.mrf.mxu1 }
 0x157   : > { %v832_v40 = vadd.f32 %v2648_v24, %v831_v39 }
 0x159   : > { %v864_v42 = vmax.f32 %v832_v40, 0.0 }
 0x15b   : > { %v877_v43 = vpack.c.bf16 %v864_v42, %v863_v41 }
 0x15d   : > { %969 = vmatmul.bf16.gmra.mxu2 %v877_v43 }
 0x15e   : > { %v834_v44 = vpop.f32.mrf.mxu1 }
 0x15f   : > { %v835_v45 = vadd.f32 %v2648_v24, %v834_v44 }
 0x161   : > { %v865_v48 = vmax.f32 %v835_v45, 0.0 }
 0x166   : > { %v836_v46 = vpop.f32.mrf.mxu1 }
 0x167   : > { %v837_v47 = vadd.f32 %v2648_v24, %v836_v46 }
 0x169   : > { %v866_v49 = vmax.f32 %v837_v47, 0.0 }
 0x16b   : > { %v878_v50 = vpack.c.bf16 %v866_v49, %v865_v48 }
 0x16d   : > { %974 = vmatmul.bf16.gmra.mxu2 %v878_v50 }
 0x16e   : > { %v839_v51 = vpop.f32.mrf.mxu1 }
 0x16f   : > { %v840_v52 = vadd.f32 %v2648_v24, %v839_v51 }
 0x171   : > { %v867_v55 = vmax.f32 %v840_v52, 0.0 }
 0x176   : > { %v841_v53 = vpop.f32.mrf.mxu1 }
 0x177   : > { %v842_v54 = vadd.f32 %v2648_v24, %v841_v53 }
 0x179   : > { %v868_v56 = vmax.f32 %v842_v54, 0.0 }
 0x17b   : > { %v879_v57 = vpack.c.bf16 %v868_v56, %v867_v55 }
 0x17d   : > { %979 = vmatmul.bf16.gmra.mxu2 %v879_v57 }
 0x17e   : > { %v844_v58 = vpop.f32.mrf.mxu1 }
 0x17f   : > { %v845_v59 = vadd.f32 %v2648_v24, %v844_v58 }
 0x181   : > { %v869_v62 = vmax.f32 %v845_v59, 0.0 }
 0x186   : > { %v846_v60 = vpop.f32.mrf.mxu1 }
 0x187   : > { %v847_v61 = vadd.f32 %v2648_v24, %v846_v60 }
 0x189   : > { %v870_v63 = vmax.f32 %v847_v61, 0.0 }
 0x18b   : > { %v880_v0 = vpack.c.bf16 %v870_v63, %v869_v62 }
 0x18d   : > { %984 = vmatmul.bf16.gmra.mxu2 %v880_v0 }
 0x18e   : > { %v849_v2 = vpop.f32.mrf.mxu1 }
 0x18f   : > { %v850_v5 = vadd.f32 %v2648_v24, %v849_v2 }
 0x191   : > { %v871_v9 = vmax.f32 %v850_v5, 0.0 }
 0x196   : > { %v851_v6 = vpop.f32.mrf.mxu1 }
 0x197   : > { %v852_v7 = vadd.f32 %v2648_v24, %v851_v6 }
 0x199   : > { %v872_v10 = vmax.f32 %v852_v7, 0.0 }
 0x19b   : > { %v881_v11 = vpack.c.bf16 %v872_v10, %v871_v9 }
 0x19d   : > { %989 = vmatmul.bf16.gmra.mxu2 %v881_v11 }
 0x19e   : > { %v854_v12 = vpop.f32.mrf.mxu1 }
 0x19f   : > { %v855_v15 = vadd.f32 %v2648_v24, %v854_v12 }
 0x1a1   : > { %v873_v19 = vmax.f32 %v855_v15, 0.0 }
 0x1a6   : > { %v856_v16 = vpop.f32.mrf.mxu1 }
 0x1a7   : > { %v857_v18 = vadd.f32 %v2648_v24, %v856_v16  ;;  %v2776_v16 = vld [vmem:[%s2982_s8] ss:$0 sm:$0xff] }
 0x1a9   : > { %v874_v20 = vmax.f32 %v857_v18, 0.0 }
 0x1ab   : > { %v882_v23 = vpack.c.bf16 %v874_v20, %v873_v19  ;;  %v2782_v19 = vld [vmem:[%s2983_s9] ss:$0 sm:$0xff] }
 0x1ad   : > { %994 = vmatmul.bf16.gmra.mxu2 %v882_v23 }
 0x1c0   : > { %v960_v25 = vpop.f32.mrf.mxu2 }
 0x1c1   : > { %v2693_v27 = vadd.f32 %v2264_v26, %v960_v25 }
 0x1c3   : > { %v1000_v24 = vmax.f32 %v2693_v27, 0.0 }
 0x1c8   : > { %v962_v28 = vpop.f32.mrf.mxu2 }
 0x1c9   : > { %v2695_v29 = vadd.f32 %v2264_v26, %v962_v28 }
 0x1cb   : > { %v1001_v30 = vmax.f32 %v2695_v29, 0.0 }
 0x1cd   : > { %v1016_v22 = vpack.c.bf16 %v1001_v30, %v1000_v24 }
 0x1cf   : > { %1100 = vmatmul.bf16.vlgmr.msra.gmra.mxu3 %v1016_v22 }
 0x1d0   : > { %v965_v31 = vpop.f32.mrf.mxu2 }
 0x1d1   : > { %v2703_v32 = vadd.f32 %v2264_v26, %v965_v31 }
 0x1d3   : > { %v1002_v35 = vmax.f32 %v2703_v32, 0.0 }
 0x1d8   : > { %v967_v33 = vpop.f32.mrf.mxu2 }
 0x1d9   : > { %v2705_v34 = vadd.f32 %v2264_v26, %v967_v33 }
 0x1db   : > { %v1003_v36 = vmax.f32 %v2705_v34, 0.0 }
 0x1dd   : > { %v1017_v37 = vpack.c.bf16 %v1003_v36, %v1002_v35 }
 0x1df   : > { %1105 = vmatmul.bf16.gmra.mxu3 %v1017_v37 }
 0x1e0   : > { %v970_v38 = vpop.f32.mrf.mxu2 }
 0x1e1   : > { %v2713_v39 = vadd.f32 %v2264_v26, %v970_v38 }
 0x1e3   : > { %v1004_v42 = vmax.f32 %v2713_v39, 0.0 }
 0x1e8   : > { %v972_v40 = vpop.f32.mrf.mxu2 }
 0x1e9   : > { %v2715_v41 = vadd.f32 %v2264_v26, %v972_v40 }
 0x1eb   : > { %v1005_v43 = vmax.f32 %v2715_v41, 0.0 }
 0x1ed   : > { %v1018_v44 = vpack.c.bf16 %v1005_v43, %v1004_v42 }
 0x1ef   : > { %1110 = vmatmul.bf16.gmra.mxu3 %v1018_v44 }
 0x1f0   : > { %v975_v45 = vpop.f32.mrf.mxu2 }
 0x1f1   : > { %v2723_v46 = vadd.f32 %v2264_v26, %v975_v45 }
 0x1f3   : > { %v1006_v49 = vmax.f32 %v2723_v46, 0.0 }
 0x1f8   : > { %v977_v47 = vpop.f32.mrf.mxu2 }
 0x1f9   : > { %v2725_v48 = vadd.f32 %v2264_v26, %v977_v47 }
 0x1fb   : > { %v1007_v50 = vmax.f32 %v2725_v48, 0.0 }
 0x1fd   : > { %v1019_v51 = vpack.c.bf16 %v1007_v50, %v1006_v49 }
 0x1ff   : > { %1115 = vmatmul.bf16.gmra.mxu3 %v1019_v51 }
 0x200   : > { %v980_v52 = vpop.f32.mrf.mxu2 }
 0x201   : > { %v2733_v53 = vadd.f32 %v2264_v26, %v980_v52 }
 0x203   : > { %v1008_v56 = vmax.f32 %v2733_v53, 0.0 }
 0x208   : > { %v982_v54 = vpop.f32.mrf.mxu2 }
 0x209   : > { %v2735_v55 = vadd.f32 %v2264_v26, %v982_v54 }
 0x20b   : > { %v1009_v57 = vmax.f32 %v2735_v55, 0.0 }
 0x20d   : > { %v1020_v58 = vpack.c.bf16 %v1009_v57, %v1008_v56 }
 0x20f   : > { %1120 = vmatmul.bf16.gmra.mxu3 %v1020_v58 }
 0x210   : > { %v985_v59 = vpop.f32.mrf.mxu2 }
 0x211   : > { %v2743_v60 = vadd.f32 %v2264_v26, %v985_v59 }
 0x213   : > { %v1010_v63 = vmax.f32 %v2743_v60, 0.0 }
 0x218   : > { %v987_v61 = vpop.f32.mrf.mxu2 }
 0x219   : > { %v2745_v62 = vadd.f32 %v2264_v26, %v987_v61 }
 0x21b   : > { %v1011_v0 = vmax.f32 %v2745_v62, 0.0  ;;  %v2201_v62 = vld [vmem:[#allocation7] sm:$0xff] }
 0x21d   : > { %v1021_v1 = vpack.c.bf16 %v1011_v0, %v1010_v63 }
 0x21f   : > { %1125 = vmatmul.bf16.gmra.mxu3 %v1021_v1 }
 0x220   : > { %v990_v2 = vpop.f32.mrf.mxu2 }
 0x221   : > { %v2753_v3 = vadd.f32 %v2264_v26, %v990_v2 }
 0x223   : > { %v1012_v6 = vmax.f32 %v2753_v3, 0.0  ;;  %v2216_v3 = vld [vmem:[%s2987_s13 + $0x38] sm:$0xff] }
 0x224   : > { %1813 = vmatpush.bf16.msrb.mxu1 %v2216_v3 }
 0x228   : > { %v992_v4 = vpop.f32.mrf.mxu2 }
 0x229   : > { %v2755_v5 = vadd.f32 %v2264_v26, %v992_v4 }
 0x22b   : > { %v1013_v7 = vmax.f32 %v2755_v5, 0.0 }
 0x22d   : > { %v1022_v8 = vpack.c.bf16 %v1013_v7, %v1012_v6 }
 0x22f   : > { %1130 = vmatmul.bf16.gmra.mxu3 %v1022_v8 }
 0x230   : > { %v995_v9 = vpop.f32.mrf.mxu2 }
 0x231   : > { %v2763_v10 = vadd.f32 %v2264_v26, %v995_v9 }
 0x233   : > { %v1014_v13 = vmax.f32 %v2763_v10, 0.0  ;;  %v2212_v10 = vld [vmem:[%s2987_s13 + $0x18] sm:$0xff] }
 0x238   : > { %v997_v11 = vpop.f32.mrf.mxu2 }
 0x239   : > { %v2765_v12 = vadd.f32 %v2264_v26, %v997_v11 }
 0x23b   : > { %v1015_v14 = vmax.f32 %v2765_v12, 0.0 }
 0x23d   : > { %v1023_v15 = vpack.c.bf16 %v1015_v14, %v1014_v13 }
 0x23f   : > { %1135 = vmatmul.bf16.gmra.mxu3 %v1023_v15 }
 0x252   : > { %v1101_v17 = vpop.f32.mrf.mxu3 }
 0x253   : > { %v1102_v18 = vadd.f32 %v2776_v16, %v1101_v17 }
 0x255   : > { %2270 = vtanh.f32 %v1102_v18 }
 0x25a   : > { %v1103_v20 = vpop.f32.mrf.mxu3 }
 0x25b   : > { %v2271_v21 = vpop.eup %2270  ;;  %v1104_v23 = vadd.f32 %v2776_v16, %v1103_v20 }
 0x25c   : > { %v1161_v25 = vmul.f32 %v2271_v21, %v2782_v19 }
 0x25d   : > { %2272 = vtanh.f32 %v1104_v23 }
 0x25e   : > { %v1177_v26 = vsel %vm644_vm0, %v1161_v25, 0.0 }
 0x25f   : > { %1178 = vadd.xlane.f32.xlu0 %v1177_v26 }
 0x262   : > { %v1106_v28 = vpop.f32.mrf.mxu3 }
 0x263   : > { %v2273_v22 = vpop.eup %2272  ;;  %v1107_v31 = vadd.f32 %v2776_v16, %v1106_v28 }
 0x264   : > { %v1162_v33 = vmul.f32 %v2273_v22, %v2782_v19 }
 0x265   : > { %2274 = vtanh.f32 %v1107_v31 }
 0x266   : > { %v1180_v37 = vsel %vm644_vm0, %v1162_v33, 0.0 }
 0x267   : > { %1181 = vadd.xlane.f32.xlu0 %v1180_v37 }
 0x26a   : > { %v1108_v38 = vpop.f32.mrf.mxu3 }
 0x26b   : > { %v2275_v40 = vpop.eup %2274  ;;  %v1109_v44 = vadd.f32 %v2776_v16, %v1108_v38 }
 0x26c   : > { %v1163_v45 = vmul.f32 %v2275_v40, %v2782_v19 }
 0x26d   : > { %2276 = vtanh.f32 %v1109_v44 }
 0x26e   : > { %v1183_v47 = vsel %vm644_vm0, %v1163_v45, 0.0 }
 0x26f   : > { %1184 = vadd.xlane.f32.xlu1 %v1183_v47 }
 0x272   : > { %v1111_v51 = vpop.f32.mrf.mxu3 }
 0x273   : > { %v2277_v52 = vpop.eup %2276  ;;  %v1112_v54 = vadd.f32 %v2776_v16, %v1111_v51 }
 0x274   : > { %v1164_v58 = vmul.f32 %v2277_v52, %v2782_v19 }
 0x275   : > { %2278 = vtanh.f32 %v1112_v54 }
 0x276   : > { %v1186_v59 = vsel %vm644_vm0, %v1164_v58, 0.0 }
 0x277   : > { %1187 = vadd.xlane.f32.xlu1 %v1186_v59 }
 0x27a   : > { %v1113_v61 = vpop.f32.mrf.mxu3 }
 0x27b   : > { %v2279_v1 = vpop.eup %2278  ;;  %v1114_v2 = vadd.f32 %v2776_v16, %v1113_v61 }
 0x27c   : > { %v1165_v4 = vmul.f32 %v2279_v1, %v2782_v19 }
 0x27d   : > { %2280 = vtanh.f32 %v1114_v2 }
 0x27e   : > { %v1189_v8 = vsel %vm644_vm0, %v1165_v4, 0.0 }
 0x27f   : > { %1190 = vadd.xlane.f32.xlu2 %v1189_v8 }
 0x282   : > { %v1116_v9 = vpop.f32.mrf.mxu3 }
 0x283   : > { %v2281_v11 = vpop.eup %2280  ;;  %v1117_v15 = vadd.f32 %v2776_v16, %v1116_v9 }
 0x284   : > { %v1166_v17 = vmul.f32 %v2281_v11, %v2782_v19 }
 0x285   : > { %2282 = vtanh.f32 %v1117_v15 }
 0x286   : > { %v1192_v18 = vsel %vm644_vm0, %v1166_v17, 0.0 }
 0x287   : > { %1193 = vadd.xlane.f32.xlu2 %v1192_v18 }
 0x28a   : > { %v1118_v20 = vpop.f32.mrf.mxu3 }
 0x28b   : > { %v2283_v21 = vpop.eup %2282  ;;  %v1119_v23 = vadd.f32 %v2776_v16, %v1118_v20 }
 0x28c   : > { %v1167_v25 = vmul.f32 %v2283_v21, %v2782_v19 }
 0x28d   : > { %2284 = vtanh.f32 %v1119_v23 }
 0x28e   : > { %v1195_v26 = vsel %vm644_vm0, %v1167_v25, 0.0 }
 0x28f   : > { %1196 = vadd.xlane.f32.xlu0 %v1195_v26 }
 0x292   : > { %v1121_v28 = vpop.f32.mrf.mxu3 }
 0x293   : > { %v2285_v22 = vpop.eup %2284  ;;  %v1122_v31 = vadd.f32 %v2776_v16, %v1121_v28 }
 0x294   : > { %v1168_v33 = vmul.f32 %v2285_v22, %v2782_v19 }
 0x295   : > { %2286 = vtanh.f32 %v1122_v31 }
 0x296   : > { %v1198_v37 = vsel %vm644_vm0, %v1168_v33, 0.0 }
 0x297   : > { %1199 = vadd.xlane.f32.xlu1 %v1198_v37 }
 0x29a   : > { %v1123_v38 = vpop.f32.mrf.mxu3 }
 0x29b   : > { %v2287_v40 = vpop.eup %2286  ;;  %v1124_v44 = vadd.f32 %v2776_v16, %v1123_v38 }
 0x29c   : > { %v1169_v45 = vmul.f32 %v2287_v40, %v2782_v19 }
 0x29d   : > { %2288 = vtanh.f32 %v1124_v44 }
 0x29e   : > { %v1201_v47 = vsel %vm644_vm0, %v1169_v45, 0.0 }
 0x29f   : > { %1202 = vadd.xlane.f32.xlu2 %v1201_v47 }
 0x2a2   : > { %v1126_v51 = vpop.f32.mrf.mxu3 }
 0x2a3   : > { %v2289_v52 = vpop.eup %2288  ;;  %v1127_v54 = vadd.f32 %v2776_v16, %v1126_v51 }
 0x2a4   : > { %v1170_v58 = vmul.f32 %v2289_v52, %v2782_v19 }
 0x2a5   : > { %2290 = vtanh.f32 %v1127_v54 }
 0x2a6   : > { %v1204_v59 = vsel %vm644_vm0, %v1170_v58, 0.0  ;;  %v2830_v58 = vld [vmem:[#allocation2] ss:$0 sm:$0xff] }
 0x2a7   : > { %1205 = vadd.xlane.f32.xlu0 %v1204_v59 }
 0x2aa   : > { %v1128_v61 = vpop.f32.mrf.mxu3 }
 0x2ab   : > { %v2291_v1 = vpop.eup %2290  ;;  %v1129_v2 = vadd.f32 %v2776_v16, %v1128_v61 }
 0x2ac   : > { %v1171_v4 = vmul.f32 %v2291_v1, %v2782_v19 }
 0x2ad   : > { %2292 = vtanh.f32 %v1129_v2 }
 0x2ae   : > { %v1207_v8 = vsel %vm644_vm0, %v1171_v4, 0.0 }
 0x2af   : > { %1208 = vadd.xlane.f32.xlu1 %v1207_v8 }
 0x2b2   : > { %v1131_v9 = vpop.f32.mrf.mxu3 }
 0x2b3   : > { %v2293_v11 = vpop.eup %2292  ;;  %v1132_v15 = vadd.f32 %v2776_v16, %v1131_v9 }
 0x2b4   : > { %v1172_v17 = vmul.f32 %v2293_v11, %v2782_v19 }
 0x2b5   : > { %2294 = vtanh.f32 %v1132_v15 }
 0x2b6   : > { %v1210_v18 = vsel %vm644_vm0, %v1172_v17, 0.0 }
 0x2b7   : > { %1211 = vadd.xlane.f32.xlu2 %v1210_v18 }
 0x2ba   : > { %v1133_v20 = vpop.f32.mrf.mxu3 }
 0x2bb   : > { %v2295_v21 = vpop.eup %2294  ;;  %v1134_v23 = vadd.f32 %v2776_v16, %v1133_v20 }
 0x2bc   : > { %v1173_v25 = vmul.f32 %v2295_v21, %v2782_v19 }
 0x2bd   : > { %2296 = vtanh.f32 %v1134_v23 }
 0x2be   : > { %v1213_v26 = vsel %vm644_vm0, %v1173_v25, 0.0 }
 0x2bf   : > { %1214 = vadd.xlane.f32.xlu0 %v1213_v26 }
 0x2c2   : > { %v1136_v28 = vpop.f32.mrf.mxu3 }
 0x2c3   : > { %v2297_v22 = vpop.eup %2296  ;;  %v1137_v31 = vadd.f32 %v2776_v16, %v1136_v28 }
 0x2c4   : > { %v1174_v33 = vmul.f32 %v2297_v22, %v2782_v19 }
 0x2c5   : > { %2298 = vtanh.f32 %v1137_v31 }
 0x2c6   : > { %v1216_v37 = vsel %vm644_vm0, %v1174_v33, 0.0 }
 0x2c7   : > { %1217 = vadd.xlane.f32.xlu1 %v1216_v37 }
 0x2ca   : > { %v1138_v38 = vpop.f32.mrf.mxu3 }
 0x2cb   : > { %v2299_v40 = vpop.eup %2298  ;;  %v1139_v44 = vadd.f32 %v2776_v16, %v1138_v38 }
 0x2cc   : > { %v1175_v45 = vmul.f32 %v2299_v40, %v2782_v19 }
 0x2cd   : > { %2300 = vtanh.f32 %v1139_v44  ;;  %v2461_v44 = vmov 0  }
 0x2ce   : > { %v1219_v47 = vsel %vm644_vm0, %v1175_v45, 0.0  ;;  %2260 = vset.pattern.permute.xlu2 %v2461_v44  ;;  %2259 = vset.pattern.permute.xlu1 %v2461_v44 }
 0x2cf   : > { %1220 = vadd.xlane.f32.xlu2 %v1219_v47  ;;  %2261 = vset.pattern.permute.xlu0 %v2461_v44 }
 0x2d2   : > { %v1179_v51 = vpop.xlane.xlu0 %1178 }
 0x2d3   : > { %v2301_v52 = vpop.eup %2300  ;;  %v1229_v61 = vadd.f32 %v2830_v58, %v1179_v51 }
 0x2d4   : > { %v1176_v54 = vmul.f32 %v2301_v52, %v2782_v19 }
 0x2d5   : > { %v1246_v2 = vsel %vm1245_vm1, %v1229_v61, -inf }
 0x2d6   : > { %v1222_v59 = vsel %vm644_vm0, %v1176_v54, 0.0 }
 0x2d7   : > { %1223 = vadd.xlane.f32.xlu0 %v1222_v59 }
 0x2da   : > { %v1182_v1 = vpop.xlane.xlu0 %1181 }
 0x2db   : > { %v1230_v16 = vadd.f32 %v2830_v58, %v1182_v1 }
 0x2dd   : > { %v1247_v4 = vsel %vm1245_vm1, %v1230_v16, -inf }
 0x2de   : > { %v1248_v8 = vmax.f32 %v1246_v2, %v1247_v4 }
 0x2e0   : > { %v1249_v9 = vrot.slane %v1248_v8, 4 }
 0x2e2   : > { %v1250_v11 = vmax.f32 %v1248_v8, %v1249_v9  ;;  %v1185_v15 = vpop.xlane.xlu1 %1184 }
 0x2e3   : > { %v1231_v20 = vadd.f32 %v2830_v58, %v1185_v15 }
 0x2e4   : > { %v1251_v19 = vrot.slane %v1250_v11, 2 }
 0x2e5   : > { %v1255_v22 = vsel %vm1245_vm1, %v1231_v20, -inf }
 0x2e6   : > { %v1252_v17 = vmax.f32 %v1250_v11, %v1251_v19 }
 0x2e8   : > { %v1253_v18 = vrot.slane %v1252_v17, 1 }
 0x2ea   : > { %v1254_v21 = vmax.f32 %v1252_v17, %v1253_v18  ;;  %v1188_v23 = vpop.xlane.xlu1 %1187 }
 0x2eb   : > { %v1232_v25 = vadd.f32 %v2830_v58, %v1188_v23 }
 0x2ec   : > { %v1318_v26 = vsub.f32 %v1229_v61, %v1254_v21  ;;  %v1319_v28 = vsub.f32 %v1230_v16, %v1254_v21 }
 0x2ed   : > { %v1256_v31 = vsel %vm1245_vm1, %v1232_v25, -inf }
 0x2ee   : > { %v1334_v33 = vmul.f32 1.442695, %v1318_v26  ;;  %v1336_v37 = vmul.f32 1.442695, %v1319_v28  ;;  %v1257_v38 = vmax.f32 %v1255_v22, %v1256_v31 }
 0x2f0   : > { %2302 = vpow2.f32 %v1334_v33  ;;  %v1258_v40 = vrot.slane %v1257_v38, 4 }
 0x2f1   : > { %2304 = vpow2.f32 %v1336_v37 }
 0x2f2   : > { %v1259_v45 = vmax.f32 %v1257_v38, %v1258_v40  ;;  %v1191_v47 = vpop.xlane.xlu2 %1190 }
 0x2f3   : > { %v1233_v4 = vadd.f32 %v2830_v58, %v1191_v47 }
 0x2f4   : > { %v1260_v51 = vrot.slane %v1259_v45, 2 }
 0x2f5   : > { %v1264_v18 = vsel %vm1245_vm1, %v1233_v4, -inf }
 0x2f6   : > { %v2303_v52 = vpop.eup %2302  ;;  %v1261_v54 = vmax.f32 %v1259_v45, %v1260_v51 }
 0x2f7   : > { %v2305_v59 = vpop.eup %2304  ;;  %v1366_v61 = vsel %vm1245_vm1, %v2303_v52, 0.0 }
 0x2f8   : > { %v1367_v1 = vsel %vm1245_vm1, %v2305_v59, 0.0  ;;  %v1262_v16 = vrot.slane %v1261_v54, 1 }
 0x2f9   : > { %v1368_v2 = vadd.f32 %v1367_v1, %v1366_v61 }
 0x2fa   : > { %v1263_v8 = vmax.f32 %v1261_v54, %v1262_v16  ;;  %v1194_v9 = vpop.xlane.xlu2 %1193 }
 0x2fb   : > { %v1369_v11 = vrot.slane %v1368_v2, 4  ;;  %v1234_v15 = vadd.f32 %v2830_v58, %v1194_v9 }
 0x2fc   : > { %v1320_v19 = vsub.f32 %v1231_v20, %v1263_v8  ;;  %v1321_v17 = vsub.f32 %v1232_v25, %v1263_v8 }
 0x2fd   : > { %v1265_v21 = vsel %vm1245_vm1, %v1234_v15, -inf  ;;  %v1370_v23 = vadd.f32 %v1369_v11, %v1368_v2 }
 0x2fe   : > { %v1338_v26 = vmul.f32 1.442695, %v1320_v19  ;;  %v1340_v28 = vmul.f32 1.442695, %v1321_v17  ;;  %v1266_v22 = vmax.f32 %v1264_v18, %v1265_v21 }
 0x2ff   : > { %v1371_v31 = vrot.slane %v1370_v23, 2 }
 0x300   : > { %2306 = vpow2.f32 %v1338_v26  ;;  %v1267_v33 = vrot.slane %v1266_v22, 4 }
 0x301   : > { %2308 = vpow2.f32 %v1340_v28  ;;  %v1372_v37 = vadd.f32 %v1371_v31, %v1370_v23 }
 0x302   : > { %v1268_v38 = vmax.f32 %v1266_v22, %v1267_v33  ;;  %v1197_v25 = vpop.xlane.xlu0 %1196 }
 0x303   : > { %v1373_v40 = vrot.slane %v1372_v37, 1  ;;  %v1235_v2 = vadd.f32 %v2830_v58, %v1197_v25 }
 0x304   : > { %v1269_v44 = vrot.slane %v1268_v38, 2 }
 0x305   : > { %v1374_v45 = vadd.f32 %v1373_v40, %v1372_v37  ;;  %v1273_v23 = vsel %vm1245_vm1, %v1235_v2, -inf }
 0x306   : > { %v2847_v47 = vpop.eup %2306  ;;  %v1270_v20 = vmax.f32 %v1268_v38, %v1269_v44 }
 0x307   : > { %v2309_v51 = vpop.eup %2308  ;;  %v1375_v54 = vsel %vm1245_vm1, %v2847_v47, 0.0  ;;  %2310 = vrcp.f32 %v1374_v45 }
 0x308   : > { %v1376_v61 = vsel %vm1245_vm1, %v2309_v51, 0.0  ;;  %v1271_v1 = vrot.slane %v1270_v20, 1 }
 0x309   : > { %v1377_v16 = vadd.f32 %v1376_v61, %v1375_v54 }
 0x30a   : > { %v1272_v8 = vmax.f32 %v1270_v20, %v1271_v1  ;;  %v1200_v9 = vpop.xlane.xlu1 %1199 }
 0x30b   : > { %v1378_v11 = vrot.slane %v1377_v16, 4  ;;  %v1236_v19 = vadd.f32 %v2830_v58, %v1200_v9 }
 0x30c   : > { %v1322_v17 = vsub.f32 %v1233_v4, %v1272_v8  ;;  %v1323_v18 = vsub.f32 %v1234_v15, %v1272_v8 }
 0x30d   : > { %v2311_v21 = vpop.eup %2310  ;;  %v1274_v26 = vsel %vm1245_vm1, %v1236_v19, -inf  ;;  %v1379_v28 = vadd.f32 %v1378_v11, %v1377_v16 }
 0x30e   : > { %v1342_v22 = vmul.f32 1.442695, %v1322_v17  ;;  %v1344_v31 = vmul.f32 1.442695, %v1323_v18  ;;  %v1275_v33 = vmax.f32 %v1273_v23, %v1274_v26  ;;  %v1446_v37 = vmul.f32 0.25, %v2311_v21 }
 0x30f   : > { %v1380_v38 = vrot.slane %v1379_v28, 2 }
 0x310   : > { %2312 = vpow2.f32 %v1342_v22  ;;  %v1276_v40 = vrot.slane %v1275_v33, 4  ;;  %v1455_v44 = vmul.f32 %v2305_v59, %v1446_v37  ;;  %v1454_v45 = vmul.f32 %v2303_v52, %v1446_v37 }
 0x311   : > { %2314 = vpow2.f32 %v1344_v31  ;;  %v1381_v20 = vadd.f32 %v1380_v38, %v1379_v28 }
 0x312   : > { %v1277_v25 = vmax.f32 %v1275_v33, %v1276_v40  ;;  %1477 = vperm.xlu2 %2260, %v1455_v44   ;;  %1472 = vperm.xlu1 %2259, %v1454_v45   ;;  %v1203_v16 = vpop.xlane.xlu2 %1202 }
 0x313   : > { %v1382_v4 = vrot.slane %v1381_v20, 1  ;;  %v1237_v17 = vadd.f32 %v2830_v58, %v1203_v16 }
 0x314   : > { %v1278_v15 = vrot.slane %v1277_v25, 2 }
 0x315   : > { %v1383_v54 = vadd.f32 %v1382_v4, %v1381_v20  ;;  %v1282_v33 = vsel %vm1245_vm1, %v1237_v17, -inf }
 0x316   : > { %v2856_v61 = vpop.eup %2312  ;;  %v1279_v1 = vmax.f32 %v1277_v25, %v1278_v15 }
 0x317   : > { %v2315_v8 = vpop.eup %2314  ;;  %v1384_v9 = vsel %vm1245_vm1, %v2856_v61, 0.0  ;;  %2316 = vrcp.f32 %v1383_v54 }
 0x318   : > { %v1385_v59 = vsel %vm1245_vm1, %v2315_v8, 0.0  ;;  %v1280_v52 = vrot.slane %v1279_v1, 1 }
 0x319   : > { %v1386_v11 = vadd.f32 %v1385_v59, %v1384_v9 }
 0x31a   : > { %v1281_v18 = vmax.f32 %v1279_v1, %v1280_v52  ;;  %v1206_v21 = vpop.xlane.xlu0 %1205 }
 0x31b   : > { %v1387_v23 = vrot.slane %v1386_v11, 4  ;;  %v1238_v26 = vadd.f32 %v2830_v58, %v1206_v21 }
 0x31c   : > { %v1324_v28 = vsub.f32 %v1235_v2, %v1281_v18  ;;  %v1325_v22 = vsub.f32 %v1236_v19, %v1281_v18 }
 0x31d   : > { %v2317_v31 = vpop.eup %2316  ;;  %v1283_v37 = vsel %vm1245_vm1, %v1238_v26, -inf  ;;  %v1388_v38 = vadd.f32 %v1387_v23, %v1386_v11 }
 0x31e   : > { %v1346_v40 = vmul.f32 1.442695, %v1324_v28  ;;  %v1348_v44 = vmul.f32 1.442695, %v1325_v22  ;;  %v1284_v45 = vmax.f32 %v1282_v33, %v1283_v37  ;;  %v1447_v20 = vmul.f32 0.25, %v2317_v31 }
 0x31f   : > { %v1389_v25 = vrot.slane %v1388_v38, 2 }
 0x320   : > { %2318 = vpow2.f32 %v1346_v40  ;;  %v1285_v4 = vrot.slane %v1284_v45, 4  ;;  %v1456_v15 = vmul.f32 %v2847_v47, %v1447_v20  ;;  %v1457_v54 = vmul.f32 %v2309_v51, %v1447_v20 }
 0x321   : > { %2320 = vpow2.f32 %v1348_v44  ;;  %v1390_v1 = vadd.f32 %v1389_v25, %v1388_v38 }
 0x322   : > { %v1286_v2 = vmax.f32 %v1284_v45, %v1285_v4  ;;  %1482 = vperm.xlu0 %2261, %v1456_v15   ;;  %1487 = vperm.xlu2 %2260, %v1457_v54   ;;  %v1209_v11 = vpop.xlane.xlu1 %1208 }
 0x323   : > { %v1391_v19 = vrot.slane %v1390_v1, 1  ;;  %v1239_v28 = vadd.f32 %v2830_v58, %v1209_v11 }
 0x324   : > { %v1287_v16 = vrot.slane %v1286_v2, 2 }
 0x325   : > { %v1392_v9 = vadd.f32 %v1391_v19, %v1390_v1  ;;  %v1291_v45 = vsel %vm1245_vm1, %v1239_v28, -inf }
 0x326   : > { %v2866_v59 = vpop.eup %2318  ;;  %v1288_v52 = vmax.f32 %v1286_v2, %v1287_v16 }
 0x327   : > { %v2321_v18 = vpop.eup %2320  ;;  %v1393_v21 = vsel %vm1245_vm1, %v2866_v59, 0.0  ;;  %2322 = vrcp.f32 %v1392_v9 }
 0x328   : > { %v1394_v47 = vsel %vm1245_vm1, %v2321_v18, 0.0  ;;  %v1289_v51 = vrot.slane %v1288_v52, 1 }
 0x329   : > { %v1395_v23 = vadd.f32 %v1394_v47, %v1393_v21 }
 0x32a   : > { %v1290_v22 = vmax.f32 %v1288_v52, %v1289_v51  ;;  %v1212_v31 = vpop.xlane.xlu2 %1211 }
 0x32b   : > { %v1396_v33 = vrot.slane %v1395_v23, 4  ;;  %v1240_v37 = vadd.f32 %v2830_v58, %v1212_v31 }
 0x32c   : > { %v1326_v38 = vsub.f32 %v1237_v17, %v1290_v22  ;;  %v1327_v40 = vsub.f32 %v1238_v26, %v1290_v22 }
 0x32d   : > { %v2323_v44 = vpop.eup %2322  ;;  %v1292_v20 = vsel %vm1245_vm1, %v1240_v37, -inf  ;;  %v1397_v25 = vadd.f32 %v1396_v33, %v1395_v23 }
 0x32e   : > { %v1350_v4 = vmul.f32 1.442695, %v1326_v38  ;;  %v1352_v15 = vmul.f32 1.442695, %v1327_v40  ;;  %v1293_v54 = vmax.f32 %v1291_v45, %v1292_v20  ;;  %v1448_v1 = vmul.f32 0.25, %v2323_v44 }
 0x32f   : > { %v1398_v2 = vrot.slane %v1397_v25, 2 }
 0x330   : > { %2324 = vpow2.f32 %v1350_v4  ;;  %v1294_v19 = vrot.slane %v1293_v54, 4  ;;  %v1459_v16 = vmul.f32 %v2315_v8, %v1448_v1  ;;  %v1458_v9 = vmul.f32 %v2856_v61, %v1448_v1 }
 0x331   : > { %2326 = vpow2.f32 %v1352_v15  ;;  %v1399_v52 = vadd.f32 %v1398_v2, %v1397_v25 }
 0x332   : > { %v1295_v17 = vmax.f32 %v1293_v54, %v1294_v19  ;;  %1497 = vperm.xlu2 %2260, %v1459_v16   ;;  %1492 = vperm.xlu1 %2259, %v1458_v9   ;;  %v1215_v23 = vpop.xlane.xlu0 %1214 }
 0x333   : > { %v1400_v26 = vrot.slane %v1399_v52, 1  ;;  %v1241_v38 = vadd.f32 %v2830_v58, %v1215_v23 }
 0x334   : > { %v1296_v11 = vrot.slane %v1295_v17, 2 }
 0x335   : > { %v1401_v21 = vadd.f32 %v1400_v26, %v1399_v52  ;;  %v1300_v54 = vsel %vm1245_vm1, %v1241_v38, -inf }
 0x336   : > { %v2876_v47 = vpop.eup %2324  ;;  %v1297_v51 = vmax.f32 %v1295_v17, %v1296_v11 }
 0x337   : > { %v2327_v22 = vpop.eup %2326  ;;  %v1402_v31 = vsel %vm1245_vm1, %v2876_v47, 0.0  ;;  %2328 = vrcp.f32 %v1401_v21 }
 0x338   : > { %v1403_v8 = vsel %vm1245_vm1, %v2327_v22, 0.0  ;;  %v1298_v61 = vrot.slane %v1297_v51, 1 }
 0x339   : > { %v1404_v33 = vadd.f32 %v1403_v8, %v1402_v31 }
 0x33a   : > { %v1299_v40 = vmax.f32 %v1297_v51, %v1298_v61  ;;  %v1218_v44 = vpop.xlane.xlu1 %1217 }
 0x33b   : > { %v1405_v45 = vrot.slane %v1404_v33, 4  ;;  %v1242_v20 = vadd.f32 %v2830_v58, %v1218_v44 }
 0x33c   : > { %v1328_v25 = vsub.f32 %v1239_v28, %v1299_v40  ;;  %v1329_v4 = vsub.f32 %v1240_v37, %v1299_v40 }
 0x33d   : > { %v2329_v15 = vpop.eup %2328  ;;  %v1301_v1 = vsel %vm1245_vm1, %v1242_v20, -inf  ;;  %v1406_v2 = vadd.f32 %v1405_v45, %v1404_v33 }
 0x33e   : > { %v1354_v19 = vmul.f32 1.442695, %v1328_v25  ;;  %v1356_v16 = vmul.f32 1.442695, %v1329_v4  ;;  %v1302_v9 = vmax.f32 %v1300_v54, %v1301_v1  ;;  %v1449_v52 = vmul.f32 0.25, %v2329_v15 }
 0x33f   : > { %v1407_v17 = vrot.slane %v1406_v2, 2 }
 0x340   : > { %2330 = vpow2.f32 %v1354_v19  ;;  %v1303_v26 = vrot.slane %v1302_v9, 4  ;;  %v1461_v11 = vmul.f32 %v2321_v18, %v1449_v52  ;;  %v1460_v21 = vmul.f32 %v2866_v59, %v1449_v52 }
 0x341   : > { %2332 = vpow2.f32 %v1356_v16  ;;  %v1408_v51 = vadd.f32 %v1407_v17, %v1406_v2 }
 0x342   : > { %v1304_v28 = vmax.f32 %v1302_v9, %v1303_v26  ;;  %1507 = vperm.xlu2 %2260, %v1461_v11   ;;  %1502 = vperm.xlu1 %2259, %v1460_v21   ;;  %v1221_v33 = vpop.xlane.xlu2 %1220 }
 0x343   : > { %v1409_v37 = vrot.slane %v1408_v51, 1  ;;  %v1243_v59 = vadd.f32 %v2830_v58, %v1221_v33 }
 0x344   : > { %v1305_v23 = vrot.slane %v1304_v28, 2 }
 0x345   : > { %v1410_v31 = vadd.f32 %v1409_v37, %v1408_v51  ;;  %v1309_v9 = vsel %vm1245_vm1, %v1243_v59, -inf }
 0x346   : > { %v2331_v8 = vpop.eup %2330  ;;  %v1306_v61 = vmax.f32 %v1304_v28, %v1305_v23 }
 0x347   : > { %v2333_v40 = vpop.eup %2332  ;;  %v1411_v44 = vsel %vm1245_vm1, %v2331_v8, 0.0  ;;  %2334 = vrcp.f32 %v1410_v31 }
 0x348   : > { %v1412_v45 = vsel %vm1245_vm1, %v2333_v40, 0.0  ;;  %v1307_v18 = vrot.slane %v1306_v61, 1 }
 0x349   : > { %v1413_v25 = vadd.f32 %v1412_v45, %v1411_v44 }
 0x34a   : > { %v1308_v4 = vmax.f32 %v1306_v61, %v1307_v18  ;;  %v1224_v15 = vpop.xlane.xlu0 %1223 }
 0x34b   : > { %v1414_v54 = vrot.slane %v1413_v25, 4  ;;  %v1244_v1 = vadd.f32 %v2830_v58, %v1224_v15 }
 0x34c   : > { %v1330_v2 = vsub.f32 %v1241_v38, %v1308_v4  ;;  %v1331_v19 = vsub.f32 %v1242_v20, %v1308_v4 }
 0x34d   : > { %v2335_v16 = vpop.eup %2334  ;;  %v1310_v52 = vsel %vm1245_vm1, %v1244_v1, -inf  ;;  %v1415_v17 = vadd.f32 %v1414_v54, %v1413_v25 }
 0x34e   : > { %v1358_v26 = vmul.f32 1.442695, %v1330_v2  ;;  %v1360_v11 = vmul.f32 1.442695, %v1331_v19  ;;  %v1311_v21 = vmax.f32 %v1309_v9, %v1310_v52  ;;  %v1450_v51 = vmul.f32 0.25, %v2335_v16 }
 0x34f   : > { %v1416_v28 = vrot.slane %v1415_v17, 2 }
 0x350   : > { %2336 = vpow2.f32 %v1358_v26  ;;  %v1312_v37 = vrot.slane %v1311_v21, 4  ;;  %v1463_v23 = vmul.f32 %v2327_v22, %v1450_v51  ;;  %v1462_v31 = vmul.f32 %v2876_v47, %v1450_v51 }
 0x351   : > { %2338 = vpow2.f32 %v1360_v11  ;;  %v1417_v58 = vadd.f32 %v1416_v28, %v1415_v17 }
 0x352   : > { %v1313_v38 = vmax.f32 %v1311_v21, %v1312_v37  ;;  %1517 = vperm.xlu0 %2261, %v1463_v23   ;;  %1512 = vperm.xlu1 %2259, %v1462_v31  }
 0x353   : > { %v1418_v20 = vrot.slane %v1417_v58, 1 }
 0x354   : > { %v1314_v61 = vrot.slane %v1313_v38, 2 }
 0x355   : > { %v1419_v33 = vadd.f32 %v1418_v20, %v1417_v58 }
 0x356   : > { %v2337_v44 = vpop.eup %2336  ;;  %v1315_v45 = vmax.f32 %v1313_v38, %v1314_v61 }
 0x357   : > { %v2339_v18 = vpop.eup %2338  ;;  %v1420_v25 = vsel %vm1245_vm1, %v2337_v44, 0.0  ;;  %2340 = vrcp.f32 %v1419_v33 }
 0x358   : > { %v1421_v4 = vsel %vm1245_vm1, %v2339_v18, 0.0  ;;  %v1316_v15 = vrot.slane %v1315_v45, 1 }
 0x359   : > { %v1422_v22 = vadd.f32 %v1421_v4, %v1420_v25 }
 0x35a   : > { %v1317_v54 = vmax.f32 %v1315_v45, %v1316_v15 }
 0x35b   : > { %v1423_v47 = vrot.slane %v1422_v22, 4 }
 0x35c   : > { %v1332_v2 = vsub.f32 %v1243_v59, %v1317_v54  ;;  %v1333_v19 = vsub.f32 %v1244_v1, %v1317_v54  ;;  %v2208_v54 = vld [vmem:[#allocation7 + $0x38] sm:$0xff] }
 0x35d   : > { %v2341_v16 = vpop.eup %2340  ;;  %v1424_v9 = vadd.f32 %v1423_v47, %v1422_v22  ;;  %1730 = vmatpush.bf16.msrb.mxu0 %v2208_v54 }
 0x35e   : > { %v1362_v52 = vmul.f32 1.442695, %v1332_v2  ;;  %v1364_v17 = vmul.f32 1.442695, %v1333_v19  ;;  %v1451_v26 = vmul.f32 0.25, %v2341_v16 }
 0x35f   : > { %v1425_v11 = vrot.slane %v1424_v9, 2 }
 0x360   : > { %2342 = vpow2.f32 %v1362_v52  ;;  %v1464_v21 = vmul.f32 %v2331_v8, %v1451_v26  ;;  %v1465_v51 = vmul.f32 %v2333_v40, %v1451_v26  ;;  %v2206_v52 = vld [vmem:[#allocation7 + $0x28] sm:$0xff] }
 0x361   : > { %2344 = vpow2.f32 %v1364_v17  ;;  %v1426_v28 = vadd.f32 %v1425_v11, %v1424_v9  ;;  %v2207_v9 = vld [vmem:[#allocation7 + $0x30] sm:$0xff] }
 0x362   : > { %1522 = vperm.xlu2 %2260, %v1464_v21   ;;  %1527 = vperm.xlu1 %2259, %v1465_v51   ;;  %v2203_v51 = vld [vmem:[#allocation7 + $0x10] sm:$0xff] }
 0x363   : > { %v1427_v37 = vrot.slane %v1426_v28, 1  ;;  %1731 = vmatpush.bf16.msrb.mxu0 %v2207_v9 }
 0x365   : > { %v1428_v23 = vadd.f32 %v1427_v37, %v1426_v28 }
 0x366   : > { %v2343_v31 = vpop.eup %2342 }
 0x367   : > { %v2345_v58 = vpop.eup %2344  ;;  %v1429_v59 = vsel %vm1245_vm1, %v2343_v31, 0.0  ;;  %2346 = vrcp.f32 %v1428_v23  ;;  %1732 = vmatpush.bf16.msrb.mxu0 %v2206_v52 }
 0x368   : > { %v1430_v1 = vsel %vm1245_vm1, %v2345_v58, 0.0 }
 0x369   : > { %v1431_v38 = vadd.f32 %v1430_v1, %v1429_v59  ;;  %v2202_v59 = vld [vmem:[#allocation7 + $0x8] sm:$0xff] }
 0x36b   : > { %v1432_v20 = vrot.slane %v1431_v38, 4 }
 0x36c   : > { %v1478_v17 = vpop.permute.xlu2 %1477 }
 0x36d   : > { %v2347_v61 = vpop.eup %2346  ;;  %v1433_v33 = vadd.f32 %v1432_v20, %v1431_v38  ;;  %v1551_v39 = vmul.f32 %v1478_v17, %v1001_v30 }
 0x36e   : > { %v1452_v45 = vmul.f32 0.25, %v2347_v61 }
 0x36f   : > { %v1434_v8 = vrot.slane %v1433_v33, 2 }
 0x370   : > { %v1467_v40 = vmul.f32 %v2339_v18, %v1452_v45  ;;  %v1466_v25 = vmul.f32 %v2337_v44, %v1452_v45  ;;  %v2205_v18 = vld [vmem:[#allocation7 + $0x20] sm:$0xff]  ;;  %v2204_v44 = vld [vmem:[#allocation7 + $0x18] sm:$0xff] }
 0x371   : > { %v1435_v4 = vadd.f32 %v1434_v8, %v1433_v33  ;;  %1733 = vmatpush.bf16.msrb.mxu0 %v2205_v18  ;;  %v2215_v18 = vld [vmem:[%s2987_s13 + $0x30] sm:$0xff] }
 0x372   : > { %1537 = vperm.xlu2 %2260, %v1467_v40   ;;  %1532 = vperm.xlu0 %2261, %v1466_v25  }
 0x373   : > { %v1436_v15 = vrot.slane %v1435_v4, 1  ;;  %1814 = vmatpush.bf16.msrb.mxu1 %v2215_v18 }
 0x375   : > { %v1437_v22 = vadd.f32 %v1436_v15, %v1435_v4  ;;  %1734 = vmatpush.bf16.msrb.mxu0 %v2204_v44 }
 0x377   : > { %2348 = vrcp.f32 %v1437_v22 }
 0x379   : > { %1735 = vmatpush.bf16.msrb.mxu0 %v2203_v51 }
 0x37c   : > { %v1488_v11 = vpop.permute.xlu2 %1487 }
 0x37d   : > { %v2349_v47 = vpop.eup %2348  ;;  %1736 = vmatpush.bf16.msrb.mxu0 %v2202_v59  ;;  %v1553_v45 = vmul.f32 %v1488_v11, %v1003_v36 }
 0x37e   : > { %v1453_v2 = vmul.f32 0.25, %v2349_v47 }
 0x380   : > { %v1469_v19 = vmul.f32 %v2345_v58, %v1453_v2  ;;  %v1468_v16 = vmul.f32 %v2343_v31, %v1453_v2 }
 0x381   : > { %1737 = vmatpush.bf16.msrb.mxu0 %v2201_v62 }
 0x382   : > { %1547 = vperm.xlu0 %2261, %v1469_v19   ;;  %1542 = vperm.xlu1 %2259, %v1468_v16  }
 0x384   : > { %v1473_v26 = vpop.permute.xlu1 %1472 }
 0x385   : > { %v1550_v8 = vmul.f32 %v1473_v26, %v1000_v24 }
 0x38c   : > { %v1498_v28 = vpop.permute.xlu2 %1497 }
 0x38d   : > { %v1555_v25 = vmul.f32 %v1498_v28, %v1005_v43 }
 0x394   : > { %v1483_v31 = vpop.permute.xlu0 %1482 }
 0x395   : > { %v1552_v38 = vmul.f32 %v1483_v31, %v1002_v35 }
 0x397   : > { %v1573_v34 = vadd.f32 %v1553_v45, %v1552_v38 }
 0x399   : > { %v1574_v53 = vrot.slane %v1573_v34, 4 }
 0x39b   : > { %v1575_v4 = vadd.f32 %v1574_v53, %v1573_v34 }
 0x39c   : > { %v1508_v23 = vpop.permute.xlu2 %1507 }
 0x39d   : > { %v1557_v27 = vmul.f32 %v1508_v23, %v1007_v50  ;;  %v1576_v19 = vrot.slane %v1575_v4, 2 }
 0x39f   : > { %v1577_v44 = vadd.f32 %v1576_v19, %v1575_v4 }
 0x3a1   : > { %v1578_v23 = vrot.slane %v1577_v44, 1 }
 0x3a4   : > { %v1493_v21 = vpop.permute.xlu1 %1492 }
 0x3a5   : > { %v1554_v61 = vmul.f32 %v1493_v21, %v1004_v42  ;;  %v1566_v42 = vadd.f32 %v1551_v39, %v1550_v8 }
 0x3a7   : > { %v1580_v36 = vadd.f32 %v1555_v25, %v1554_v61  ;;  %v1567_v30 = vrot.slane %v1566_v42, 4  ;;  %v1579_v25 = vadd.f32 %v1578_v23, %v1577_v44  ;;  %v2268_v44 = vld [vmem:[%s2986_s12] ss:$0 sm:$0xff] }
 0x3a9   : > { %v1568_v22 = vadd.f32 %v1567_v30, %v1566_v42  ;;  %v1623_v12 = vpack.c.bf16 %v1579_v25, %v1579_v25 }
 0x3ab   : > { %v1569_v5 = vrot.slane %v1568_v22, 2 }
 0x3ad   : > { %v1570_v21 = vadd.f32 %v1569_v5, %v1568_v22 }
 0x3b4   : > { %v1503_v37 = vpop.permute.xlu1 %1502 }
 0x3b5   : > { %v1556_v40 = vmul.f32 %v1503_v37, %v1006_v49  ;;  %v2214_v37 = vld [vmem:[%s2987_s13 + $0x28] sm:$0xff] }
 0x3b6   : > { %1815 = vmatpush.bf16.msrb.mxu1 %v2214_v37 }
 0x3b7   : > { %v1587_v41 = vadd.f32 %v1557_v27, %v1556_v40  ;;  %v2213_v40 = vld [vmem:[%s2987_s13 + $0x20] sm:$0xff] }
 0x3ba   : > { %1816 = vmatpush.bf16.msrb.mxu1 %v2213_v40 }
 0x3bc   : > { %v1523_v1 = vpop.permute.xlu2 %1522 }
 0x3bd   : > { %v1560_v43 = vmul.f32 %v1523_v1, %v1010_v63 }
 0x3be   : > { %1817 = vmatpush.bf16.msrb.mxu1 %v2212_v10 }
 0x3c4   : > { %v1513_v58 = vpop.permute.xlu1 %1512  ;;  %v1518_v20 = vpop.permute.xlu0 %1517 }
 0x3c5   : > { %v1558_v32 = vmul.f32 %v1513_v58, %v1008_v56  ;;  %v1559_v35 = vmul.f32 %v1518_v20, %v1009_v57  ;;  %v1581_v56 = vrot.slane %v1580_v36, 4  ;;  %v1588_v57 = vrot.slane %v1587_v41, 4 }
 0x3c6   : > { %v1571_v20 = vrot.slane %v1570_v21, 1 }
 0x3c7   : > { %v1594_v46 = vadd.f32 %v1559_v35, %v1558_v32  ;;  %v1582_v63 = vadd.f32 %v1581_v56, %v1580_v36  ;;  %v1589_v54 = vadd.f32 %v1588_v57, %v1587_v41  ;;  %v2211_v56 = vld [vmem:[%s2987_s13 + $0x10] sm:$0xff] }
 0x3c8   : > { %v1572_v27 = vadd.f32 %v1571_v20, %v1570_v21  ;;  %1818 = vmatpush.bf16.msrb.mxu1 %v2211_v56 }
 0x3c9   : > { %v1583_v9 = vrot.slane %v1582_v63, 2 }
 0x3cb   : > { %v1584_v26 = vadd.f32 %v1583_v9, %v1582_v63 }
 0x3cc   : > { %v1538_v49 = vpop.permute.xlu2 %1537 }
 0x3cd   : > { %v1563_v48 = vmul.f32 %v1538_v49, %v1013_v7  ;;  %v1585_v58 = vrot.slane %v1584_v26, 1 }
 0x3cf   : > { %v1586_v39 = vadd.f32 %v1585_v58, %v1584_v26 }
 0x3d1   : > { %v1624_v41 = vpack.c.bf16 %v1586_v39, %v1586_v39 }
 0x3d4   : > { %v1528_v33 = vpop.permute.xlu1 %1527 }
 0x3d5   : > { %v1561_v24 = vmul.f32 %v1528_v33, %v1011_v0  ;;  %v1595_v0 = vrot.slane %v1594_v46, 4 }
 0x3d7   : > { %v1601_v55 = vadd.f32 %v1561_v24, %v1560_v43  ;;  %v1596_v2 = vadd.f32 %v1595_v0, %v1594_v46  ;;  %v1622_v46 = vpack.c.bf16 %v1572_v27, %v1572_v27 }
 0x3d9   : > { %v1602_v15 = vrot.slane %v1601_v55, 4  ;;  %v1597_v7 = vrot.slane %v1596_v2, 2  ;;  %v1658_v62 = vunpack.c.l.b16 %v1622_v46 }
 0x3db   : > { %v1603_v16 = vadd.f32 %v1602_v15, %v1601_v55  ;;  %v1598_v28 = vadd.f32 %v1597_v7, %v1596_v2 }
 0x3dd   : > { %v1604_v17 = vrot.slane %v1603_v16, 2  ;;  %v1599_v8 = vrot.slane %v1598_v28, 1 }
 0x3df   : > { %v1605_v31 = vadd.f32 %v1604_v17, %v1603_v16  ;;  %v1600_v42 = vadd.f32 %v1599_v8, %v1598_v28  ;;  %v2269_v28 = vld [vmem:[%s2988_s14] ss:$0 sm:$0xff] }
 0x3e1   : > { %v1606_v32 = vrot.slane %v1605_v31, 1  ;;  %v1626_v55 = vpack.c.bf16 %v1600_v42, %v1600_v42 }
 0x3e3   : > { %v1662_v15 = vunpack.c.l.b16 %v1626_v55 }
 0x3e4   : > { %v1533_v29 = vpop.permute.xlu0 %1532 }
 0x3e5   : > { %v1562_v50 = vmul.f32 %v1533_v29, %v1012_v6  ;;  %v1590_v6 = vrot.slane %v1589_v54, 2  ;;  %v1659_v29 = vunpack.c.l.b16 %v1623_v12 }
 0x3e7   : > { %v1608_v60 = vadd.f32 %v1563_v48, %v1562_v50  ;;  %v1591_v51 = vadd.f32 %v1590_v6, %v1589_v54  ;;  %v1660_v48 = vunpack.c.l.b16 %v1624_v41  ;;  %v1667_v63 = vsel %vm1666_vm2, %v1659_v29, %v1658_v62 }
 0x3e9   : > { %v1609_v47 = vrot.slane %v1608_v60, 4  ;;  %v1592_v61 = vrot.slane %v1591_v51, 1 }
 0x3eb   : > { %v1610_v52 = vadd.f32 %v1609_v47, %v1608_v60  ;;  %v1593_v24 = vadd.f32 %v1592_v61, %v1591_v51  ;;  %v2210_v60 = vld [vmem:[%s2987_s13 + $0x8] sm:$0xff]  ;;  %v1669_v47 = vsel %vm1668_vm3, %v1660_v48, %v1667_v63 }
 0x3ec   : > { %1819 = vmatpush.bf16.msrb.mxu1 %v2210_v60 }
 0x3ed   : > { %v1611_v11 = vrot.slane %v1610_v52, 2  ;;  %v1625_v49 = vpack.c.bf16 %v1593_v24, %v1593_v24 }
 0x3ef   : > { %v1612_v59 = vadd.f32 %v1611_v11, %v1610_v52  ;;  %v1661_v0 = vunpack.c.l.b16 %v1625_v49  ;;  %v2209_v52 = vld [vmem:[%s2987_s13] sm:$0xff] }
 0x3f0   : > { %1820 = vmatpush.bf16.msrb.mxu1 %v2209_v52 }
 0x3f1   : > { %v1613_v34 = vrot.slane %v1612_v59, 1  ;;  %v1671_v16 = vsel %vm1670_vm4, %v1661_v0, %v1669_v47 }
 0x3f2   : > { %v1673_v9 = vsel %vm1672_vm5, %v1662_v15, %v1671_v16 }
 0x3f3   : > { %v1614_v43 = vadd.f32 %v1613_v34, %v1612_v59 }
 0x3f4   : > { %v1543_v1 = vpop.permute.xlu1 %1542  ;;  %v1548_v38 = vpop.permute.xlu0 %1547 }
 0x3f5   : > { %v1564_v33 = vmul.f32 %v1543_v1, %v1014_v13  ;;  %v1565_v45 = vmul.f32 %v1548_v38, %v1015_v14  ;;  %v1607_v13 = vadd.f32 %v1606_v32, %v1605_v31  ;;  %v1628_v50 = vpack.c.bf16 %v1614_v43, %v1614_v43 }
 0x3f7   : > { %v1615_v35 = vadd.f32 %v1565_v45, %v1564_v33  ;;  %v1627_v30 = vpack.c.bf16 %v1607_v13, %v1607_v13  ;;  %v1664_v2 = vunpack.c.l.b16 %v1628_v50 }
 0x3f9   : > { %v1616_v36 = vrot.slane %v1615_v35, 4  ;;  %v1663_v22 = vunpack.c.l.b16 %v1627_v30 }
 0x3fb   : > { %v1617_v14 = vadd.f32 %v1616_v36, %v1615_v35  ;;  %v1675_v5 = vsel %vm1674_vm6, %v1663_v22, %v1673_v9 }
 0x3fc   : > { %v1677_v6 = vsel %vm1676_vm7, %v1664_v2, %v1675_v5 }
 0x3fd   : > { %v1618_v53 = vrot.slane %v1617_v14, 2 }
 0x3ff   : > { %v1619_v57 = vadd.f32 %v1618_v53, %v1617_v14 }
 0x401   : > { %v1620_v4 = vrot.slane %v1619_v57, 1 }
 0x403   : > { %v1621_v54 = vadd.f32 %v1620_v4, %v1619_v57 }
 0x405   : > { %v1629_v19 = vpack.c.bf16 %v1621_v54, %v1621_v54 }
 0x407   : > { %v1665_v3 = vunpack.c.l.b16 %v1629_v19 }
 0x409   : > { %v1679_v7 = vsel %vm1678_vm8, %v1665_v3, %v1677_v6 }
 0x40a   : > { %v1680_v18 = vpack.c.b16 %v1679_v7, %v1679_v7 }
 0x40c   : > { %1738 = vmatmul.bf16.vlgmr.msrb.gmra.mxu0 %v1680_v18 }
 0x489   : > { %v1739_v17 = vpop.f32.mrf.mxu0 }
 0x48a   : > { %v1740_v26 = vadd.f32 %v2268_v44, %v1739_v17 }
 0x48c   : > { %v1743_v11 = vmax.f32 %v1740_v26, 0.0 }
 0x48e   : > { %v1744_v21 = vpack.c.bf16 %v1743_v11, %v1743_v11 }
 0x490   : > { %1821 = vmatmul.bf16.vlgmr.msrb.gmra.mxu1 %v1744_v21 }
 0x491   : > { %v1741_v51 = vpop.f32.mrf.mxu0 }
 0x50d   : > { %v1822_v37 = vpop.f32.mrf.mxu1 }
 0x50e   : > { %v1823_v23 = vadd.f32 %v2269_v28, %v1822_v37 }
 0x510   : > { %v1827_v31 = vrot.slane %v1823_v23, 1  ;;  %v1828_v58 = vrot.slane %v1823_v23, 2  ;;  %v1829_v59 = vrot.slane %v1823_v23, 3  ;;  %1842 = vst.msk [vmem:[%s549_s16] sm:$0x1] %vm1841_vm9, %v1823_v23  ;;  %v1830_v1 = vrot.slane %v1823_v23, 4 }
 0x511   : > { %v1831_v38 = vrot.slane %v1823_v23, 5  ;;  %v1832_v20 = vrot.slane %v1823_v23, 6  ;;  %v1833_v61 = vrot.slane %v1823_v23, 7 }
 0x512   : > { %1843 = vst.msk [vmem:[%s549_s16 + $0x1] sm:$0x1] %vm1841_vm9, %v1827_v31 }
 0x513   : > { %1844 = vst.msk [vmem:[%s549_s16 + $0x2] sm:$0x1] %vm1841_vm9, %v1828_v58 }
 0x514   : > { %1845 = vst.msk [vmem:[%s549_s16 + $0x3] sm:$0x1] %vm1841_vm9, %v1829_v59 }
 0x515   : > { %1846 = vst.msk [vmem:[%s549_s16 + $0x4] sm:$0x1] %vm1841_vm9, %v1830_v1  ;;  %v1824_v33 = vpop.f32.mrf.mxu1 }
 0x516   : > { %1847 = vst.msk [vmem:[%s549_s16 + $0x5] sm:$0x1] %vm1841_vm9, %v1831_v38 }
 0x517   : > { %1848 = vst.msk [vmem:[%s549_s16 + $0x6] sm:$0x1] %vm1841_vm9, %v1832_v20 }
 0x518   : > { %1849 = vst.msk [vmem:[%s549_s16 + $0x7] sm:$0x1] %vm1841_vm9, %v1833_v61 }
 0x519 PF: > { %s29_s20 = sadd.s32 1, %s2454_s20  }
 0x51a   : > { %p26_p7 = scmp.ge.s32.totalorder %s29_s20, 4  }
 0x51c   :  { %28 = sbr.rel (!%p26_p7) target bundleno = 5 (0x5), region = 123 }
 0x521   :  { %1870 = vsyncpa [#allocation4], 1 }
 0x522   :  { %1872 = vsyncpa [#allocation4 + $0x1], 1 }
 0x523   :  { %1873 = vsyncpa [#allocation6], 1 }

// kernel: tpu_custom_call.1
= control target key start
LH: loop header
LB: loop body
LE: loop exit
PB: predicated region body
PF: predicated region fallthrough
CT: control target
= control target key end

     0   :  { %s2974_s0 = inlined_call_operand.vmem [shape: bf16[16,16,64], index: 0, kind: input, shape index: {}]   ;;  %s2975_s1 = inlined_call_operand.vmem [shape: bf16[64,128], index: 1, kind: input, shape index: {}]   ;;  %s2976_s2 = inlined_call_operand.vmem [shape: f32[1,128], index: 2, kind: input, shape index: {}]   ;;  %s2977_s3 = inlined_call_operand.hbm [shape: bf16[128,128], index: 3, kind: input, shape index: {}]   ;;  %s2978_s4 = inlined_call_operand.vmem [shape: f32[1,128], index: 4, kind: input, shape index: {}]   ;;  %s2979_s5 = inlined_call_operand.hbm [shape: bf16[128,128], index: 5, kind: input, shape index: {}]   ;;  %s2980_s6 = inlined_call_operand.vmem [shape: f32[1,128], index: 6, kind: input, shape index: {}]   ;;  %s2981_s7 = inlined_call_operand.vmem [shape: bf16[128,64], index: 7, kind: input, shape index: {}]   ;;  %s2982_s8 = inlined_call_operand.vmem [shape: f32[1,64], index: 8, kind: input, shape index: {}]   ;;  %s2983_s9 = inlined_call_operand.vmem [shape: f32[1,64], index: 9, kind: input, shape index: {}]   ;;  %s2984_s10 = inlined_call_operand.<no memory space> [shape: f32[1,1], index: 10, kind: input, shape index: {}]   ;;  %s2985_s11 = inlined_call_operand.hbm [shape: bf16[128,128], index: 11, kind: input, shape index: {}]   ;;  %s2986_s12 = inlined_call_operand.vmem [shape: f32[1,128], index: 12, kind: input, shape index: {}]   ;;  %s2987_s13 = inlined_call_operand.vmem [shape: bf16[128,2], index: 13, kind: input, shape index: {}]   ;;  %s2988_s14 = inlined_call_operand.vmem [shape: f32[1,2], index: 14, kind: input, shape index: {}]   ;;  %s2989_s15 = inlined_call_operand.vmem [shape: f32[16,1,2], index: 15, kind: output, shape index: {}]  }
   0x1   :  { %v20_v0 = vstv %s2984_s10 }
   0x2   :  { %21 = vst [vmem:[#allocation2] sm:$0x1] %v20_v0 }
   0x3   :  { %22 = vsyncpa [#allocation4], 0 }
   0x4   :  { %23 = vsyncpa [#allocation6], 0  ;;  %s2545_s20 = smov 0  }
   0x5 LB: > { %s2990_s21 = sadd.s32 4294967295, %s2454_s20   ;;  %p1933_p0 = scmp.ge.s32.totalorder %s2454_s20, 1  ;;  %s2454_s20 = sphi %s2545_s20, %s29_s20  }
   0x6   : > { %p380_p1 = scmp.lt.s32.totalorder %s2454_s20, 3  ;;  %p2555_p2 = scmp.eq.s32.totalorder %s2990_s21, 0 }
   0x7   : > { %s414_s24 = sshll.u32 %s2979_s5, 4  ;;  %s397_s28 = sshll.u32 %s2977_s3, 4  ;;  %s415_s24 = int_to_ptr.hbm [resolvable:$true] %s414_s24  ;;  %s398_s28 = int_to_ptr.hbm [resolvable:$true] %s397_s28 }
   0x8   : > { %p2562_p3 = pnand %p1933_p0, %p380_p1  ;;  %s2456_s29 = smov [#allocation5]  }
   0x9   : > { %s416_s30 = sshll.u32 %s2456_s29, 4  ;;  %s2457_s16 = smov [#allocation3]   ;;  %s417_s30 = int_to_ptr.vmem [resolvable:$true] %s416_s30 }
   0xa   : > { %p2229_p4 = pneg %p2562_p3  ;;  %s399_s17 = sshll.u32 %s2457_s16, 4  ;;  %s400_s17 = int_to_ptr.vmem [resolvable:$true] %s399_s17 }
   0xb   : > { %s443_s22 = sshll.u32 %s2985_s11, 4  ;;  %s2458_s23 = smov 64   ;;  %s444_s22 = int_to_ptr.hbm [resolvable:$true] %s443_s22 }
   0xc   : > { %p2230_p5 = pnand %p2555_p2, %p2229_p4  ;;  %s2459_s21 = smov 4  }
   0xd   : > { %s2460_s26 = smov [#allocation7]   ;;  %480 = sbr.rel (%p2562_p3) target bundleno = 1305 (0x519), region = 80 }
   0xe   : > { %2235 = dma.hbm_to_vmem [thread:$0]  (!%p2230_p5), %s415_s24, 1024, %s417_s30, [#allocation6], %s2458_s23, %s2458_s23, %s2459_s21  }
   0xf   : > { %2232 = dma.hbm_to_vmem [thread:$0]  (!%p2230_p5), %s398_s28, 1024, %s400_s17, [#allocation4], %s2458_s23, %s2458_s23, %s2459_s21  }
  0x10   : > { %s445_s27 = sshll.u32 %s2460_s26, 4  ;;  %s446_s27 = int_to_ptr.vmem [resolvable:$true] %s445_s27 }
  0x11   : > { %2238 = dma.hbm_to_vmem [thread:$0]  (!%p2230_p5), %s444_s22, 1024, %s446_s27, [#allocation6], %s2458_s23, %s2458_s23, %s2459_s21  }
  0x12   : > { %2445 = dma.done.wait (%p2555_p2), [#allocation4], 1024  }
  0x13   : > { %2447 = vsyncadd (%p2555_p2), [#allocation4], 4294966272 }
  0x14   : > { %2449 = dma.done.wait (%p2555_p2), [#allocation6], 2048  }
  0x15   : > { %2451 = vsyncadd (%p2555_p2), [#allocation6], 4294965248  ;;  %s2993_s24 = sadd.s32 4294967295, %s2454_s20   ;;  %v2176_v1 = vld [vmem:[%s2975_s1 + $0x18] sm:$0xff]  ;;  %v2175_v2 = vld [vmem:[%s2975_s1 + $0x10] sm:$0xff]  ;;  %vm644_vm0 = vcmask 523264  }
  0x16   : > { %s1942_s28 = sshll.u32 %s2993_s24, 3  ;;  %673 = vmatpush.bf16.msra.mxu0 %v2176_v1  ;;  %v2174_v3 = vld [vmem:[%s2975_s1 + $0x8] sm:$0xff]  ;;  %v2173_v4 = vld [vmem:[%s2975_s1] sm:$0xff]  ;;  %v2183_v12 = vld [vmem:[#allocation3 + $0x30] sm:$0xff]  ;;  %vm1245_vm1 = vcmask 7168   ;;  %vm1666_vm2 = vcmask 1041409  }
  0x17   : > { %p540_p6 = scmp.lt.s32.totalorder %s1942_s28, 15  ;;  %v2184_v10 = vld [vmem:[#allocation3 + $0x38] sm:$0xff]  ;;  %v2182_v13 = vld [vmem:[#allocation3 + $0x28] sm:$0xff]  ;;  %v2181_v14 = vld [vmem:[#allocation3 + $0x20] sm:$0xff]  ;;  %vm1668_vm3 = vcmask 1042434   ;;  %vm1670_vm4 = vcmask 1043459  }
  0x18   : > { %810 = vmatpush.bf16.msra.mxu1 %v2184_v10  ;;  %v2180_v15 = vld [vmem:[#allocation3 + $0x18] sm:$0xff]  ;;  %v2179_v17 = vld [vmem:[#allocation3 + $0x10] sm:$0xff]  ;;  %v2178_v18 = vld [vmem:[#allocation3 + $0x8] sm:$0xff]  ;;  %vm1672_vm5 = vcmask 1044484   ;;  %vm1674_vm6 = vcmask 1045509   ;;  %vm1676_vm7 = vcmask 1046534  }
  0x19   : > { %s2995_s28 = smov (!%p540_p6, %s1942_s28), 15  ;;  %v2177_v19 = vld [vmem:[#allocation3] sm:$0xff]  ;;  %v2627_v22 = vld [vmem:[%s2976_s2] ss:$0 sm:$0xff]  ;;  %v2191_v1 = vld [vmem:[#allocation5 + $0x30] sm:$0xff]  ;;  %vm1678_vm8 = vcmask 1047559  }
  0x1a   : > { %674 = vmatpush.bf16.msra.mxu0 %v2175_v2  ;;  %s2164_s17 = sshll.u32 %s2995_s28, 3  ;;  %v2192_v61 = vld [vmem:[#allocation5 + $0x38] sm:$0xff]  ;;  %s549_s16 = scalar_lea.vmem %s2989_s15, %s2995_s28  ;;  %vm1841_vm9 = vcmask 8192  }
  0x1b   : > { %s2606_s26 = scalar_lea.vmem %s2974_s0, %s2164_s17  ;;  %951 = vmatpush.bf16.msra.mxu2 %v2192_v61 }
  0x1c   : > { %v2165_v5 = vld [vmem:[%s2606_s26] sm:$0xff]  ;;  %v2166_v6 = vld [vmem:[%s2606_s26 + $0x8] sm:$0xff]  ;;  %v2167_v7 = vld [vmem:[%s2606_s26 + $0x10] sm:$0xff]  ;;  %811 = vmatpush.bf16.msra.mxu1 %v2183_v12 }
  0x1d   : > { %v2168_v8 = vld [vmem:[%s2606_s26 + $0x18] sm:$0xff]  ;;  %v2169_v9 = vld [vmem:[%s2606_s26 + $0x20] sm:$0xff]  ;;  %v2170_v11 = vld [vmem:[%s2606_s26 + $0x28] sm:$0xff] }
  0x1e   : > { %675 = vmatpush.bf16.msra.mxu0 %v2174_v3  ;;  %v2171_v16 = vld [vmem:[%s2606_s26 + $0x30] sm:$0xff]  ;;  %v2172_v20 = vld [vmem:[%s2606_s26 + $0x38] sm:$0xff] }
  0x1f   : > { %952 = vmatpush.bf16.msra.mxu2 %v2191_v1  ;;  %v2190_v3 = vld [vmem:[#allocation5 + $0x28] sm:$0xff]  ;;  %v2187_v12 = vld [vmem:[#allocation5 + $0x10] sm:$0xff] }
  0x20   : > { %812 = vmatpush.bf16.msra.mxu1 %v2182_v13  ;;  %v2200_v1 = vld [vmem:[%s2981_s7 + $0x38] sm:$0xff] }
  0x21   : > { %1092 = vmatpush.bf16.msra.mxu3 %v2200_v1 }
  0x22   : > { %676 = vmatpush.bf16.msra.mxu0 %v2173_v4  ;;  %v2189_v4 = vld [vmem:[#allocation5 + $0x20] sm:$0xff] }
  0x23   : > { %953 = vmatpush.bf16.msra.mxu2 %v2190_v3  ;;  %v2199_v3 = vld [vmem:[%s2981_s7 + $0x30] sm:$0xff] }
  0x24   : > { %813 = vmatpush.bf16.msra.mxu1 %v2181_v14  ;;  %v2186_v14 = vld [vmem:[#allocation5 + $0x8] sm:$0xff] }
  0x25   : > { %1994 = vmatmul.msk.bf16.vlgmr.msra.gmra.mxu0 %vm644_vm0, %v2165_v5  ;;  %1093 = vmatpush.bf16.msra.mxu3 %v2199_v3 }
  0x27   : > { %954 = vmatpush.bf16.msra.mxu2 %v2189_v4  ;;  %v2198_v4 = vld [vmem:[%s2981_s7 + $0x28] sm:$0xff] }
  0x28   : > { %814 = vmatpush.bf16.msra.mxu1 %v2180_v15  ;;  %v2185_v15 = vld [vmem:[#allocation5] sm:$0xff] }
  0x29   : > { %1094 = vmatpush.bf16.msra.mxu3 %v2198_v4 }
  0x2c   : > { %815 = vmatpush.bf16.msra.mxu1 %v2179_v17 }
  0x30   : > { %816 = vmatpush.bf16.msra.mxu1 %v2178_v18 }
  0x34   : > { %817 = vmatpush.bf16.msra.mxu1 %v2177_v19 }
  0x35   : > { %1995 = vmatmul.msk.bf16.gmra.mxu0 %vm644_vm0, %v2166_v6 }
  0x45   : > { %1996 = vmatmul.msk.bf16.gmra.mxu0 %vm644_vm0, %v2167_v7 }
  0x55   : > { %1997 = vmatmul.msk.bf16.gmra.mxu0 %vm644_vm0, %v2168_v8  ;;  %v2188_v8 = vld [vmem:[#allocation5 + $0x18] sm:$0xff] }
  0x56   : > { %955 = vmatpush.bf16.msra.mxu2 %v2188_v8  ;;  %v2197_v8 = vld [vmem:[%s2981_s7 + $0x20] sm:$0xff] }
  0x57   : > { %1095 = vmatpush.bf16.msra.mxu3 %v2197_v8 }
  0x5a   : > { %956 = vmatpush.bf16.msra.mxu2 %v2187_v12 }
  0x5e   : > { %957 = vmatpush.bf16.msra.mxu2 %v2186_v14  ;;  %v2195_v14 = vld [vmem:[%s2981_s7 + $0x10] sm:$0xff] }
  0x62   : > { %958 = vmatpush.bf16.msra.mxu2 %v2185_v15 }
  0x65   : > { %1998 = vmatmul.msk.bf16.gmra.mxu0 %vm644_vm0, %v2169_v9 }
  0x75   : > { %1999 = vmatmul.msk.bf16.gmra.mxu0 %vm644_vm0, %v2170_v11 }
  0x85   : > { %2000 = vmatmul.msk.bf16.gmra.mxu0 %vm644_vm0, %v2171_v16 }
  0x95   : > { %2001 = vmatmul.msk.bf16.gmra.mxu0 %vm644_vm0, %v2172_v20 }
  0xa2   : > { %v678_v21 = vpop.f32.mrf.mxu0 }
  0xa3   : > { %v679_v23 = vadd.f32 %v2627_v22, %v678_v21 }
  0xa5   : > { %v718_v26 = vmax.f32 %v679_v23, 0.0 }
  0xaa   : > { %v680_v24 = vpop.f32.mrf.mxu0 }
  0xab   : > { %v681_v25 = vadd.f32 %v2627_v22, %v680_v24  ;;  %v2648_v24 = vld [vmem:[%s2978_s4] ss:$0 sm:$0xff] }
  0xad   : > { %v719_v27 = vmax.f32 %v681_v25, 0.0 }
  0xaf   : > { %v734_v28 = vpack.c.bf16 %v719_v27, %v718_v26 }
  0xb1   : > { %818 = vmatmul.bf16.vlgmr.msra.gmra.mxu1 %v734_v28 }
  0xb2   : > { %v683_v29 = vpop.f32.mrf.mxu0 }
  0xb3   : > { %v684_v30 = vadd.f32 %v2627_v22, %v683_v29 }
  0xb5   : > { %v720_v33 = vmax.f32 %v684_v30, 0.0 }
  0xba   : > { %v685_v31 = vpop.f32.mrf.mxu0 }
  0xbb   : > { %v686_v32 = vadd.f32 %v2627_v22, %v685_v31 }
  0xbd   : > { %v721_v34 = vmax.f32 %v686_v32, 0.0 }
  0xbf   : > { %v735_v35 = vpack.c.bf16 %v721_v34, %v720_v33 }
  0xc1   : > { %823 = vmatmul.bf16.gmra.mxu1 %v735_v35 }
  0xc2   : > { %v688_v36 = vpop.f32.mrf.mxu0 }
  0xc3   : > { %v689_v37 = vadd.f32 %v2627_v22, %v688_v36 }
  0xc5   : > { %v722_v40 = vmax.f32 %v689_v37, 0.0 }
  0xca   : > { %v690_v38 = vpop.f32.mrf.mxu0 }
  0xcb   : > { %v691_v39 = vadd.f32 %v2627_v22, %v690_v38 }
  0xcd   : > { %v723_v41 = vmax.f32 %v691_v39, 0.0 }
  0xcf   : > { %v736_v42 = vpack.c.bf16 %v723_v41, %v722_v40 }
  0xd1   : > { %828 = vmatmul.bf16.gmra.mxu1 %v736_v42 }
  0xd2   : > { %v693_v43 = vpop.f32.mrf.mxu0 }
  0xd3   : > { %v694_v44 = vadd.f32 %v2627_v22, %v693_v43 }
  0xd5   : > { %v724_v47 = vmax.f32 %v694_v44, 0.0 }
  0xda   : > { %v695_v45 = vpop.f32.mrf.mxu0 }
  0xdb   : > { %v696_v46 = vadd.f32 %v2627_v22, %v695_v45 }
  0xdd   : > { %v725_v48 = vmax.f32 %v696_v46, 0.0 }
  0xdf   : > { %v737_v49 = vpack.c.bf16 %v725_v48, %v724_v47 }
  0xe1   : > { %833 = vmatmul.bf16.gmra.mxu1 %v737_v49 }
  0xe2   : > { %v698_v50 = vpop.f32.mrf.mxu0 }
  0xe3   : > { %v699_v51 = vadd.f32 %v2627_v22, %v698_v50 }
  0xe5   : > { %v726_v54 = vmax.f32 %v699_v51, 0.0 }
  0xea   : > { %v700_v52 = vpop.f32.mrf.mxu0 }
  0xeb   : > { %v701_v53 = vadd.f32 %v2627_v22, %v700_v52 }
  0xed   : > { %v727_v55 = vmax.f32 %v701_v53, 0.0 }
  0xef   : > { %v738_v56 = vpack.c.bf16 %v727_v55, %v726_v54 }
  0xf1   : > { %838 = vmatmul.bf16.gmra.mxu1 %v738_v56 }
  0xf2   : > { %v703_v57 = vpop.f32.mrf.mxu0 }
  0xf3   : > { %v704_v58 = vadd.f32 %v2627_v22, %v703_v57 }
  0xf5   : > { %v728_v62 = vmax.f32 %v704_v58, 0.0 }
  0xfa   : > { %v705_v59 = vpop.f32.mrf.mxu0 }
  0xfb   : > { %v706_v60 = vadd.f32 %v2627_v22, %v705_v59 }
  0xfd   : > { %v729_v63 = vmax.f32 %v706_v60, 0.0 }
  0xff   : > { %v739_v0 = vpack.c.bf16 %v729_v63, %v728_v62 }
 0x101   : > { %843 = vmatmul.bf16.gmra.mxu1 %v739_v0 }
 0x102   : > { %v708_v2 = vpop.f32.mrf.mxu0 }
 0x103   : > { %v709_v5 = vadd.f32 %v2627_v22, %v708_v2 }
 0x105   : > { %v730_v9 = vmax.f32 %v709_v5, 0.0 }
 0x10a   : > { %v710_v6 = vpop.f32.mrf.mxu0 }
 0x10b   : > { %v711_v7 = vadd.f32 %v2627_v22, %v710_v6 }
 0x10d   : > { %v731_v10 = vmax.f32 %v711_v7, 0.0 }
 0x10f   : > { %v740_v11 = vpack.c.bf16 %v731_v10, %v730_v9 }
 0x111   : > { %848 = vmatmul.bf16.gmra.mxu1 %v740_v11 }
 0x112   : > { %v713_v13 = vpop.f32.mrf.mxu0 }
 0x113   : > { %v714_v16 = vadd.f32 %v2627_v22, %v713_v13  ;;  %v2196_v13 = vld [vmem:[%s2981_s7 + $0x18] sm:$0xff] }
 0x114   : > { %1096 = vmatpush.bf16.msra.mxu3 %v2196_v13 }
 0x115   : > { %v732_v19 = vmax.f32 %v714_v16, 0.0 }
 0x118   : > { %1097 = vmatpush.bf16.msra.mxu3 %v2195_v14 }
 0x11a   : > { %v715_v17 = vpop.f32.mrf.mxu0 }
 0x11b   : > { %v716_v18 = vadd.f32 %v2627_v22, %v715_v17  ;;  %v2194_v17 = vld [vmem:[%s2981_s7 + $0x8] sm:$0xff] }
 0x11c   : > { %1098 = vmatpush.bf16.msra.mxu3 %v2194_v17 }
 0x11d   : > { %v733_v20 = vmax.f32 %v716_v18, 0.0 }
 0x11f   : > { %v741_v21 = vpack.c.bf16 %v733_v20, %v732_v19 }
 0x121   : > { %853 = vmatmul.bf16.gmra.mxu1 %v741_v21  ;;  %v2193_v21 = vld [vmem:[%s2981_s7] sm:$0xff] }
 0x122   : > { %1099 = vmatpush.bf16.msra.mxu3 %v2193_v21 }
 0x12e   : > { %v819_v23 = vpop.f32.mrf.mxu1 }
 0x12f   : > { %v820_v25 = vadd.f32 %v2648_v24, %v819_v23 }
 0x131   : > { %v859_v28 = vmax.f32 %v820_v25, 0.0 }
 0x136   : > { %v821_v26 = vpop.f32.mrf.mxu1 }
 0x137   : > { %v822_v27 = vadd.f32 %v2648_v24, %v821_v26  ;;  %v2264_v26 = vld [vmem:[%s2980_s6] ss:$0 sm:$0xff] }
 0x139   : > { %v860_v29 = vmax.f32 %v822_v27, 0.0 }
 0x13b   : > { %v875_v30 = vpack.c.bf16 %v860_v29, %v859_v28 }
 0x13d   : > { %959 = vmatmul.bf16.vlgmr.msra.gmra.mxu2 %v875_v30 }
 0x13e   : > { %v824_v22 = vpop.f32.mrf.mxu1 }
 0x13f   : > { %v825_v31 = vadd.f32 %v2648_v24, %v824_v22 }
 0x141   : > { %v861_v34 = vmax.f32 %v825_v31, 0.0 }
 0x146   : > { %v826_v32 = vpop.f32.mrf.mxu1 }
 0x147   : > { %v827_v33 = vadd.f32 %v2648_v24, %v826_v32 }
 0x149   : > { %v862_v35 = vmax.f32 %v827_v33, 0.0 }
 0x14b   : > { %v876_v36 = vpack.c.bf16 %v862_v35, %v861_v34 }
 0x14d   : > { %964 = vmatmul.bf16.gmra.mxu2 %v876_v36 }
 0x14e   : > { %v829_v37 = vpop.f32.mrf.mxu1 }
 0x14f   : > { %v830_v38 = vadd.f32 %v2648_v24, %v829_v37 }
 0x151   : > { %v863_v41 = vmax.f32 %v830_v38, 0.0 }
 0x156   : > { %v831_v39 = vpop.f32.mrf.mxu1 }
 0x157   : > { %v832_v40 = vadd.f32 %v2648_v24, %v831_v39 }
 0x159   : > { %v864_v42 = vmax.f32 %v832_v40, 0.0 }
 0x15b   : > { %v877_v43 = vpack.c.bf16 %v864_v42, %v863_v41 }
 0x15d   : > { %969 = vmatmul.bf16.gmra.mxu2 %v877_v43 }
 0x15e   : > { %v834_v44 = vpop.f32.mrf.mxu1 }
 0x15f   : > { %v835_v45 = vadd.f32 %v2648_v24, %v834_v44 }
 0x161   : > { %v865_v48 = vmax.f32 %v835_v45, 0.0 }
 0x166   : > { %v836_v46 = vpop.f32.mrf.mxu1 }
 0x167   : > { %v837_v47 = vadd.f32 %v2648_v24, %v836_v46 }
 0x169   : > { %v866_v49 = vmax.f32 %v837_v47, 0.0 }
 0x16b   : > { %v878_v50 = vpack.c.bf16 %v866_v49, %v865_v48 }
 0x16d   : > { %974 = vmatmul.bf16.gmra.mxu2 %v878_v50 }
 0x16e   : > { %v839_v51 = vpop.f32.mrf.mxu1 }
 0x16f   : > { %v840_v52 = vadd.f32 %v2648_v24, %v839_v51 }
 0x171   : > { %v867_v55 = vmax.f32 %v840_v52, 0.0 }
 0x176   : > { %v841_v53 = vpop.f32.mrf.mxu1 }
 0x177   : > { %v842_v54 = vadd.f32 %v2648_v24, %v841_v53 }
 0x179   : > { %v868_v56 = vmax.f32 %v842_v54, 0.0 }
 0x17b   : > { %v879_v57 = vpack.c.bf16 %v868_v56, %v867_v55 }
 0x17d   : > { %979 = vmatmul.bf16.gmra.mxu2 %v879_v57 }
 0x17e   : > { %v844_v58 = vpop.f32.mrf.mxu1 }
 0x17f   : > { %v845_v59 = vadd.f32 %v2648_v24, %v844_v58 }
 0x181   : > { %v869_v62 = vmax.f32 %v845_v59, 0.0 }
 0x186   : > { %v846_v60 = vpop.f32.mrf.mxu1 }
 0x187   : > { %v847_v61 = vadd.f32 %v2648_v24, %v846_v60 }
 0x189   : > { %v870_v63 = vmax.f32 %v847_v61, 0.0 }
 0x18b   : > { %v880_v0 = vpack.c.bf16 %v870_v63, %v869_v62 }
 0x18d   : > { %984 = vmatmul.bf16.gmra.mxu2 %v880_v0 }
 0x18e   : > { %v849_v2 = vpop.f32.mrf.mxu1 }
 0x18f   : > { %v850_v5 = vadd.f32 %v2648_v24, %v849_v2 }
 0x191   : > { %v871_v9 = vmax.f32 %v850_v5, 0.0 }
 0x196   : > { %v851_v6 = vpop.f32.mrf.mxu1 }
 0x197   : > { %v852_v7 = vadd.f32 %v2648_v24, %v851_v6 }
 0x199   : > { %v872_v10 = vmax.f32 %v852_v7, 0.0 }
 0x19b   : > { %v881_v11 = vpack.c.bf16 %v872_v10, %v871_v9 }
 0x19d   : > { %989 = vmatmul.bf16.gmra.mxu2 %v881_v11 }
 0x19e   : > { %v854_v12 = vpop.f32.mrf.mxu1 }
 0x19f   : > { %v855_v15 = vadd.f32 %v2648_v24, %v854_v12 }
 0x1a1   : > { %v873_v19 = vmax.f32 %v855_v15, 0.0 }
 0x1a6   : > { %v856_v16 = vpop.f32.mrf.mxu1 }
 0x1a7   : > { %v857_v18 = vadd.f32 %v2648_v24, %v856_v16  ;;  %v2776_v16 = vld [vmem:[%s2982_s8] ss:$0 sm:$0xff] }
 0x1a9   : > { %v874_v20 = vmax.f32 %v857_v18, 0.0 }
 0x1ab   : > { %v882_v23 = vpack.c.bf16 %v874_v20, %v873_v19  ;;  %v2782_v19 = vld [vmem:[%s2983_s9] ss:$0 sm:$0xff] }
 0x1ad   : > { %994 = vmatmul.bf16.gmra.mxu2 %v882_v23 }
 0x1c0   : > { %v960_v25 = vpop.f32.mrf.mxu2 }
 0x1c1   : > { %v2693_v27 = vadd.f32 %v2264_v26, %v960_v25 }
 0x1c3   : > { %v1000_v24 = vmax.f32 %v2693_v27, 0.0 }
 0x1c8   : > { %v962_v28 = vpop.f32.mrf.mxu2 }
 0x1c9   : > { %v2695_v29 = vadd.f32 %v2264_v26, %v962_v28 }
 0x1cb   : > { %v1001_v30 = vmax.f32 %v2695_v29, 0.0 }
 0x1cd   : > { %v1016_v22 = vpack.c.bf16 %v1001_v30, %v1000_v24 }
 0x1cf   : > { %1100 = vmatmul.bf16.vlgmr.msra.gmra.mxu3 %v1016_v22 }
 0x1d0   : > { %v965_v31 = vpop.f32.mrf.mxu2 }
 0x1d1   : > { %v2703_v32 = vadd.f32 %v2264_v26, %v965_v31 }
 0x1d3   : > { %v1002_v35 = vmax.f32 %v2703_v32, 0.0 }
 0x1d8   : > { %v967_v33 = vpop.f32.mrf.mxu2 }
 0x1d9   : > { %v2705_v34 = vadd.f32 %v2264_v26, %v967_v33 }
 0x1db   : > { %v1003_v36 = vmax.f32 %v2705_v34, 0.0 }
 0x1dd   : > { %v1017_v37 = vpack.c.bf16 %v1003_v36, %v1002_v35 }
 0x1df   : > { %1105 = vmatmul.bf16.gmra.mxu3 %v1017_v37 }
 0x1e0   : > { %v970_v38 = vpop.f32.mrf.mxu2 }
 0x1e1   : > { %v2713_v39 = vadd.f32 %v2264_v26, %v970_v38 }
 0x1e3   : > { %v1004_v42 = vmax.f32 %v2713_v39, 0.0 }
 0x1e8   : > { %v972_v40 = vpop.f32.mrf.mxu2 }
 0x1e9   : > { %v2715_v41 = vadd.f32 %v2264_v26, %v972_v40 }
 0x1eb   : > { %v1005_v43 = vmax.f32 %v2715_v41, 0.0 }
 0x1ed   : > { %v1018_v44 = vpack.c.bf16 %v1005_v43, %v1004_v42 }
 0x1ef   : > { %1110 = vmatmul.bf16.gmra.mxu3 %v1018_v44 }
 0x1f0   : > { %v975_v45 = vpop.f32.mrf.mxu2 }
 0x1f1   : > { %v2723_v46 = vadd.f32 %v2264_v26, %v975_v45 }
 0x1f3   : > { %v1006_v49 = vmax.f32 %v2723_v46, 0.0 }
 0x1f8   : > { %v977_v47 = vpop.f32.mrf.mxu2 }
 0x1f9   : > { %v2725_v48 = vadd.f32 %v2264_v26, %v977_v47 }
 0x1fb   : > { %v1007_v50 = vmax.f32 %v2725_v48, 0.0 }
 0x1fd   : > { %v1019_v51 = vpack.c.bf16 %v1007_v50, %v1006_v49 }
 0x1ff   : > { %1115 = vmatmul.bf16.gmra.mxu3 %v1019_v51 }
 0x200   : > { %v980_v52 = vpop.f32.mrf.mxu2 }
 0x201   : > { %v2733_v53 = vadd.f32 %v2264_v26, %v980_v52 }
 0x203   : > { %v1008_v56 = vmax.f32 %v2733_v53, 0.0 }
 0x208   : > { %v982_v54 = vpop.f32.mrf.mxu2 }
 0x209   : > { %v2735_v55 = vadd.f32 %v2264_v26, %v982_v54 }
 0x20b   : > { %v1009_v57 = vmax.f32 %v2735_v55, 0.0 }
 0x20d   : > { %v1020_v58 = vpack.c.bf16 %v1009_v57, %v1008_v56 }
 0x20f   : > { %1120 = vmatmul.bf16.gmra.mxu3 %v1020_v58 }
 0x210   : > { %v985_v59 = vpop.f32.mrf.mxu2 }
 0x211   : > { %v2743_v60 = vadd.f32 %v2264_v26, %v985_v59 }
 0x213   : > { %v1010_v63 = vmax.f32 %v2743_v60, 0.0 }
 0x218   : > { %v987_v61 = vpop.f32.mrf.mxu2 }
 0x219   : > { %v2745_v62 = vadd.f32 %v2264_v26, %v987_v61 }
 0x21b   : > { %v1011_v0 = vmax.f32 %v2745_v62, 0.0  ;;  %v2201_v62 = vld [vmem:[#allocation7] sm:$0xff] }
 0x21d   : > { %v1021_v1 = vpack.c.bf16 %v1011_v0, %v1010_v63 }
 0x21f   : > { %1125 = vmatmul.bf16.gmra.mxu3 %v1021_v1 }
 0x220   : > { %v990_v2 = vpop.f32.mrf.mxu2 }
 0x221   : > { %v2753_v3 = vadd.f32 %v2264_v26, %v990_v2 }
 0x223   : > { %v1012_v6 = vmax.f32 %v2753_v3, 0.0  ;;  %v2216_v3 = vld [vmem:[%s2987_s13 + $0x38] sm:$0xff] }
 0x224   : > { %1813 = vmatpush.bf16.msrb.mxu1 %v2216_v3 }
 0x228   : > { %v992_v4 = vpop.f32.mrf.mxu2 }
 0x229   : > { %v2755_v5 = vadd.f32 %v2264_v26, %v992_v4 }
 0x22b   : > { %v1013_v7 = vmax.f32 %v2755_v5, 0.0 }
 0x22d   : > { %v1022_v8 = vpack.c.bf16 %v1013_v7, %v1012_v6 }
 0x22f   : > { %1130 = vmatmul.bf16.gmra.mxu3 %v1022_v8 }
 0x230   : > { %v995_v9 = vpop.f32.mrf.mxu2 }
 0x231   : > { %v2763_v10 = vadd.f32 %v2264_v26, %v995_v9 }
 0x233   : > { %v1014_v13 = vmax.f32 %v2763_v10, 0.0  ;;  %v2212_v10 = vld [vmem:[%s2987_s13 + $0x18] sm:$0xff] }
 0x238   : > { %v997_v11 = vpop.f32.mrf.mxu2 }
 0x239   : > { %v2765_v12 = vadd.f32 %v2264_v26, %v997_v11 }
 0x23b   : > { %v1015_v14 = vmax.f32 %v2765_v12, 0.0 }
 0x23d   : > { %v1023_v15 = vpack.c.bf16 %v1015_v14, %v1014_v13 }
 0x23f   : > { %1135 = vmatmul.bf16.gmra.mxu3 %v1023_v15 }
 0x252   : > { %v1101_v17 = vpop.f32.mrf.mxu3 }
 0x253   : > { %v1102_v18 = vadd.f32 %v2776_v16, %v1101_v17 }
 0x255   : > { %2270 = vtanh.f32 %v1102_v18 }
 0x25a   : > { %v1103_v20 = vpop.f32.mrf.mxu3 }
 0x25b   : > { %v2271_v21 = vpop.eup %2270  ;;  %v1104_v23 = vadd.f32 %v2776_v16, %v1103_v20 }
 0x25c   : > { %v1161_v25 = vmul.f32 %v2271_v21, %v2782_v19 }
 0x25d   : > { %2272 = vtanh.f32 %v1104_v23 }
 0x25e   : > { %v1177_v26 = vsel %vm644_vm0, %v1161_v25, 0.0 }
 0x25f   : > { %1178 = vadd.xlane.f32.xlu0 %v1177_v26 }
 0x262   : > { %v1106_v28 = vpop.f32.mrf.mxu3 }
 0x263   : > { %v2273_v22 = vpop.eup %2272  ;;  %v1107_v31 = vadd.f32 %v2776_v16, %v1106_v28 }
 0x264   : > { %v1162_v33 = vmul.f32 %v2273_v22, %v2782_v19 }
 0x265   : > { %2274 = vtanh.f32 %v1107_v31 }
 0x266   : > { %v1180_v37 = vsel %vm644_vm0, %v1162_v33, 0.0 }
 0x267   : > { %1181 = vadd.xlane.f32.xlu0 %v1180_v37 }
 0x26a   : > { %v1108_v38 = vpop.f32.mrf.mxu3 }
 0x26b   : > { %v2275_v40 = vpop.eup %2274  ;;  %v1109_v44 = vadd.f32 %v2776_v16, %v1108_v38 }
 0x26c   : > { %v1163_v45 = vmul.f32 %v2275_v40, %v2782_v19 }
 0x26d   : > { %2276 = vtanh.f32 %v1109_v44 }
 0x26e   : > { %v1183_v47 = vsel %vm644_vm0, %v1163_v45, 0.0 }
 0x26f   : > { %1184 = vadd.xlane.f32.xlu1 %v1183_v47 }
 0x272   : > { %v1111_v51 = vpop.f32.mrf.mxu3 }
 0x273   : > { %v2277_v52 = vpop.eup %2276  ;;  %v1112_v54 = vadd.f32 %v2776_v16, %v1111_v51 }
 0x274   : > { %v1164_v58 = vmul.f32 %v2277_v52, %v2782_v19 }
 0x275   : > { %2278 = vtanh.f32 %v1112_v54 }
 0x276   : > { %v1186_v59 = vsel %vm644_vm0, %v1164_v58, 0.0 }
 0x277   : > { %1187 = vadd.xlane.f32.xlu1 %v1186_v59 }
 0x27a   : > { %v1113_v61 = vpop.f32.mrf.mxu3 }
 0x27b   : > { %v2279_v1 = vpop.eup %2278  ;;  %v1114_v2 = vadd.f32 %v2776_v16, %v1113_v61 }
 0x27c   : > { %v1165_v4 = vmul.f32 %v2279_v1, %v2782_v19 }
 0x27d   : > { %2280 = vtanh.f32 %v1114_v2 }
 0x27e   : > { %v1189_v8 = vsel %vm644_vm0, %v1165_v4, 0.0 }
 0x27f   : > { %1190 = vadd.xlane.f32.xlu2 %v1189_v8 }
 0x282   : > { %v1116_v9 = vpop.f32.mrf.mxu3 }
 0x283   : > { %v2281_v11 = vpop.eup %2280  ;;  %v1117_v15 = vadd.f32 %v2776_v16, %v1116_v9 }
 0x284   : > { %v1166_v17 = vmul.f32 %v2281_v11, %v2782_v19 }
 0x285   : > { %2282 = vtanh.f32 %v1117_v15 }
 0x286   : > { %v1192_v18 = vsel %vm644_vm0, %v1166_v17, 0.0 }
 0x287   : > { %1193 = vadd.xlane.f32.xlu2 %v1192_v18 }
 0x28a   : > { %v1118_v20 = vpop.f32.mrf.mxu3 }
 0x28b   : > { %v2283_v21 = vpop.eup %2282  ;;  %v1119_v23 = vadd.f32 %v2776_v16, %v1118_v20 }
 0x28c   : > { %v1167_v25 = vmul.f32 %v2283_v21, %v2782_v19 }
 0x28d   : > { %2284 = vtanh.f32 %v1119_v23 }
 0x28e   : > { %v1195_v26 = vsel %vm644_vm0, %v1167_v25, 0.0 }
 0x28f   : > { %1196 = vadd.xlane.f32.xlu0 %v1195_v26 }
 0x292   : > { %v1121_v28 = vpop.f32.mrf.mxu3 }
 0x293   : > { %v2285_v22 = vpop.eup %2284  ;;  %v1122_v31 = vadd.f32 %v2776_v16, %v1121_v28 }
 0x294   : > { %v1168_v33 = vmul.f32 %v2285_v22, %v2782_v19 }
 0x295   : > { %2286 = vtanh.f32 %v1122_v31 }
 0x296   : > { %v1198_v37 = vsel %vm644_vm0, %v1168_v33, 0.0 }
 0x297   : > { %1199 = vadd.xlane.f32.xlu1 %v1198_v37 }
 0x29a   : > { %v1123_v38 = vpop.f32.mrf.mxu3 }
 0x29b   : > { %v2287_v40 = vpop.eup %2286  ;;  %v1124_v44 = vadd.f32 %v2776_v16, %v1123_v38 }
 0x29c   : > { %v1169_v45 = vmul.f32 %v2287_v40, %v2782_v19 }
 0x29d   : > { %2288 = vtanh.f32 %v1124_v44 }
 0x29e   : > { %v1201_v47 = vsel %vm644_vm0, %v1169_v45, 0.0 }
 0x29f   : > { %1202 = vadd.xlane.f32.xlu2 %v1201_v47 }
 0x2a2   : > { %v1126_v51 = vpop.f32.mrf.mxu3 }
 0x2a3   : > { %v2289_v52 = vpop.eup %2288  ;;  %v1127_v54 = vadd.f32 %v2776_v16, %v1126_v51 }
 0x2a4   : > { %v1170_v58 = vmul.f32 %v2289_v52, %v2782_v19 }
 0x2a5   : > { %2290 = vtanh.f32 %v1127_v54 }
 0x2a6   : > { %v1204_v59 = vsel %vm644_vm0, %v1170_v58, 0.0  ;;  %v2830_v58 = vld [vmem:[#allocation2] ss:$0 sm:$0xff] }
 0x2a7   : > { %1205 = vadd.xlane.f32.xlu0 %v1204_v59 }
 0x2aa   : > { %v1128_v61 = vpop.f32.mrf.mxu3 }
 0x2ab   : > { %v2291_v1 = vpop.eup %2290  ;;  %v1129_v2 = vadd.f32 %v2776_v16, %v1128_v61 }
 0x2ac   : > { %v1171_v4 = vmul.f32 %v2291_v1, %v2782_v19 }
 0x2ad   : > { %2292 = vtanh.f32 %v1129_v2 }
 0x2ae   : > { %v1207_v8 = vsel %vm644_vm0, %v1171_v4, 0.0 }
 0x2af   : > { %1208 = vadd.xlane.f32.xlu1 %v1207_v8 }
 0x2b2   : > { %v1131_v9 = vpop.f32.mrf.mxu3 }
 0x2b3   : > { %v2293_v11 = vpop.eup %2292  ;;  %v1132_v15 = vadd.f32 %v2776_v16, %v1131_v9 }
 0x2b4   : > { %v1172_v17 = vmul.f32 %v2293_v11, %v2782_v19 }
 0x2b5   : > { %2294 = vtanh.f32 %v1132_v15 }
 0x2b6   : > { %v1210_v18 = vsel %vm644_vm0, %v1172_v17, 0.0 }
 0x2b7   : > { %1211 = vadd.xlane.f32.xlu2 %v1210_v18 }
 0x2ba   : > { %v1133_v20 = vpop.f32.mrf.mxu3 }
 0x2bb   : > { %v2295_v21 = vpop.eup %2294  ;;  %v1134_v23 = vadd.f32 %v2776_v16, %v1133_v20 }
 0x2bc   : > { %v1173_v25 = vmul.f32 %v2295_v21, %v2782_v19 }
 0x2bd   : > { %2296 = vtanh.f32 %v1134_v23 }
 0x2be   : > { %v1213_v26 = vsel %vm644_vm0, %v1173_v25, 0.0 }
 0x2bf   : > { %1214 = vadd.xlane.f32.xlu0 %v1213_v26 }
 0x2c2   : > { %v1136_v28 = vpop.f32.mrf.mxu3 }
 0x2c3   : > { %v2297_v22 = vpop.eup %2296  ;;  %v1137_v31 = vadd.f32 %v2776_v16, %v1136_v28 }
 0x2c4   : > { %v1174_v33 = vmul.f32 %v2297_v22, %v2782_v19 }
 0x2c5   : > { %2298 = vtanh.f32 %v1137_v31 }
 0x2c6   : > { %v1216_v37 = vsel %vm644_vm0, %v1174_v33, 0.0 }
 0x2c7   : > { %1217 = vadd.xlane.f32.xlu1 %v1216_v37 }
 0x2ca   : > { %v1138_v38 = vpop.f32.mrf.mxu3 }
 0x2cb   : > { %v2299_v40 = vpop.eup %2298  ;;  %v1139_v44 = vadd.f32 %v2776_v16, %v1138_v38 }
 0x2cc   : > { %v1175_v45 = vmul.f32 %v2299_v40, %v2782_v19 }
 0x2cd   : > { %2300 = vtanh.f32 %v1139_v44  ;;  %v2461_v44 = vmov 0  }
 0x2ce   : > { %v1219_v47 = vsel %vm644_vm0, %v1175_v45, 0.0  ;;  %2260 = vset.pattern.permute.xlu2 %v2461_v44  ;;  %2259 = vset.pattern.permute.xlu1 %v2461_v44 }
 0x2cf   : > { %1220 = vadd.xlane.f32.xlu2 %v1219_v47  ;;  %2261 = vset.pattern.permute.xlu0 %v2461_v44 }
 0x2d2   : > { %v1179_v51 = vpop.xlane.xlu0 %1178 }
 0x2d3   : > { %v2301_v52 = vpop.eup %2300  ;;  %v1229_v61 = vadd.f32 %v2830_v58, %v1179_v51 }
 0x2d4   : > { %v1176_v54 = vmul.f32 %v2301_v52, %v2782_v19 }
 0x2d5   : > { %v1246_v2 = vsel %vm1245_vm1, %v1229_v61, -inf }
 0x2d6   : > { %v1222_v59 = vsel %vm644_vm0, %v1176_v54, 0.0 }
 0x2d7   : > { %1223 = vadd.xlane.f32.xlu0 %v1222_v59 }
 0x2da   : > { %v1182_v1 = vpop.xlane.xlu0 %1181 }
 0x2db   : > { %v1230_v16 = vadd.f32 %v2830_v58, %v1182_v1 }
 0x2dd   : > { %v1247_v4 = vsel %vm1245_vm1, %v1230_v16, -inf }
 0x2de   : > { %v1248_v8 = vmax.f32 %v1246_v2, %v1247_v4 }
 0x2e0   : > { %v1249_v9 = vrot.slane %v1248_v8, 4 }
 0x2e2   : > { %v1250_v11 = vmax.f32 %v1248_v8, %v1249_v9  ;;  %v1185_v15 = vpop.xlane.xlu1 %1184 }
 0x2e3   : > { %v1231_v20 = vadd.f32 %v2830_v58, %v1185_v15 }
 0x2e4   : > { %v1251_v19 = vrot.slane %v1250_v11, 2 }
 0x2e5   : > { %v1255_v22 = vsel %vm1245_vm1, %v1231_v20, -inf }
 0x2e6   : > { %v1252_v17 = vmax.f32 %v1250_v11, %v1251_v19 }
 0x2e8   : > { %v1253_v18 = vrot.slane %v1252_v17, 1 }
 0x2ea   : > { %v1254_v21 = vmax.f32 %v1252_v17, %v1253_v18  ;;  %v1188_v23 = vpop.xlane.xlu1 %1187 }
 0x2eb   : > { %v1232_v25 = vadd.f32 %v2830_v58, %v1188_v23 }
 0x2ec   : > { %v1318_v26 = vsub.f32 %v1229_v61, %v1254_v21  ;;  %v1319_v28 = vsub.f32 %v1230_v16, %v1254_v21 }
 0x2ed   : > { %v1256_v31 = vsel %vm1245_vm1, %v1232_v25, -inf }
 0x2ee   : > { %v1334_v33 = vmul.f32 1.442695, %v1318_v26  ;;  %v1336_v37 = vmul.f32 1.442695, %v1319_v28  ;;  %v1257_v38 = vmax.f32 %v1255_v22, %v1256_v31 }
 0x2f0   : > { %2302 = vpow2.f32 %v1334_v33  ;;  %v1258_v40 = vrot.slane %v1257_v38, 4 }
 0x2f1   : > { %2304 = vpow2.f32 %v1336_v37 }
 0x2f2   : > { %v1259_v45 = vmax.f32 %v1257_v38, %v1258_v40  ;;  %v1191_v47 = vpop.xlane.xlu2 %1190 }
 0x2f3   : > { %v1233_v4 = vadd.f32 %v2830_v58, %v1191_v47 }
 0x2f4   : > { %v1260_v51 = vrot.slane %v1259_v45, 2 }
 0x2f5   : > { %v1264_v18 = vsel %vm1245_vm1, %v1233_v4, -inf }
 0x2f6   : > { %v2303_v52 = vpop.eup %2302  ;;  %v1261_v54 = vmax.f32 %v1259_v45, %v1260_v51 }
 0x2f7   : > { %v2305_v59 = vpop.eup %2304  ;;  %v1366_v61 = vsel %vm1245_vm1, %v2303_v52, 0.0 }
 0x2f8   : > { %v1367_v1 = vsel %vm1245_vm1, %v2305_v59, 0.0  ;;  %v1262_v16 = vrot.slane %v1261_v54, 1 }
 0x2f9   : > { %v1368_v2 = vadd.f32 %v1367_v1, %v1366_v61 }
 0x2fa   : > { %v1263_v8 = vmax.f32 %v1261_v54, %v1262_v16  ;;  %v1194_v9 = vpop.xlane.xlu2 %1193 }
 0x2fb   : > { %v1369_v11 = vrot.slane %v1368_v2, 4  ;;  %v1234_v15 = vadd.f32 %v2830_v58, %v1194_v9 }
 0x2fc   : > { %v1320_v19 = vsub.f32 %v1231_v20, %v1263_v8  ;;  %v1321_v17 = vsub.f32 %v1232_v25, %v1263_v8 }
 0x2fd   : > { %v1265_v21 = vsel %vm1245_vm1, %v1234_v15, -inf  ;;  %v1370_v23 = vadd.f32 %v1369_v11, %v1368_v2 }
 0x2fe   : > { %v1338_v26 = vmul.f32 1.442695, %v1320_v19  ;;  %v1340_v28 = vmul.f32 1.442695, %v1321_v17  ;;  %v1266_v22 = vmax.f32 %v1264_v18, %v1265_v21 }
 0x2ff   : > { %v1371_v31 = vrot.slane %v1370_v23, 2 }
 0x300   : > { %2306 = vpow2.f32 %v1338_v26  ;;  %v1267_v33 = vrot.slane %v1266_v22, 4 }
 0x301   : > { %2308 = vpow2.f32 %v1340_v28  ;;  %v1372_v37 = vadd.f32 %v1371_v31, %v1370_v23 }
 0x302   : > { %v1268_v38 = vmax.f32 %v1266_v22, %v1267_v33  ;;  %v1197_v25 = vpop.xlane.xlu0 %1196 }
 0x303   : > { %v1373_v40 = vrot.slane %v1372_v37, 1  ;;  %v1235_v2 = vadd.f32 %v2830_v58, %v1197_v25 }
 0x304   : > { %v1269_v44 = vrot.slane %v1268_v38, 2 }
 0x305   : > { %v1374_v45 = vadd.f32 %v1373_v40, %v1372_v37  ;;  %v1273_v23 = vsel %vm1245_vm1, %v1235_v2, -inf }
 0x306   : > { %v2847_v47 = vpop.eup %2306  ;;  %v1270_v20 = vmax.f32 %v1268_v38, %v1269_v44 }
 0x307   : > { %v2309_v51 = vpop.eup %2308  ;;  %v1375_v54 = vsel %vm1245_vm1, %v2847_v47, 0.0  ;;  %2310 = vrcp.f32 %v1374_v45 }
 0x308   : > { %v1376_v61 = vsel %vm1245_vm1, %v2309_v51, 0.0  ;;  %v1271_v1 = vrot.slane %v1270_v20, 1 }
 0x309   : > { %v1377_v16 = vadd.f32 %v1376_v61, %v1375_v54 }
 0x30a   : > { %v1272_v8 = vmax.f32 %v1270_v20, %v1271_v1  ;;  %v1200_v9 = vpop.xlane.xlu1 %1199 }
 0x30b   : > { %v1378_v11 = vrot.slane %v1377_v16, 4  ;;  %v1236_v19 = vadd.f32 %v2830_v58, %v1200_v9 }
 0x30c   : > { %v1322_v17 = vsub.f32 %v1233_v4, %v1272_v8  ;;  %v1323_v18 = vsub.f32 %v1234_v15, %v1272_v8 }
 0x30d   : > { %v2311_v21 = vpop.eup %2310  ;;  %v1274_v26 = vsel %vm1245_vm1, %v1236_v19, -inf  ;;  %v1379_v28 = vadd.f32 %v1378_v11, %v1377_v16 }
 0x30e   : > { %v1342_v22 = vmul.f32 1.442695, %v1322_v17  ;;  %v1344_v31 = vmul.f32 1.442695, %v1323_v18  ;;  %v1275_v33 = vmax.f32 %v1273_v23, %v1274_v26  ;;  %v1446_v37 = vmul.f32 0.25, %v2311_v21 }
 0x30f   : > { %v1380_v38 = vrot.slane %v1379_v28, 2 }
 0x310   : > { %2312 = vpow2.f32 %v1342_v22  ;;  %v1276_v40 = vrot.slane %v1275_v33, 4  ;;  %v1455_v44 = vmul.f32 %v2305_v59, %v1446_v37  ;;  %v1454_v45 = vmul.f32 %v2303_v52, %v1446_v37 }
 0x311   : > { %2314 = vpow2.f32 %v1344_v31  ;;  %v1381_v20 = vadd.f32 %v1380_v38, %v1379_v28 }
 0x312   : > { %v1277_v25 = vmax.f32 %v1275_v33, %v1276_v40  ;;  %1477 = vperm.xlu2 %2260, %v1455_v44   ;;  %1472 = vperm.xlu1 %2259, %v1454_v45   ;;  %v1203_v16 = vpop.xlane.xlu2 %1202 }
 0x313   : > { %v1382_v4 = vrot.slane %v1381_v20, 1  ;;  %v1237_v17 = vadd.f32 %v2830_v58, %v1203_v16 }
 0x314   : > { %v1278_v15 = vrot.slane %v1277_v25, 2 }
 0x315   : > { %v1383_v54 = vadd.f32 %v1382_v4, %v1381_v20  ;;  %v1282_v33 = vsel %vm1245_vm1, %v1237_v17, -inf }
 0x316   : > { %v2856_v61 = vpop.eup %2312  ;;  %v1279_v1 = vmax.f32 %v1277_v25, %v1278_v15 }
 0x317   : > { %v2315_v8 = vpop.eup %2314  ;;  %v1384_v9 = vsel %vm1245_vm1, %v2856_v61, 0.0  ;;  %2316 = vrcp.f32 %v1383_v54 }
 0x318   : > { %v1385_v59 = vsel %vm1245_vm1, %v2315_v8, 0.0  ;;  %v1280_v52 = vrot.slane %v1279_v1, 1 }
 0x319   : > { %v1386_v11 = vadd.f32 %v1385_v59, %v1384_v9 }
 0x31a   : > { %v1281_v18 = vmax.f32 %v1279_v1, %v1280_v52  ;;  %v1206_v21 = vpop.xlane.xlu0 %1205 }
 0x31b   : > { %v1387_v23 = vrot.slane %v1386_v11, 4  ;;  %v1238_v26 = vadd.f32 %v2830_v58, %v1206_v21 }
 0x31c   : > { %v1324_v28 = vsub.f32 %v1235_v2, %v1281_v18  ;;  %v1325_v22 = vsub.f32 %v1236_v19, %v1281_v18 }
 0x31d   : > { %v2317_v31 = vpop.eup %2316  ;;  %v1283_v37 = vsel %vm1245_vm1, %v1238_v26, -inf  ;;  %v1388_v38 = vadd.f32 %v1387_v23, %v1386_v11 }
 0x31e   : > { %v1346_v40 = vmul.f32 1.442695, %v1324_v28  ;;  %v1348_v44 = vmul.f32 1.442695, %v1325_v22  ;;  %v1284_v45 = vmax.f32 %v1282_v33, %v1283_v37  ;;  %v1447_v20 = vmul.f32 0.25, %v2317_v31 }
 0x31f   : > { %v1389_v25 = vrot.slane %v1388_v38, 2 }
 0x320   : > { %2318 = vpow2.f32 %v1346_v40  ;;  %v1285_v4 = vrot.slane %v1284_v45, 4  ;;  %v1456_v15 = vmul.f32 %v2847_v47, %v1447_v20  ;;  %v1457_v54 = vmul.f32 %v2309_v51, %v1447_v20 }
 0x321   : > { %2320 = vpow2.f32 %v1348_v44  ;;  %v1390_v1 = vadd.f32 %v1389_v25, %v1388_v38 }
 0x322   : > { %v1286_v2 = vmax.f32 %v1284_v45, %v1285_v4  ;;  %1482 = vperm.xlu0 %2261, %v1456_v15   ;;  %1487 = vperm.xlu2 %2260, %v1457_v54   ;;  %v1209_v11 = vpop.xlane.xlu1 %1208 }
 0x323   : > { %v1391_v19 = vrot.slane %v1390_v1, 1  ;;  %v1239_v28 = vadd.f32 %v2830_v58, %v1209_v11 }
 0x324   : > { %v1287_v16 = vrot.slane %v1286_v2, 2 }
 0x325   : > { %v1392_v9 = vadd.f32 %v1391_v19, %v1390_v1  ;;  %v1291_v45 = vsel %vm1245_vm1, %v1239_v28, -inf }
 0x326   : > { %v2866_v59 = vpop.eup %2318  ;;  %v1288_v52 = vmax.f32 %v1286_v2, %v1287_v16 }
 0x327   : > { %v2321_v18 = vpop.eup %2320  ;;  %v1393_v21 = vsel %vm1245_vm1, %v2866_v59, 0.0  ;;  %2322 = vrcp.f32 %v1392_v9 }
 0x328   : > { %v1394_v47 = vsel %vm1245_vm1, %v2321_v18, 0.0  ;;  %v1289_v51 = vrot.slane %v1288_v52, 1 }
 0x329   : > { %v1395_v23 = vadd.f32 %v1394_v47, %v1393_v21 }
 0x32a   : > { %v1290_v22 = vmax.f32 %v1288_v52, %v1289_v51  ;;  %v1212_v31 = vpop.xlane.xlu2 %1211 }
 0x32b   : > { %v1396_v33 = vrot.slane %v1395_v23, 4  ;;  %v1240_v37 = vadd.f32 %v2830_v58, %v1212_v31 }
 0x32c   : > { %v1326_v38 = vsub.f32 %v1237_v17, %v1290_v22  ;;  %v1327_v40 = vsub.f32 %v1238_v26, %v1290_v22 }
 0x32d   : > { %v2323_v44 = vpop.eup %2322  ;;  %v1292_v20 = vsel %vm1245_vm1, %v1240_v37, -inf  ;;  %v1397_v25 = vadd.f32 %v1396_v33, %v1395_v23 }
 0x32e   : > { %v1350_v4 = vmul.f32 1.442695, %v1326_v38  ;;  %v1352_v15 = vmul.f32 1.442695, %v1327_v40  ;;  %v1293_v54 = vmax.f32 %v1291_v45, %v1292_v20  ;;  %v1448_v1 = vmul.f32 0.25, %v2323_v44 }
 0x32f   : > { %v1398_v2 = vrot.slane %v1397_v25, 2 }
 0x330   : > { %2324 = vpow2.f32 %v1350_v4  ;;  %v1294_v19 = vrot.slane %v1293_v54, 4  ;;  %v1459_v16 = vmul.f32 %v2315_v8, %v1448_v1  ;;  %v1458_v9 = vmul.f32 %v2856_v61, %v1448_v1 }
 0x331   : > { %2326 = vpow2.f32 %v1352_v15  ;;  %v1399_v52 = vadd.f32 %v1398_v2, %v1397_v25 }
 0x332   : > { %v1295_v17 = vmax.f32 %v1293_v54, %v1294_v19  ;;  %1497 = vperm.xlu2 %2260, %v1459_v16   ;;  %1492 = vperm.xlu1 %2259, %v1458_v9   ;;  %v1215_v23 = vpop.xlane.xlu0 %1214 }
 0x333   : > { %v1400_v26 = vrot.slane %v1399_v52, 1  ;;  %v1241_v38 = vadd.f32 %v2830_v58, %v1215_v23 }
 0x334   : > { %v1296_v11 = vrot.slane %v1295_v17, 2 }
 0x335   : > { %v1401_v21 = vadd.f32 %v1400_v26, %v1399_v52  ;;  %v1300_v54 = vsel %vm1245_vm1, %v1241_v38, -inf }
 0x336   : > { %v2876_v47 = vpop.eup %2324  ;;  %v1297_v51 = vmax.f32 %v1295_v17, %v1296_v11 }
 0x337   : > { %v2327_v22 = vpop.eup %2326  ;;  %v1402_v31 = vsel %vm1245_vm1, %v2876_v47, 0.0  ;;  %2328 = vrcp.f32 %v1401_v21 }
 0x338   : > { %v1403_v8 = vsel %vm1245_vm1, %v2327_v22, 0.0  ;;  %v1298_v61 = vrot.slane %v1297_v51, 1 }
 0x339   : > { %v1404_v33 = vadd.f32 %v1403_v8, %v1402_v31 }
 0x33a   : > { %v1299_v40 = vmax.f32 %v1297_v51, %v1298_v61  ;;  %v1218_v44 = vpop.xlane.xlu1 %1217 }
 0x33b   : > { %v1405_v45 = vrot.slane %v1404_v33, 4  ;;  %v1242_v20 = vadd.f32 %v2830_v58, %v1218_v44 }
 0x33c   : > { %v1328_v25 = vsub.f32 %v1239_v28, %v1299_v40  ;;  %v1329_v4 = vsub.f32 %v1240_v37, %v1299_v40 }
 0x33d   : > { %v2329_v15 = vpop.eup %2328  ;;  %v1301_v1 = vsel %vm1245_vm1, %v1242_v20, -inf  ;;  %v1406_v2 = vadd.f32 %v1405_v45, %v1404_v33 }
 0x33e   : > { %v1354_v19 = vmul.f32 1.442695, %v1328_v25  ;;  %v1356_v16 = vmul.f32 1.442695, %v1329_v4  ;;  %v1302_v9 = vmax.f32 %v1300_v54, %v1301_v1  ;;  %v1449_v52 = vmul.f32 0.25, %v2329_v15 }
 0x33f   : > { %v1407_v17 = vrot.slane %v1406_v2, 2 }
 0x340   : > { %2330 = vpow2.f32 %v1354_v19  ;;  %v1303_v26 = vrot.slane %v1302_v9, 4  ;;  %v1461_v11 = vmul.f32 %v2321_v18, %v1449_v52  ;;  %v1460_v21 = vmul.f32 %v2866_v59, %v1449_v52 }
 0x341   : > { %2332 = vpow2.f32 %v1356_v16  ;;  %v1408_v51 = vadd.f32 %v1407_v17, %v1406_v2 }
 0x342   : > { %v1304_v28 = vmax.f32 %v1302_v9, %v1303_v26  ;;  %1507 = vperm.xlu2 %2260, %v1461_v11   ;;  %1502 = vperm.xlu1 %2259, %v1460_v21   ;;  %v1221_v33 = vpop.xlane.xlu2 %1220 }
 0x343   : > { %v1409_v37 = vrot.slane %v1408_v51, 1  ;;  %v1243_v59 = vadd.f32 %v2830_v58, %v1221_v33 }
 0x344   : > { %v1305_v23 = vrot.slane %v1304_v28, 2 }
 0x345   : > { %v1410_v31 = vadd.f32 %v1409_v37, %v1408_v51  ;;  %v1309_v9 = vsel %vm1245_vm1, %v1243_v59, -inf }
 0x346   : > { %v2331_v8 = vpop.eup %2330  ;;  %v1306_v61 = vmax.f32 %v1304_v28, %v1305_v23 }
 0x347   : > { %v2333_v40 = vpop.eup %2332  ;;  %v1411_v44 = vsel %vm1245_vm1, %v2331_v8, 0.0  ;;  %2334 = vrcp.f32 %v1410_v31 }
 0x348   : > { %v1412_v45 = vsel %vm1245_vm1, %v2333_v40, 0.0  ;;  %v1307_v18 = vrot.slane %v1306_v61, 1 }
 0x349   : > { %v1413_v25 = vadd.f32 %v1412_v45, %v1411_v44 }
 0x34a   : > { %v1308_v4 = vmax.f32 %v1306_v61, %v1307_v18  ;;  %v1224_v15 = vpop.xlane.xlu0 %1223 }
 0x34b   : > { %v1414_v54 = vrot.slane %v1413_v25, 4  ;;  %v1244_v1 = vadd.f32 %v2830_v58, %v1224_v15 }
 0x34c   : > { %v1330_v2 = vsub.f32 %v1241_v38, %v1308_v4  ;;  %v1331_v19 = vsub.f32 %v1242_v20, %v1308_v4 }
 0x34d   : > { %v2335_v16 = vpop.eup %2334  ;;  %v1310_v52 = vsel %vm1245_vm1, %v1244_v1, -inf  ;;  %v1415_v17 = vadd.f32 %v1414_v54, %v1413_v25 }
 0x34e   : > { %v1358_v26 = vmul.f32 1.442695, %v1330_v2  ;;  %v1360_v11 = vmul.f32 1.442695, %v1331_v19  ;;  %v1311_v21 = vmax.f32 %v1309_v9, %v1310_v52  ;;  %v1450_v51 = vmul.f32 0.25, %v2335_v16 }
 0x34f   : > { %v1416_v28 = vrot.slane %v1415_v17, 2 }
 0x350   : > { %2336 = vpow2.f32 %v1358_v26  ;;  %v1312_v37 = vrot.slane %v1311_v21, 4  ;;  %v1463_v23 = vmul.f32 %v2327_v22, %v1450_v51  ;;  %v1462_v31 = vmul.f32 %v2876_v47, %v1450_v51 }
 0x351   : > { %2338 = vpow2.f32 %v1360_v11  ;;  %v1417_v58 = vadd.f32 %v1416_v28, %v1415_v17 }
 0x352   : > { %v1313_v38 = vmax.f32 %v1311_v21, %v1312_v37  ;;  %1517 = vperm.xlu0 %2261, %v1463_v23   ;;  %1512 = vperm.xlu1 %2259, %v1462_v31  }
 0x353   : > { %v1418_v20 = vrot.slane %v1417_v58, 1 }
 0x354   : > { %v1314_v61 = vrot.slane %v1313_v38, 2 }
 0x355   : > { %v1419_v33 = vadd.f32 %v1418_v20, %v1417_v58 }
 0x356   : > { %v2337_v44 = vpop.eup %2336  ;;  %v1315_v45 = vmax.f32 %v1313_v38, %v1314_v61 }
 0x357   : > { %v2339_v18 = vpop.eup %2338  ;;  %v1420_v25 = vsel %vm1245_vm1, %v2337_v44, 0.0  ;;  %2340 = vrcp.f32 %v1419_v33 }
 0x358   : > { %v1421_v4 = vsel %vm1245_vm1, %v2339_v18, 0.0  ;;  %v1316_v15 = vrot.slane %v1315_v45, 1 }
 0x359   : > { %v1422_v22 = vadd.f32 %v1421_v4, %v1420_v25 }
 0x35a   : > { %v1317_v54 = vmax.f32 %v1315_v45, %v1316_v15 }
 0x35b   : > { %v1423_v47 = vrot.slane %v1422_v22, 4 }
 0x35c   : > { %v1332_v2 = vsub.f32 %v1243_v59, %v1317_v54  ;;  %v1333_v19 = vsub.f32 %v1244_v1, %v1317_v54  ;;  %v2208_v54 = vld [vmem:[#allocation7 + $0x38] sm:$0xff] }
 0x35d   : > { %v2341_v16 = vpop.eup %2340  ;;  %v1424_v9 = vadd.f32 %v1423_v47, %v1422_v22  ;;  %1730 = vmatpush.bf16.msrb.mxu0 %v2208_v54 }
 0x35e   : > { %v1362_v52 = vmul.f32 1.442695, %v1332_v2  ;;  %v1364_v17 = vmul.f32 1.442695, %v1333_v19  ;;  %v1451_v26 = vmul.f32 0.25, %v2341_v16 }
 0x35f   : > { %v1425_v11 = vrot.slane %v1424_v9, 2 }
 0x360   : > { %2342 = vpow2.f32 %v1362_v52  ;;  %v1464_v21 = vmul.f32 %v2331_v8, %v1451_v26  ;;  %v1465_v51 = vmul.f32 %v2333_v40, %v1451_v26  ;;  %v2206_v52 = vld [vmem:[#allocation7 + $0x28] sm:$0xff] }
 0x361   : > { %2344 = vpow2.f32 %v1364_v17  ;;  %v1426_v28 = vadd.f32 %v1425_v11, %v1424_v9  ;;  %v2207_v9 = vld [vmem:[#allocation7 + $0x30] sm:$0xff] }
 0x362   : > { %1522 = vperm.xlu2 %2260, %v1464_v21   ;;  %1527 = vperm.xlu1 %2259, %v1465_v51   ;;  %v2203_v51 = vld [vmem:[#allocation7 + $0x10] sm:$0xff] }
 0x363   : > { %v1427_v37 = vrot.slane %v1426_v28, 1  ;;  %1731 = vmatpush.bf16.msrb.mxu0 %v2207_v9 }
 0x365   : > { %v1428_v23 = vadd.f32 %v1427_v37, %v1426_v28 }
 0x366   : > { %v2343_v31 = vpop.eup %2342 }
 0x367   : > { %v2345_v58 = vpop.eup %2344  ;;  %v1429_v59 = vsel %vm1245_vm1, %v2343_v31, 0.0  ;;  %2346 = vrcp.f32 %v1428_v23  ;;  %1732 = vmatpush.bf16.msrb.mxu0 %v2206_v52 }
 0x368   : > { %v1430_v1 = vsel %vm1245_vm1, %v2345_v58, 0.0 }
 0x369   : > { %v1431_v38 = vadd.f32 %v1430_v1, %v1429_v59  ;;  %v2202_v59 = vld [vmem:[#allocation7 + $0x8] sm:$0xff] }
 0x36b   : > { %v1432_v20 = vrot.slane %v1431_v38, 4 }
 0x36c   : > { %v1478_v17 = vpop.permute.xlu2 %1477 }
 0x36d   : > { %v2347_v61 = vpop.eup %2346  ;;  %v1433_v33 = vadd.f32 %v1432_v20, %v1431_v38  ;;  %v1551_v39 = vmul.f32 %v1478_v17, %v1001_v30 }
 0x36e   : > { %v1452_v45 = vmul.f32 0.25, %v2347_v61 }
 0x36f   : > { %v1434_v8 = vrot.slane %v1433_v33, 2 }
 0x370   : > { %v1467_v40 = vmul.f32 %v2339_v18, %v1452_v45  ;;  %v1466_v25 = vmul.f32 %v2337_v44, %v1452_v45  ;;  %v2205_v18 = vld [vmem:[#allocation7 + $0x20] sm:$0xff]  ;;  %v2204_v44 = vld [vmem:[#allocation7 + $0x18] sm:$0xff] }
 0x371   : > { %v1435_v4 = vadd.f32 %v1434_v8, %v1433_v33  ;;  %1733 = vmatpush.bf16.msrb.mxu0 %v2205_v18  ;;  %v2215_v18 = vld [vmem:[%s2987_s13 + $0x30] sm:$0xff] }
 0x372   : > { %1537 = vperm.xlu2 %2260, %v1467_v40   ;;  %1532 = vperm.xlu0 %2261, %v1466_v25  }
 0x373   : > { %v1436_v15 = vrot.slane %v1435_v4, 1  ;;  %1814 = vmatpush.bf16.msrb.mxu1 %v2215_v18 }
 0x375   : > { %v1437_v22 = vadd.f32 %v1436_v15, %v1435_v4  ;;  %1734 = vmatpush.bf16.msrb.mxu0 %v2204_v44 }
 0x377   : > { %2348 = vrcp.f32 %v1437_v22 }
 0x379   : > { %1735 = vmatpush.bf16.msrb.mxu0 %v2203_v51 }
 0x37c   : > { %v1488_v11 = vpop.permute.xlu2 %1487 }
 0x37d   : > { %v2349_v47 = vpop.eup %2348  ;;  %1736 = vmatpush.bf16.msrb.mxu0 %v2202_v59  ;;  %v1553_v45 = vmul.f32 %v1488_v11, %v1003_v36 }
 0x37e   : > { %v1453_v2 = vmul.f32 0.25, %v2349_v47 }
 0x380   : > { %v1469_v19 = vmul.f32 %v2345_v58, %v1453_v2  ;;  %v1468_v16 = vmul.f32 %v2343_v31, %v1453_v2 }
 0x381   : > { %1737 = vmatpush.bf16.msrb.mxu0 %v2201_v62 }
 0x382   : > { %1547 = vperm.xlu0 %2261, %v1469_v19   ;;  %1542 = vperm.xlu1 %2259, %v1468_v16  }
 0x384   : > { %v1473_v26 = vpop.permute.xlu1 %1472 }
 0x385   : > { %v1550_v8 = vmul.f32 %v1473_v26, %v1000_v24 }
 0x38c   : > { %v1498_v28 = vpop.permute.xlu2 %1497 }
 0x38d   : > { %v1555_v25 = vmul.f32 %v1498_v28, %v1005_v43 }
 0x394   : > { %v1483_v31 = vpop.permute.xlu0 %1482 }
 0x395   : > { %v1552_v38 = vmul.f32 %v1483_v31, %v1002_v35 }
 0x397   : > { %v1573_v34 = vadd.f32 %v1553_v45, %v1552_v38 }
 0x399   : > { %v1574_v53 = vrot.slane %v1573_v34, 4 }
 0x39b   : > { %v1575_v4 = vadd.f32 %v1574_v53, %v1573_v34 }
 0x39c   : > { %v1508_v23 = vpop.permute.xlu2 %1507 }
 0x39d   : > { %v1557_v27 = vmul.f32 %v1508_v23, %v1007_v50  ;;  %v1576_v19 = vrot.slane %v1575_v4, 2 }
 0x39f   : > { %v1577_v44 = vadd.f32 %v1576_v19, %v1575_v4 }
 0x3a1   : > { %v1578_v23 = vrot.slane %v1577_v44, 1 }
 0x3a4   : > { %v1493_v21 = vpop.permute.xlu1 %1492 }
 0x3a5   : > { %v1554_v61 = vmul.f32 %v1493_v21, %v1004_v42  ;;  %v1566_v42 = vadd.f32 %v1551_v39, %v1550_v8 }
 0x3a7   : > { %v1580_v36 = vadd.f32 %v1555_v25, %v1554_v61  ;;  %v1567_v30 = vrot.slane %v1566_v42, 4  ;;  %v1579_v25 = vadd.f32 %v1578_v23, %v1577_v44  ;;  %v2268_v44 = vld [vmem:[%s2986_s12] ss:$0 sm:$0xff] }
 0x3a9   : > { %v1568_v22 = vadd.f32 %v1567_v30, %v1566_v42  ;;  %v1623_v12 = vpack.c.bf16 %v1579_v25, %v1579_v25 }
 0x3ab   : > { %v1569_v5 = vrot.slane %v1568_v22, 2 }
 0x3ad   : > { %v1570_v21 = vadd.f32 %v1569_v5, %v1568_v22 }
 0x3b4   : > { %v1503_v37 = vpop.permute.xlu1 %1502 }
 0x3b5   : > { %v1556_v40 = vmul.f32 %v1503_v37, %v1006_v49  ;;  %v2214_v37 = vld [vmem:[%s2987_s13 + $0x28] sm:$0xff] }
 0x3b6   : > { %1815 = vmatpush.bf16.msrb.mxu1 %v2214_v37 }
 0x3b7   : > { %v1587_v41 = vadd.f32 %v1557_v27, %v1556_v40  ;;  %v2213_v40 = vld [vmem:[%s2987_s13 + $0x20] sm:$0xff] }
 0x3ba   : > { %1816 = vmatpush.bf16.msrb.mxu1 %v2213_v40 }
 0x3bc   : > { %v1523_v1 = vpop.permute.xlu2 %1522 }
 0x3bd   : > { %v1560_v43 = vmul.f32 %v1523_v1, %v1010_v63 }
 0x3be   : > { %1817 = vmatpush.bf16.msrb.mxu1 %v2212_v10 }
 0x3c4   : > { %v1513_v58 = vpop.permute.xlu1 %1512  ;;  %v1518_v20 = vpop.permute.xlu0 %1517 }
 0x3c5   : > { %v1558_v32 = vmul.f32 %v1513_v58, %v1008_v56  ;;  %v1559_v35 = vmul.f32 %v1518_v20, %v1009_v57  ;;  %v1581_v56 = vrot.slane %v1580_v36, 4  ;;  %v1588_v57 = vrot.slane %v1587_v41, 4 }
 0x3c6   : > { %v1571_v20 = vrot.slane %v1570_v21, 1 }
 0x3c7   : > { %v1594_v46 = vadd.f32 %v1559_v35, %v1558_v32  ;;  %v1582_v63 = vadd.f32 %v1581_v56, %v1580_v36  ;;  %v1589_v54 = vadd.f32 %v1588_v57, %v1587_v41  ;;  %v2211_v56 = vld [vmem:[%s2987_s13 + $0x10] sm:$0xff] }
 0x3c8   : > { %v1572_v27 = vadd.f32 %v1571_v20, %v1570_v21  ;;  %1818 = vmatpush.bf16.msrb.mxu1 %v2211_v56 }
 0x3c9   : > { %v1583_v9 = vrot.slane %v1582_v63, 2 }
 0x3cb   : > { %v1584_v26 = vadd.f32 %v1583_v9, %v1582_v63 }
 0x3cc   : > { %v1538_v49 = vpop.permute.xlu2 %1537 }
 0x3cd   : > { %v1563_v48 = vmul.f32 %v1538_v49, %v1013_v7  ;;  %v1585_v58 = vrot.slane %v1584_v26, 1 }
 0x3cf   : > { %v1586_v39 = vadd.f32 %v1585_v58, %v1584_v26 }
 0x3d1   : > { %v1624_v41 = vpack.c.bf16 %v1586_v39, %v1586_v39 }
 0x3d4   : > { %v1528_v33 = vpop.permute.xlu1 %1527 }
 0x3d5   : > { %v1561_v24 = vmul.f32 %v1528_v33, %v1011_v0  ;;  %v1595_v0 = vrot.slane %v1594_v46, 4 }
 0x3d7   : > { %v1601_v55 = vadd.f32 %v1561_v24, %v1560_v43  ;;  %v1596_v2 = vadd.f32 %v1595_v0, %v1594_v46  ;;  %v1622_v46 = vpack.c.bf16 %v1572_v27, %v1572_v27 }
 0x3d9   : > { %v1602_v15 = vrot.slane %v1601_v55, 4  ;;  %v1597_v7 = vrot.slane %v1596_v2, 2  ;;  %v1658_v62 = vunpack.c.l.b16 %v1622_v46 }
 0x3db   : > { %v1603_v16 = vadd.f32 %v1602_v15, %v1601_v55  ;;  %v1598_v28 = vadd.f32 %v1597_v7, %v1596_v2 }
 0x3dd   : > { %v1604_v17 = vrot.slane %v1603_v16, 2  ;;  %v1599_v8 = vrot.slane %v1598_v28, 1 }
 0x3df   : > { %v1605_v31 = vadd.f32 %v1604_v17, %v1603_v16  ;;  %v1600_v42 = vadd.f32 %v1599_v8, %v1598_v28  ;;  %v2269_v28 = vld [vmem:[%s2988_s14] ss:$0 sm:$0xff] }
 0x3e1   : > { %v1606_v32 = vrot.slane %v1605_v31, 1  ;;  %v1626_v55 = vpack.c.bf16 %v1600_v42, %v1600_v42 }
 0x3e3   : > { %v1662_v15 = vunpack.c.l.b16 %v1626_v55 }
 0x3e4   : > { %v1533_v29 = vpop.permute.xlu0 %1532 }
 0x3e5   : > { %v1562_v50 = vmul.f32 %v1533_v29, %v1012_v6  ;;  %v1590_v6 = vrot.slane %v1589_v54, 2  ;;  %v1659_v29 = vunpack.c.l.b16 %v1623_v12 }
 0x3e7   : > { %v1608_v60 = vadd.f32 %v1563_v48, %v1562_v50  ;;  %v1591_v51 = vadd.f32 %v1590_v6, %v1589_v54  ;;  %v1660_v48 = vunpack.c.l.b16 %v1624_v41  ;;  %v1667_v63 = vsel %vm1666_vm2, %v1659_v29, %v1658_v62 }
 0x3e9   : > { %v1609_v47 = vrot.slane %v1608_v60, 4  ;;  %v1592_v61 = vrot.slane %v1591_v51, 1 }
 0x3eb   : > { %v1610_v52 = vadd.f32 %v1609_v47, %v1608_v60  ;;  %v1593_v24 = vadd.f32 %v1592_v61, %v1591_v51  ;;  %v2210_v60 = vld [vmem:[%s2987_s13 + $0x8] sm:$0xff]  ;;  %v1669_v47 = vsel %vm1668_vm3, %v1660_v48, %v1667_v63 }
 0x3ec   : > { %1819 = vmatpush.bf16.msrb.mxu1 %v2210_v60 }
 0x3ed   : > { %v1611_v11 = vrot.slane %v1610_v52, 2  ;;  %v1625_v49 = vpack.c.bf16 %v1593_v24, %v1593_v24 }
 0x3ef   : > { %v1612_v59 = vadd.f32 %v1611_v11, %v1610_v52  ;;  %v1661_v0 = vunpack.c.l.b16 %v1625_v49  ;;  %v2209_v52 = vld [vmem:[%s2987_s13] sm:$0xff] }
 0x3f0   : > { %1820 = vmatpush.bf16.msrb.mxu1 %v2209_v52 }
 0x3f1   : > { %v1613_v34 = vrot.slane %v1612_v59, 1  ;;  %v1671_v16 = vsel %vm1670_vm4, %v1661_v0, %v1669_v47 }
 0x3f2   : > { %v1673_v9 = vsel %vm1672_vm5, %v1662_v15, %v1671_v16 }
 0x3f3   : > { %v1614_v43 = vadd.f32 %v1613_v34, %v1612_v59 }
 0x3f4   : > { %v1543_v1 = vpop.permute.xlu1 %1542  ;;  %v1548_v38 = vpop.permute.xlu0 %1547 }
 0x3f5   : > { %v1564_v33 = vmul.f32 %v1543_v1, %v1014_v13  ;;  %v1565_v45 = vmul.f32 %v1548_v38, %v1015_v14  ;;  %v1607_v13 = vadd.f32 %v1606_v32, %v1605_v31  ;;  %v1628_v50 = vpack.c.bf16 %v1614_v43, %v1614_v43 }
 0x3f7   : > { %v1615_v35 = vadd.f32 %v1565_v45, %v1564_v33  ;;  %v1627_v30 = vpack.c.bf16 %v1607_v13, %v1607_v13  ;;  %v1664_v2 = vunpack.c.l.b16 %v1628_v50 }
 0x3f9   : > { %v1616_v36 = vrot.slane %v1615_v35, 4  ;;  %v1663_v22 = vunpack.c.l.b16 %v1627_v30 }
 0x3fb   : > { %v1617_v14 = vadd.f32 %v1616_v36, %v1615_v35  ;;  %v1675_v5 = vsel %vm1674_vm6, %v1663_v22, %v1673_v9 }
 0x3fc   : > { %v1677_v6 = vsel %vm1676_vm7, %v1664_v2, %v1675_v5 }
 0x3fd   : > { %v1618_v53 = vrot.slane %v1617_v14, 2 }
 0x3ff   : > { %v1619_v57 = vadd.f32 %v1618_v53, %v1617_v14 }
 0x401   : > { %v1620_v4 = vrot.slane %v1619_v57, 1 }
 0x403   : > { %v1621_v54 = vadd.f32 %v1620_v4, %v1619_v57 }
 0x405   : > { %v1629_v19 = vpack.c.bf16 %v1621_v54, %v1621_v54 }
 0x407   : > { %v1665_v3 = vunpack.c.l.b16 %v1629_v19 }
 0x409   : > { %v1679_v7 = vsel %vm1678_vm8, %v1665_v3, %v1677_v6 }
 0x40a   : > { %v1680_v18 = vpack.c.b16 %v1679_v7, %v1679_v7 }
 0x40c   : > { %1738 = vmatmul.bf16.vlgmr.msrb.gmra.mxu0 %v1680_v18 }
 0x489   : > { %v1739_v17 = vpop.f32.mrf.mxu0 }
 0x48a   : > { %v1740_v26 = vadd.f32 %v2268_v44, %v1739_v17 }
 0x48c   : > { %v1743_v11 = vmax.f32 %v1740_v26, 0.0 }
 0x48e   : > { %v1744_v21 = vpack.c.bf16 %v1743_v11, %v1743_v11 }
 0x490   : > { %1821 = vmatmul.bf16.vlgmr.msrb.gmra.mxu1 %v1744_v21 }
 0x491   : > { %v1741_v51 = vpop.f32.mrf.mxu0 }
 0x50d   : > { %v1822_v37 = vpop.f32.mrf.mxu1 }
 0x50e   : > { %v1823_v23 = vadd.f32 %v2269_v28, %v1822_v37 }
 0x510   : > { %v1827_v31 = vrot.slane %v1823_v23, 1  ;;  %v1828_v58 = vrot.slane %v1823_v23, 2  ;;  %v1829_v59 = vrot.slane %v1823_v23, 3  ;;  %1842 = vst.msk [vmem:[%s549_s16] sm:$0x1] %vm1841_vm9, %v1823_v23  ;;  %v1830_v1 = vrot.slane %v1823_v23, 4 }
 0x511   : > { %v1831_v38 = vrot.slane %v1823_v23, 5  ;;  %v1832_v20 = vrot.slane %v1823_v23, 6  ;;  %v1833_v61 = vrot.slane %v1823_v23, 7 }
 0x512   : > { %1843 = vst.msk [vmem:[%s549_s16 + $0x1] sm:$0x1] %vm1841_vm9, %v1827_v31 }
 0x513   : > { %1844 = vst.msk [vmem:[%s549_s16 + $0x2] sm:$0x1] %vm1841_vm9, %v1828_v58 }
 0x514   : > { %1845 = vst.msk [vmem:[%s549_s16 + $0x3] sm:$0x1] %vm1841_vm9, %v1829_v59 }
 0x515   : > { %1846 = vst.msk [vmem:[%s549_s16 + $0x4] sm:$0x1] %vm1841_vm9, %v1830_v1  ;;  %v1824_v33 = vpop.f32.mrf.mxu1 }
 0x516   : > { %1847 = vst.msk [vmem:[%s549_s16 + $0x5] sm:$0x1] %vm1841_vm9, %v1831_v38 }
 0x517   : > { %1848 = vst.msk [vmem:[%s549_s16 + $0x6] sm:$0x1] %vm1841_vm9, %v1832_v20 }
 0x518   : > { %1849 = vst.msk [vmem:[%s549_s16 + $0x7] sm:$0x1] %vm1841_vm9, %v1833_v61 }
 0x519 PF: > { %s29_s20 = sadd.s32 1, %s2454_s20  }
 0x51a   : > { %p26_p7 = scmp.ge.s32.totalorder %s29_s20, 4  }
 0x51c   :  { %28 = sbr.rel (!%p26_p7) target bundleno = 5 (0x5), region = 123 }
 0x521   :  { %1870 = vsyncpa [#allocation4], 1 }
 0x522   :  { %1872 = vsyncpa [#allocation4 + $0x1], 1 }
 0x523   :  { %1873 = vsyncpa [#allocation6], 1 }

</bundles_post_ra>
